<compile_context>
chip_gen: v6e
topology: v6e:2x2x1
jax: 0.10.0
libtpu: 0.0.40
codegen_flags: <defaults>
</compile_context>

<pallas_src>
import numpy as np

import jax
import jax.numpy as jnp
from jax.experimental import pallas as pl
from jax.experimental.pallas import tpu as pltpu

F32 = jnp.float32
CSTD = 8
CLUSTER_INPUT_SIZE = 200
SEL_ROWS = 128          # sublane height of the packed selection-matrix slab


def _conv_len(l, k, s, p=0):
    return (l + 2 * p - k) // s + 1


def _tconv_len(l, k, s, p=0):
    return (l - 1) * s + k - 2 * p


# Static length chain (fc4 always emits 128 features -> conv1 sees length 128).
L_FC4 = 128
L_CONV1 = _conv_len(L_FC4, 3, 2, 1)      # 64
L_CONV3 = _conv_len(L_CONV1, 2, 2, 0)    # 32
L_CONV6 = _conv_len(L_CONV3, 3, 2, 0)    # 15
L_CONV8 = _conv_len(L_CONV6, 3, 2, 1)    # 8
L_OUT = _conv_len(L_CONV8, 2, 2, 0)      # 4

# (stride, pad) per conv of the RAB mask branches (kernel size from weights).
RAB5_DOWN = ((2, 0), (2, 0), (2, 0))     # DownUp1D.downsample1: k3s2, k3s2, k3s2
RAB5_UP = ((2, 0), (2, 0), (2, 0))       # DownUp1D.upsample1
RAB9_DOWN = ((1, 0), (2, 0), (1, 0))     # DownUp1D.downsample2: k2s1, k3s2, k2s1
RAB9_UP = ((1, 0), (2, 0), (1, 0))       # DownUp1D.upsample2


# --------------------------- host-side packing (runs once) ---------------------------

class _Packer:
    """Packs small (r <= rows, w) f32 arrays side by side along the lane axis."""

    def __init__(self, rows):
        self.rows = rows
        self.chunks = []
        self.width = 0

    def add(self, arr):
        arr = np.asarray(arr, np.float32)
        if arr.ndim == 1:
            arr = arr.reshape(-1, 1)
        r, w = arr.shape
        assert r <= self.rows, (r, self.rows)
        padded = np.zeros((self.rows, w), np.float32)
        padded[:r] = arr
        off = self.width
        self.chunks.append(padded)
        self.width += w
        return off

    def finalize(self):
        wpad = max(128, ((self.width + 127) // 128) * 128)
        slab = np.zeros((self.rows, wpad), np.float32)
        if self.chunks:
            slab[:, :self.width] = np.concatenate(self.chunks, axis=1)
        return jnp.asarray(slab)


def _sel_conv_np(lin, lout, stride, offset):
    # S[i, t] = 1 iff i == t*stride + offset (offset = tap - pad); OOB -> zero pad.
    s = np.zeros((lin, lout), np.float32)
    for t in range(lout):
        i = t * stride + offset
        if 0 <= i < lin:
            s[i, t] = 1.0
    return s


def _sel_tconv_np(lin, lout, stride, offset):
    # Scatter form for ConvTranspose1d: S[i, t] = 1 iff t == i*stride + offset.
    s = np.zeros((lin, lout), np.float32)
    for i in range(lin):
        t = i * stride + offset
        if 0 <= t < lout:
            s[i, t] = 1.0
    return s


class _SelBank:
    """Precomputed, de-duplicated 0/1 tap-selection matrices (packed once)."""

    def __init__(self, packer):
        self.packer = packer
        self.cache = {}

    def get(self, kind, lin, lout, stride, offset):
        key = (kind, lin, lout, stride, offset)
        if key not in self.cache:
            fn = _sel_conv_np if kind == "c" else _sel_tconv_np
            self.cache[key] = self.packer.add(fn(lin, lout, stride, offset))
        return self.cache[key]


def _plan_conv(theta, bank, w, b, lin, stride, pad, *, relu=False, transposed=False):
    """Static plan for one Conv1d / ConvTranspose1d (weights packed into theta)."""
    w = np.asarray(w, np.float32)
    if transposed:
        cin, cout, k = w.shape
        # [co, j*Cin+ci] = w[ci, co, j]
        wcat = np.transpose(w, (1, 2, 0)).reshape(cout, k * cin)
        lout = _tconv_len(lin, k, stride, pad)
        kind = "t"
    else:
        cout, cin, k = w.shape
        # [co, j*Cin+ci] = w[co, ci, j]
        wcat = np.transpose(w, (0, 2, 1)).reshape(cout, k * cin)
        lout = _conv_len(lin, k, stride, pad)
        kind = "c"
    sel = [bank.get(kind, lin, lout, stride, j - pad) for j in range(k)]
    plan = dict(
        w_off=theta.add(wcat), kcin=k * cin, cout=cout,
        b_off=(None if b is None else theta.add(np.asarray(b, np.float32).reshape(-1, 1))),
        lin=lin, lout=lout, sel=sel, relu=relu)
    return plan, lout


def _np(a):
    return np.asarray(jax.device_get(a), np.float32)


def prepare_params(params, c=CSTD):
    """One-time parameter prep (host-side, hoisted out of the jitted hot path)."""
    theta = _Packer(c)
    selp = _Packer(SEL_ROWS)
    bank = _SelBank(selp)
    plan = {}

    # ---- fc1..fc4 folded into ONE affine map (no nonlinearity between them). ----
    (w1, b1), (w2, b2), (w3, b3), (w4, b4) = (params["fc1"], params["fc2"],
                                              params["fc3"], params["fc4"])
    w1, b1, w2, b2, w3, b3, w4, b4 = map(_np, (w1, b1, w2, b2, w3, b3, w4, b4))
    w_eff = w1.T @ w2.T @ w3.T @ w4.T                              # (cluster, 128)
    b_eff = ((b1 @ w2.T + b2) @ w3.T + b3) @ w4.T + b4             # (128,)
    plan["fc_b_off"] = theta.add(b_eff.reshape(1, -1))

    def conv(name, lin, stride, pad):
        w, b = params[name]
        p, lout = _plan_conv(theta, bank, _np(w), _np(b), lin, stride, pad)
        plan[name] = p
        return lout

    def gdn(name):
        beta, gamma = params[name]
        plan[name] = dict(g_off=theta.add(_np(gamma)),
                          b_off=theta.add(_np(beta).reshape(-1, 1)))

    def block(bp, lin):
        c1, _ = _plan_conv(theta, bank, _np(bp["w1"]), _np(bp["b1"]), lin, 1, 1, relu=True)
        c2, _ = _plan_conv(theta, bank, _np(bp["w2"]), _np(bp["b2"]), lin, 1, 1, relu=False)
        return {"c1": c1, "c2": c2}

    def rab(name, lin, down_cfg, up_cfg):
        rp = params[name]
        out = {"t1": block(rp["t1"], lin), "t2": block(rp["t2"], lin)}
        cur, down = lin, []
        for i, ((w, b), (s, p)) in enumerate(zip(rp["down"], down_cfg)):
            cp, cur = _plan_conv(theta, bank, _np(w), _np(b), cur, s, p,
                                 relu=(i < len(down_cfg) - 1))
            down.append(cp)
        out["down"] = down
        out["m"] = block(rp["m"], cur)
        up = []
        for i, ((w, b), (s, p)) in enumerate(zip(rp["up"], up_cfg)):
            cp, cur = _plan_conv(theta, bank, _np(w), _np(b), cur, s, p,
                                 relu=(i < len(up_cfg) - 1), transposed=True)
            up.append(cp)
        out["up"] = up
        plan[name] = out

    l = conv("conv1", L_FC4, 2, 1)           # 128 -> 64
    gdn("gdn2")
    l = conv("conv3", l, 2, 0)               # 64 -> 32
    gdn("gdn4")
    rab("rnab5", l, RAB5_DOWN, RAB5_UP)      # 32
    l = conv("conv6", l, 2, 0)               # 32 -> 15
    gdn("gdn7")
    l = conv("conv8", l, 2, 1)               # 15 -> 8
    rab("rnab9", l, RAB9_DOWN, RAB9_UP)      # 8
    conv("convA", L_CONV1, 8, 0)             # 64 -> 8
    conv("convB", L_CONV3, 4, 0)             # 32 -> 8
    conv("convC", L_CONV6, 2, 1)             # 15 -> 8

    # conv10: split the (C, 4C, 2) weight into 4 per-source groups so no
    # sublane concat of [h, ha, hb, hc] is needed in-kernel.
    w10, b10 = params["conv10"]
    w10 = _np(w10)
    groups = []
    for g in range(4):
        p, _ = _plan_conv(theta, bank, w10[:, g * c:(g + 1) * c, :], None, L_CONV8, 2, 0)
        groups.append(p)
    plan["conv10"] = {"groups": groups, "b_off": theta.add(_np(b10).reshape(-1, 1))}

    return jnp.asarray(w_eff), theta.finalize(), selp.finalize(), plan


# --------------------------- the fused kernel ---------------------------

def _make_kernel(plan):
    c = CSTD

    def kernel(x_ref, wfc_ref, theta_ref, sel_ref, out_ref):
        def wslice(off, rows, width):
            return theta_ref[0:rows, off:off + width]

        def conv(x, cp):
            # k tap slices via precomputed 0/1 selection matrices, stacked along
            # sublanes (im2col) and hit with ONE (Cout, k*Cin) weight matmul.
            taps = [jnp.dot(x, sel_ref[0:cp["lin"], o:o + cp["lout"]],
                            preferred_element_type=F32) for o in cp["sel"]]
            xcol = taps[0] if len(taps) == 1 else jnp.concatenate(taps, axis=0)
            y = jnp.dot(wslice(cp["w_off"], cp["cout"], cp["kcin"]), xcol,
                        preferred_element_type=F32)
            if cp["b_off"] is not None:
                y = y + wslice(cp["b_off"], cp["cout"], 1)
            if cp["relu"]:
                y = jnp.maximum(y, 0.0)
            return y

        def gdn(x, gp):
            # TODO(synk): GDN class body not provided; standard forward (divisive) GDN.
            z = jnp.dot(wslice(gp["g_off"], c, c), x * x,
                        preferred_element_type=F32) + wslice(gp["b_off"], c, 1)
            return x * jax.lax.rsqrt(z)

        def block(x, bp):
            # TODO(synk): Block class body not provided; conv3(p=1)+ReLU+conv3(p=1)+residual.
            return x + conv(conv(x, bp["c1"]), bp["c2"])

        def rab(x, rp):
            # TODO(synk): RAB1D class body not provided; out = x + trunk(x)*mask(x), sigmoid=False.
            l = x.shape[1]
            t = block(block(x, rp["t1"]), rp["t2"])
            m = x
            for cp in rp["down"]:
                m = conv(m, cp)
            m = block(m, rp["m"])
            for cp in rp["up"]:
                m = conv(m, cp)
            lm = m.shape[1]
            if lm > l:
                m = m[:, :l]
            elif lm < l:
                m = jnp.concatenate([m, jnp.zeros((m.shape[0], l - lm), F32)], axis=1)
            return x + t * m

        # ---- folded fc1..fc4: one (1,200) @ (200,128) matmul ----
        h = jnp.dot(x_ref[0], wfc_ref[...], preferred_element_type=F32)
        h = h + wslice(plan["fc_b_off"], 1, L_FC4)             # (1, 128)   -> x1

        x = conv(h, plan["conv1"])                             # (C, 64)
        x = gdn(x, plan["gdn2"])
        xa = x                                                 # -> x3
        x = conv(x, plan["conv3"])                             # (C, 32)
        x = gdn(x, plan["gdn4"])
        xb = x
        x = rab(x, plan["rnab5"])                              # (C, 32)    -> x6
        x = conv(x, plan["conv6"])                             # (C, 15)
        x = gdn(x, plan["gdn7"])
        xc = x                                                 # -> x8
        x = conv(x, plan["conv8"])                             # (C, 8)
        x = rab(x, plan["rnab9"])                              # (C, 8)

        ha = conv(xa, plan["convA"])                           # (C, 8)
        hb = conv(xb, plan["convB"])                           # (C, 8)
        hc = conv(xc, plan["convC"])                           # (C, 8)

        # conv10 with its weight split into four per-source groups
        # (no sublane concat of [h, ha, hb, hc]; that concat shape is x10).
        cp10 = plan["conv10"]
        y = conv(x, cp10["groups"][0])
        for g, src in zip(cp10["groups"][1:], (ha, hb, hc)):
            y = y + conv(src, g)
        out_ref[0] = y + wslice(cp10["b_off"], c, 1)           # (C, 4)

    return kernel


# --------------------------- builder / wrapper ---------------------------

def build_encoder(params):
    """Prepare (fold/pack) parameters ONCE; return a jitted forward closure."""
    wfc, theta, sel, plan = prepare_params(params)
    kernel = _make_kernel(plan)

    def _fwd(x, wfc, theta, sel):
        b = x.shape[0]
        return pl.pallas_call(
            kernel,
            grid=(b,),
            in_specs=[
                pl.BlockSpec((1, 1, x.shape[2]), lambda i: (i, 0, 0)),   # per-sample input
                pl.BlockSpec(wfc.shape, lambda i: (0, 0)),               # folded FC weight
                pl.BlockSpec(theta.shape, lambda i: (0, 0)),             # packed small weights
                pl.BlockSpec(sel.shape, lambda i: (0, 0)),               # packed selection mats
            ],
            out_specs=pl.BlockSpec((1, CSTD, L_OUT), lambda i: (i, 0, 0)),
            out_shape=jax.ShapeDtypeStruct((b, CSTD, L_OUT), F32),
            compiler_params=pltpu.CompilerParams(
                dimension_semantics=("parallel",),       # v7x: batch over 2 TCs
                vmem_limit_bytes=32 * 1024 * 1024,
            ),
        )(x, wfc, theta, sel)

    fwd = jax.jit(_fwd)

    def encode(x):
        """Matches TucodecEncode1D4L.forward: returns (h, x1, x3, x6, x8, x10).
        x1..x10 are np.shape(...) results in the reference, i.e. shape tuples."""
        assert x.shape[1] == 1, "TucodecEncode1D4L expects a single input channel"
        h = fwd(x, wfc, theta, sel)
        b = x.shape[0]
        return (h,
                (b, 1, L_FC4),
                (b, CSTD, L_CONV1),
                (b, CSTD, L_CONV3),
                (b, CSTD, L_CONV6),
                (b, 4 * CSTD, L_CONV8))

    return encode


# --------------------------- random parameters (PyTorch layouts) ---------------------------

class _ParamGen:
    def __init__(self, seed):
        self.key = jax.random.PRNGKey(seed)
        self.i = 0

    def __call__(self, shape, scale=0.05):
        self.i += 1
        return scale * jax.random.normal(jax.random.fold_in(self.key, self.i), shape, F32)


def _block_params(g, c):
    return {"w1": g((c, c, 3)), "b1": g((c,)), "w2": g((c, c, 3)), "b2": g((c,))}


def _gdn_params(c):
    return (jnp.ones((c,), F32), 0.1 * jnp.eye(c, dtype=F32))   # (beta, gamma)


def make_params(c=CSTD, cluster=CLUSTER_INPUT_SIZE):
    g = _ParamGen(42)

    def rab(down_ks, up_ks):
        return {
            "t1": _block_params(g, c), "t2": _block_params(g, c),
            "m": _block_params(g, c),
            "down": [(g((c, c, k)), g((c,))) for k in down_ks],   # Conv1d weights
            "up": [(g((c, c, k)), g((c,))) for k in up_ks],       # ConvTranspose1d weights
        }

    return {
        "fc1": (g((1024, cluster)), g((1024,))),
        "fc2": (g((512, 1024)), g((512,))),
        "fc3": (g((256, 512)), g((256,))),
        "fc4": (g((128, 256)), g((128,))),
        "conv1": (g((c, 1, 3)), g((c,))),
        "gdn2": _gdn_params(c),
        "conv3": (g((c, c, 2)), g((c,))),
        "gdn4": _gdn_params(c),
        "rnab5": rab([3, 3, 3], [3, 3, 3]),
        "conv6": (g((c, c, 3)), g((c,))),
        "gdn7": _gdn_params(c),
        "conv8": (g((c, c, 3)), g((c,))),
        "rnab9": rab([2, 3, 2], [2, 3, 2]),
        "convA": (g((c, c, 3)), g((c,))),
        "convB": (g((c, c, 3)), g((c,))),
        "convC": (g((c, c, 3)), g((c,))),
        "conv10": (g((c, 4 * c, 2)), g((c,))),
    }


if __name__ == "__main__":
    params = make_params()
    encode = build_encoder(params)                      # prep/pack runs once, off hot path
    x = jax.random.normal(jax.random.PRNGKey(0), (2, 1, CLUSTER_INPUT_SIZE), F32)
    h, x1, x3, x6, x8, x10 = encode(x)
    h = jax.block_until_ready(h)
    assert h.shape == (2, CSTD, L_OUT), h.shape
    assert x1 == (2, 1, 128), x1
    assert x3 == (2, CSTD, 64), x3
    assert x6 == (2, CSTD, 32), x6
    assert x8 == (2, CSTD, 15), x8
    assert x10 == (2, 4 * CSTD, 8), x10
    assert bool(jnp.all(jnp.isfinite(h)))
    print("KERNEL_OK")
</pallas_src>

<mosaic_0001>
module attributes {stable_mosaic.version = 11 : i64} {
  func.func @kernel(%arg0: i32, %arg1: memref<1x1x200xf32, #tpu.memory_space<vmem>>, %arg2: memref<200x128xf32, #tpu.memory_space<vmem>>, %arg3: memref<8x1024xf32, #tpu.memory_space<vmem>>, %arg4: memref<128x768xf32, #tpu.memory_space<vmem>>, %arg5: memref<1x8x4xf32, #tpu.memory_space<vmem>>) attributes {dimension_semantics = [#tpu.dimension_semantics<parallel>], iteration_bounds = array<i64: 2>, scalar_prefetch = 0 : i64, scratch_operands = 0 : i64, tpu.core_type = #tpu.core_type<tc>, window_params = [{transform_indices = @transform_0, window_bounds = array<i64: 1, 1, 200>}, {pipeline_mode = #tpu.pipeline_mode<synchronous>, transform_indices = @transform_1, window_bounds = array<i64: 200, 128>}, {pipeline_mode = #tpu.pipeline_mode<synchronous>, transform_indices = @transform_2, window_bounds = array<i64: 8, 1024>}, {pipeline_mode = #tpu.pipeline_mode<synchronous>, transform_indices = @transform_3, window_bounds = array<i64: 128, 768>}, {transform_indices = @transform_4, window_bounds = array<i64: 1, 8, 4>}]} {
    %c0 = arith.constant 0 : index
    %c0_0 = arith.constant 0 : index
    %c0_1 = arith.constant 0 : index
    %0 = vector.load %arg1[%c0, %c0_0, %c0_1] : memref<1x1x200xf32, #tpu.memory_space<vmem>>, vector<1x1x200xf32>
    %1 = vector.shape_cast %0 : vector<1x1x200xf32> to vector<1x200xf32>
    %c0_2 = arith.constant 0 : index
    %c0_3 = arith.constant 0 : index
    %2 = vector.load %arg2[%c0_2, %c0_3] : memref<200x128xf32, #tpu.memory_space<vmem>>, vector<200x128xf32>
    %cst = arith.constant dense<0.000000e+00> : vector<1x128xf32>
    %3 = tpu.matmul %1, %2, %cst {dimension_numbers = #tpu.dot_dimension_numbers<[1], [0], [0], [1], [0, 0, 1, 1], [], []>} : vector<1x200xf32>, vector<200x128xf32>, vector<1x128xf32> -> vector<1x128xf32>
    %c0_4 = arith.constant 0 : index
    %c0_5 = arith.constant 0 : index
    %4 = vector.load %arg3[%c0_4, %c0_5] : memref<8x1024xf32, #tpu.memory_space<vmem>>, vector<1x128xf32>
    %5 = arith.addf %3, %4 : vector<1x128xf32>
    %c0_6 = arith.constant 0 : index
    %c0_7 = arith.constant 0 : index
    %6 = vector.load %arg4[%c0_6, %c0_7] : memref<128x768xf32, #tpu.memory_space<vmem>>, vector<128x64xf32>
    %cst_8 = arith.constant dense<0.000000e+00> : vector<1x64xf32>
    %7 = tpu.matmul %5, %6, %cst_8 {dimension_numbers = #tpu.dot_dimension_numbers<[1], [0], [0], [1], [0, 0, 1, 1], [], []>} : vector<1x128xf32>, vector<128x64xf32>, vector<1x64xf32> -> vector<1x64xf32>
    %c0_9 = arith.constant 0 : index
    %c64 = arith.constant 64 : index
    %8 = vector.load %arg4[%c0_9, %c64] : memref<128x768xf32, #tpu.memory_space<vmem>>, vector<128x64xf32>
    %cst_10 = arith.constant dense<0.000000e+00> : vector<1x64xf32>
    %9 = tpu.matmul %5, %8, %cst_10 {dimension_numbers = #tpu.dot_dimension_numbers<[1], [0], [0], [1], [0, 0, 1, 1], [], []>} : vector<1x128xf32>, vector<128x64xf32>, vector<1x64xf32> -> vector<1x64xf32>
    %c0_11 = arith.constant 0 : index
    %c128 = arith.constant 128 : index
    %10 = vector.load %arg4[%c0_11, %c128] : memref<128x768xf32, #tpu.memory_space<vmem>>, vector<128x64xf32>
    %cst_12 = arith.constant dense<0.000000e+00> : vector<1x64xf32>
    %11 = tpu.matmul %5, %10, %cst_12 {dimension_numbers = #tpu.dot_dimension_numbers<[1], [0], [0], [1], [0, 0, 1, 1], [], []>} : vector<1x128xf32>, vector<128x64xf32>, vector<1x64xf32> -> vector<1x64xf32>
    %12 = tpu.concatenate %7, %9, %11 in 0 : vector<1x64xf32>, vector<1x64xf32>, vector<1x64xf32> -> vector<3x64xf32>
    %c0_13 = arith.constant 0 : index
    %c128_14 = arith.constant 128 : index
    %13 = vector.load %arg3[%c0_13, %c128_14] : memref<8x1024xf32, #tpu.memory_space<vmem>>, vector<8x3xf32>
    %cst_15 = arith.constant dense<0.000000e+00> : vector<8x64xf32>
    %14 = tpu.matmul %13, %12, %cst_15 {dimension_numbers = #tpu.dot_dimension_numbers<[1], [0], [0], [1], [0, 0, 1, 1], [], []>} : vector<8x3xf32>, vector<3x64xf32>, vector<8x64xf32> -> vector<8x64xf32>
    %c0_16 = arith.constant 0 : index
    %c131 = arith.constant 131 : index
    %15 = vector.load %arg3[%c0_16, %c131] : memref<8x1024xf32, #tpu.memory_space<vmem>>, vector<8x1xf32>
    %16 = vector.broadcast %15 : vector<8x1xf32> to vector<8x64xf32>
    %17 = arith.addf %14, %16 : vector<8x64xf32>
    %c0_17 = arith.constant 0 : index
    %c132 = arith.constant 132 : index
    %18 = vector.load %arg3[%c0_17, %c132] : memref<8x1024xf32, #tpu.memory_space<vmem>>, vector<8x8xf32>
    %19 = arith.mulf %17, %17 : vector<8x64xf32>
    %cst_18 = arith.constant dense<0.000000e+00> : vector<8x64xf32>
    %20 = tpu.matmul %18, %19, %cst_18 {dimension_numbers = #tpu.dot_dimension_numbers<[1], [0], [0], [1], [0, 0, 1, 1], [], []>} : vector<8x8xf32>, vector<8x64xf32>, vector<8x64xf32> -> vector<8x64xf32>
    %c0_19 = arith.constant 0 : index
    %c140 = arith.constant 140 : index
    %21 = vector.load %arg3[%c0_19, %c140] : memref<8x1024xf32, #tpu.memory_space<vmem>>, vector<8x1xf32>
    %22 = vector.broadcast %21 : vector<8x1xf32> to vector<8x64xf32>
    %23 = arith.addf %20, %22 : vector<8x64xf32>
    %24 = math.rsqrt %23 : vector<8x64xf32>
    %25 = arith.mulf %17, %24 : vector<8x64xf32>
    %c0_20 = arith.constant 0 : index
    %c192 = arith.constant 192 : index
    %26 = vector.load %arg4[%c0_20, %c192] : memref<128x768xf32, #tpu.memory_space<vmem>>, vector<64x32xf32>
    %cst_21 = arith.constant dense<0.000000e+00> : vector<8x32xf32>
    %27 = tpu.matmul %25, %26, %cst_21 {dimension_numbers = #tpu.dot_dimension_numbers<[1], [0], [0], [1], [0, 0, 1, 1], [], []>} : vector<8x64xf32>, vector<64x32xf32>, vector<8x32xf32> -> vector<8x32xf32>
    %c0_22 = arith.constant 0 : index
    %c224 = arith.constant 224 : index
    %28 = vector.load %arg4[%c0_22, %c224] : memref<128x768xf32, #tpu.memory_space<vmem>>, vector<64x32xf32>
    %cst_23 = arith.constant dense<0.000000e+00> : vector<8x32xf32>
    %29 = tpu.matmul %25, %28, %cst_23 {dimension_numbers = #tpu.dot_dimension_numbers<[1], [0], [0], [1], [0, 0, 1, 1], [], []>} : vector<8x64xf32>, vector<64x32xf32>, vector<8x32xf32> -> vector<8x32xf32>
    %30 = tpu.concatenate %27, %29 in 0 : vector<8x32xf32>, vector<8x32xf32> -> vector<16x32xf32>
    %c0_24 = arith.constant 0 : index
    %c141 = arith.constant 141 : index
    %31 = vector.load %arg3[%c0_24, %c141] : memref<8x1024xf32, #tpu.memory_space<vmem>>, vector<8x16xf32>
    %cst_25 = arith.constant dense<0.000000e+00> : vector<8x32xf32>
    %32 = tpu.matmul %31, %30, %cst_25 {dimension_numbers = #tpu.dot_dimension_numbers<[1], [0], [0], [1], [0, 0, 1, 1], [], []>} : vector<8x16xf32>, vector<16x32xf32>, vector<8x32xf32> -> vector<8x32xf32>
    %c0_26 = arith.constant 0 : index
    %c157 = arith.constant 157 : index
    %33 = vector.load %arg3[%c0_26, %c157] : memref<8x1024xf32, #tpu.memory_space<vmem>>, vector<8x1xf32>
    %34 = vector.broadcast %33 : vector<8x1xf32> to vector<8x32xf32>
    %35 = arith.addf %32, %34 : vector<8x32xf32>
    %c0_27 = arith.constant 0 : index
    %c158 = arith.constant 158 : index
    %36 = vector.load %arg3[%c0_27, %c158] : memref<8x1024xf32, #tpu.memory_space<vmem>>, vector<8x8xf32>
    %37 = arith.mulf %35, %35 : vector<8x32xf32>
    %cst_28 = arith.constant dense<0.000000e+00> : vector<8x32xf32>
    %38 = tpu.matmul %36, %37, %cst_28 {dimension_numbers = #tpu.dot_dimension_numbers<[1], [0], [0], [1], [0, 0, 1, 1], [], []>} : vector<8x8xf32>, vector<8x32xf32>, vector<8x32xf32> -> vector<8x32xf32>
    %c0_29 = arith.constant 0 : index
    %c166 = arith.constant 166 : index
    %39 = vector.load %arg3[%c0_29, %c166] : memref<8x1024xf32, #tpu.memory_space<vmem>>, vector<8x1xf32>
    %40 = vector.broadcast %39 : vector<8x1xf32> to vector<8x32xf32>
    %41 = arith.addf %38, %40 : vector<8x32xf32>
    %42 = math.rsqrt %41 : vector<8x32xf32>
    %43 = arith.mulf %35, %42 : vector<8x32xf32>
    %c0_30 = arith.constant 0 : index
    %c256 = arith.constant 256 : index
    %44 = vector.load %arg4[%c0_30, %c256] : memref<128x768xf32, #tpu.memory_space<vmem>>, vector<32x32xf32>
    %cst_31 = arith.constant dense<0.000000e+00> : vector<8x32xf32>
    %45 = tpu.matmul %43, %44, %cst_31 {dimension_numbers = #tpu.dot_dimension_numbers<[1], [0], [0], [1], [0, 0, 1, 1], [], []>} : vector<8x32xf32>, vector<32x32xf32>, vector<8x32xf32> -> vector<8x32xf32>
    %c0_32 = arith.constant 0 : index
    %c288 = arith.constant 288 : index
    %46 = vector.load %arg4[%c0_32, %c288] : memref<128x768xf32, #tpu.memory_space<vmem>>, vector<32x32xf32>
    %cst_33 = arith.constant dense<0.000000e+00> : vector<8x32xf32>
    %47 = tpu.matmul %43, %46, %cst_33 {dimension_numbers = #tpu.dot_dimension_numbers<[1], [0], [0], [1], [0, 0, 1, 1], [], []>} : vector<8x32xf32>, vector<32x32xf32>, vector<8x32xf32> -> vector<8x32xf32>
    %c0_34 = arith.constant 0 : index
    %c320 = arith.constant 320 : index
    %48 = vector.load %arg4[%c0_34, %c320] : memref<128x768xf32, #tpu.memory_space<vmem>>, vector<32x32xf32>
    %cst_35 = arith.constant dense<0.000000e+00> : vector<8x32xf32>
    %49 = tpu.matmul %43, %48, %cst_35 {dimension_numbers = #tpu.dot_dimension_numbers<[1], [0], [0], [1], [0, 0, 1, 1], [], []>} : vector<8x32xf32>, vector<32x32xf32>, vector<8x32xf32> -> vector<8x32xf32>
    %50 = tpu.concatenate %45, %47, %49 in 0 : vector<8x32xf32>, vector<8x32xf32>, vector<8x32xf32> -> vector<24x32xf32>
    %c0_36 = arith.constant 0 : index
    %c167 = arith.constant 167 : index
    %51 = vector.load %arg3[%c0_36, %c167] : memref<8x1024xf32, #tpu.memory_space<vmem>>, vector<8x24xf32>
    %cst_37 = arith.constant dense<0.000000e+00> : vector<8x32xf32>
    %52 = tpu.matmul %51, %50, %cst_37 {dimension_numbers = #tpu.dot_dimension_numbers<[1], [0], [0], [1], [0, 0, 1, 1], [], []>} : vector<8x24xf32>, vector<24x32xf32>, vector<8x32xf32> -> vector<8x32xf32>
    %c0_38 = arith.constant 0 : index
    %c191 = arith.constant 191 : index
    %53 = vector.load %arg3[%c0_38, %c191] : memref<8x1024xf32, #tpu.memory_space<vmem>>, vector<8x1xf32>
    %54 = vector.broadcast %53 : vector<8x1xf32> to vector<8x32xf32>
    %55 = arith.addf %52, %54 : vector<8x32xf32>
    %cst_39 = arith.constant 0.000000e+00 : f32
    %56 = vector.broadcast %cst_39 : f32 to vector<8x32xf32>
    %57 = arith.maximumf %55, %56 : vector<8x32xf32>
    %c0_40 = arith.constant 0 : index
    %c256_41 = arith.constant 256 : index
    %58 = vector.load %arg4[%c0_40, %c256_41] : memref<128x768xf32, #tpu.memory_space<vmem>>, vector<32x32xf32>
    %cst_42 = arith.constant dense<0.000000e+00> : vector<8x32xf32>
    %59 = tpu.matmul %57, %58, %cst_42 {dimension_numbers = #tpu.dot_dimension_numbers<[1], [0], [0], [1], [0, 0, 1, 1], [], []>} : vector<8x32xf32>, vector<32x32xf32>, vector<8x32xf32> -> vector<8x32xf32>
    %c0_43 = arith.constant 0 : index
    %c288_44 = arith.constant 288 : index
    %60 = vector.load %arg4[%c0_43, %c288_44] : memref<128x768xf32, #tpu.memory_space<vmem>>, vector<32x32xf32>
    %cst_45 = arith.constant dense<0.000000e+00> : vector<8x32xf32>
    %61 = tpu.matmul %57, %60, %cst_45 {dimension_numbers = #tpu.dot_dimension_numbers<[1], [0], [0], [1], [0, 0, 1, 1], [], []>} : vector<8x32xf32>, vector<32x32xf32>, vector<8x32xf32> -> vector<8x32xf32>
    %c0_46 = arith.constant 0 : index
    %c320_47 = arith.constant 320 : index
    %62 = vector.load %arg4[%c0_46, %c320_47] : memref<128x768xf32, #tpu.memory_space<vmem>>, vector<32x32xf32>
    %cst_48 = arith.constant dense<0.000000e+00> : vector<8x32xf32>
    %63 = tpu.matmul %57, %62, %cst_48 {dimension_numbers = #tpu.dot_dimension_numbers<[1], [0], [0], [1], [0, 0, 1, 1], [], []>} : vector<8x32xf32>, vector<32x32xf32>, vector<8x32xf32> -> vector<8x32xf32>
    %64 = tpu.concatenate %59, %61, %63 in 0 : vector<8x32xf32>, vector<8x32xf32>, vector<8x32xf32> -> vector<24x32xf32>
    %c0_49 = arith.constant 0 : index
    %c192_50 = arith.constant 192 : index
    %65 = vector.load %arg3[%c0_49, %c192_50] : memref<8x1024xf32, #tpu.memory_space<vmem>>, vector<8x24xf32>
    %cst_51 = arith.constant dense<0.000000e+00> : vector<8x32xf32>
    %66 = tpu.matmul %65, %64, %cst_51 {dimension_numbers = #tpu.dot_dimension_numbers<[1], [0], [0], [1], [0, 0, 1, 1], [], []>} : vector<8x24xf32>, vector<24x32xf32>, vector<8x32xf32> -> vector<8x32xf32>
    %c0_52 = arith.constant 0 : index
    %c216 = arith.constant 216 : index
    %67 = vector.load %arg3[%c0_52, %c216] : memref<8x1024xf32, #tpu.memory_space<vmem>>, vector<8x1xf32>
    %68 = vector.broadcast %67 : vector<8x1xf32> to vector<8x32xf32>
    %69 = arith.addf %66, %68 : vector<8x32xf32>
    %70 = arith.addf %43, %69 : vector<8x32xf32>
    %c0_53 = arith.constant 0 : index
    %c256_54 = arith.constant 256 : index
    %71 = vector.load %arg4[%c0_53, %c256_54] : memref<128x768xf32, #tpu.memory_space<vmem>>, vector<32x32xf32>
    %cst_55 = arith.constant dense<0.000000e+00> : vector<8x32xf32>
    %72 = tpu.matmul %70, %71, %cst_55 {dimension_numbers = #tpu.dot_dimension_numbers<[1], [0], [0], [1], [0, 0, 1, 1], [], []>} : vector<8x32xf32>, vector<32x32xf32>, vector<8x32xf32> -> vector<8x32xf32>
    %c0_56 = arith.constant 0 : index
    %c288_57 = arith.constant 288 : index
    %73 = vector.load %arg4[%c0_56, %c288_57] : memref<128x768xf32, #tpu.memory_space<vmem>>, vector<32x32xf32>
    %cst_58 = arith.constant dense<0.000000e+00> : vector<8x32xf32>
    %74 = tpu.matmul %70, %73, %cst_58 {dimension_numbers = #tpu.dot_dimension_numbers<[1], [0], [0], [1], [0, 0, 1, 1], [], []>} : vector<8x32xf32>, vector<32x32xf32>, vector<8x32xf32> -> vector<8x32xf32>
    %c0_59 = arith.constant 0 : index
    %c320_60 = arith.constant 320 : index
    %75 = vector.load %arg4[%c0_59, %c320_60] : memref<128x768xf32, #tpu.memory_space<vmem>>, vector<32x32xf32>
    %cst_61 = arith.constant dense<0.000000e+00> : vector<8x32xf32>
    %76 = tpu.matmul %70, %75, %cst_61 {dimension_numbers = #tpu.dot_dimension_numbers<[1], [0], [0], [1], [0, 0, 1, 1], [], []>} : vector<8x32xf32>, vector<32x32xf32>, vector<8x32xf32> -> vector<8x32xf32>
    %77 = tpu.concatenate %72, %74, %76 in 0 : vector<8x32xf32>, vector<8x32xf32>, vector<8x32xf32> -> vector<24x32xf32>
    %c0_62 = arith.constant 0 : index
    %c217 = arith.constant 217 : index
    %78 = vector.load %arg3[%c0_62, %c217] : memref<8x1024xf32, #tpu.memory_space<vmem>>, vector<8x24xf32>
    %cst_63 = arith.constant dense<0.000000e+00> : vector<8x32xf32>
    %79 = tpu.matmul %78, %77, %cst_63 {dimension_numbers = #tpu.dot_dimension_numbers<[1], [0], [0], [1], [0, 0, 1, 1], [], []>} : vector<8x24xf32>, vector<24x32xf32>, vector<8x32xf32> -> vector<8x32xf32>
    %c0_64 = arith.constant 0 : index
    %c241 = arith.constant 241 : index
    %80 = vector.load %arg3[%c0_64, %c241] : memref<8x1024xf32, #tpu.memory_space<vmem>>, vector<8x1xf32>
    %81 = vector.broadcast %80 : vector<8x1xf32> to vector<8x32xf32>
    %82 = arith.addf %79, %81 : vector<8x32xf32>
    %cst_65 = arith.constant 0.000000e+00 : f32
    %83 = vector.broadcast %cst_65 : f32 to vector<8x32xf32>
    %84 = arith.maximumf %82, %83 : vector<8x32xf32>
    %c0_66 = arith.constant 0 : index
    %c256_67 = arith.constant 256 : index
    %85 = vector.load %arg4[%c0_66, %c256_67] : memref<128x768xf32, #tpu.memory_space<vmem>>, vector<32x32xf32>
    %cst_68 = arith.constant dense<0.000000e+00> : vector<8x32xf32>
    %86 = tpu.matmul %84, %85, %cst_68 {dimension_numbers = #tpu.dot_dimension_numbers<[1], [0], [0], [1], [0, 0, 1, 1], [], []>} : vector<8x32xf32>, vector<32x32xf32>, vector<8x32xf32> -> vector<8x32xf32>
    %c0_69 = arith.constant 0 : index
    %c288_70 = arith.constant 288 : index
    %87 = vector.load %arg4[%c0_69, %c288_70] : memref<128x768xf32, #tpu.memory_space<vmem>>, vector<32x32xf32>
    %cst_71 = arith.constant dense<0.000000e+00> : vector<8x32xf32>
    %88 = tpu.matmul %84, %87, %cst_71 {dimension_numbers = #tpu.dot_dimension_numbers<[1], [0], [0], [1], [0, 0, 1, 1], [], []>} : vector<8x32xf32>, vector<32x32xf32>, vector<8x32xf32> -> vector<8x32xf32>
    %c0_72 = arith.constant 0 : index
    %c320_73 = arith.constant 320 : index
    %89 = vector.load %arg4[%c0_72, %c320_73] : memref<128x768xf32, #tpu.memory_space<vmem>>, vector<32x32xf32>
    %cst_74 = arith.constant dense<0.000000e+00> : vector<8x32xf32>
    %90 = tpu.matmul %84, %89, %cst_74 {dimension_numbers = #tpu.dot_dimension_numbers<[1], [0], [0], [1], [0, 0, 1, 1], [], []>} : vector<8x32xf32>, vector<32x32xf32>, vector<8x32xf32> -> vector<8x32xf32>
    %91 = tpu.concatenate %86, %88, %90 in 0 : vector<8x32xf32>, vector<8x32xf32>, vector<8x32xf32> -> vector<24x32xf32>
    %c0_75 = arith.constant 0 : index
    %c242 = arith.constant 242 : index
    %92 = vector.load %arg3[%c0_75, %c242] : memref<8x1024xf32, #tpu.memory_space<vmem>>, vector<8x24xf32>
    %cst_76 = arith.constant dense<0.000000e+00> : vector<8x32xf32>
    %93 = tpu.matmul %92, %91, %cst_76 {dimension_numbers = #tpu.dot_dimension_numbers<[1], [0], [0], [1], [0, 0, 1, 1], [], []>} : vector<8x24xf32>, vector<24x32xf32>, vector<8x32xf32> -> vector<8x32xf32>
    %c0_77 = arith.constant 0 : index
    %c266 = arith.constant 266 : index
    %94 = vector.load %arg3[%c0_77, %c266] : memref<8x1024xf32, #tpu.memory_space<vmem>>, vector<8x1xf32>
    %95 = vector.broadcast %94 : vector<8x1xf32> to vector<8x32xf32>
    %96 = arith.addf %93, %95 : vector<8x32xf32>
    %97 = arith.addf %70, %96 : vector<8x32xf32>
    %c0_78 = arith.constant 0 : index
    %c352 = arith.constant 352 : index
    %98 = vector.load %arg4[%c0_78, %c352] : memref<128x768xf32, #tpu.memory_space<vmem>>, vector<32x15xf32>
    %cst_79 = arith.constant dense<0.000000e+00> : vector<8x15xf32>
    %99 = tpu.matmul %43, %98, %cst_79 {dimension_numbers = #tpu.dot_dimension_numbers<[1], [0], [0], [1], [0, 0, 1, 1], [], []>} : vector<8x32xf32>, vector<32x15xf32>, vector<8x15xf32> -> vector<8x15xf32>
    %c0_80 = arith.constant 0 : index
    %c367 = arith.constant 367 : index
    %100 = vector.load %arg4[%c0_80, %c367] : memref<128x768xf32, #tpu.memory_space<vmem>>, vector<32x15xf32>
    %cst_81 = arith.constant dense<0.000000e+00> : vector<8x15xf32>
    %101 = tpu.matmul %43, %100, %cst_81 {dimension_numbers = #tpu.dot_dimension_numbers<[1], [0], [0], [1], [0, 0, 1, 1], [], []>} : vector<8x32xf32>, vector<32x15xf32>, vector<8x15xf32> -> vector<8x15xf32>
    %c0_82 = arith.constant 0 : index
    %c382 = arith.constant 382 : index
    %102 = vector.load %arg4[%c0_82, %c382] : memref<128x768xf32, #tpu.memory_space<vmem>>, vector<32x15xf32>
    %cst_83 = arith.constant dense<0.000000e+00> : vector<8x15xf32>
    %103 = tpu.matmul %43, %102, %cst_83 {dimension_numbers = #tpu.dot_dimension_numbers<[1], [0], [0], [1], [0, 0, 1, 1], [], []>} : vector<8x32xf32>, vector<32x15xf32>, vector<8x15xf32> -> vector<8x15xf32>
    %104 = tpu.concatenate %99, %101, %103 in 0 : vector<8x15xf32>, vector<8x15xf32>, vector<8x15xf32> -> vector<24x15xf32>
    %c0_84 = arith.constant 0 : index
    %c267 = arith.constant 267 : index
    %105 = vector.load %arg3[%c0_84, %c267] : memref<8x1024xf32, #tpu.memory_space<vmem>>, vector<8x24xf32>
    %cst_85 = arith.constant dense<0.000000e+00> : vector<8x15xf32>
    %106 = tpu.matmul %105, %104, %cst_85 {dimension_numbers = #tpu.dot_dimension_numbers<[1], [0], [0], [1], [0, 0, 1, 1], [], []>} : vector<8x24xf32>, vector<24x15xf32>, vector<8x15xf32> -> vector<8x15xf32>
    %c0_86 = arith.constant 0 : index
    %c291 = arith.constant 291 : index
    %107 = vector.load %arg3[%c0_86, %c291] : memref<8x1024xf32, #tpu.memory_space<vmem>>, vector<8x1xf32>
    %108 = vector.broadcast %107 : vector<8x1xf32> to vector<8x15xf32>
    %109 = arith.addf %106, %108 : vector<8x15xf32>
    %cst_87 = arith.constant 0.000000e+00 : f32
    %110 = vector.broadcast %cst_87 : f32 to vector<8x15xf32>
    %111 = arith.maximumf %109, %110 : vector<8x15xf32>
    %c0_88 = arith.constant 0 : index
    %c397 = arith.constant 397 : index
    %112 = vector.load %arg4[%c0_88, %c397] : memref<128x768xf32, #tpu.memory_space<vmem>>, vector<15x7xf32>
    %cst_89 = arith.constant dense<0.000000e+00> : vector<8x7xf32>
    %113 = tpu.matmul %111, %112, %cst_89 {dimension_numbers = #tpu.dot_dimension_numbers<[1], [0], [0], [1], [0, 0, 1, 1], [], []>} : vector<8x15xf32>, vector<15x7xf32>, vector<8x7xf32> -> vector<8x7xf32>
    %c0_90 = arith.constant 0 : index
    %c404 = arith.constant 404 : index
    %114 = vector.load %arg4[%c0_90, %c404] : memref<128x768xf32, #tpu.memory_space<vmem>>, vector<15x7xf32>
    %cst_91 = arith.constant dense<0.000000e+00> : vector<8x7xf32>
    %115 = tpu.matmul %111, %114, %cst_91 {dimension_numbers = #tpu.dot_dimension_numbers<[1], [0], [0], [1], [0, 0, 1, 1], [], []>} : vector<8x15xf32>, vector<15x7xf32>, vector<8x7xf32> -> vector<8x7xf32>
    %c0_92 = arith.constant 0 : index
    %c411 = arith.constant 411 : index
    %116 = vector.load %arg4[%c0_92, %c411] : memref<128x768xf32, #tpu.memory_space<vmem>>, vector<15x7xf32>
    %cst_93 = arith.constant dense<0.000000e+00> : vector<8x7xf32>
    %117 = tpu.matmul %111, %116, %cst_93 {dimension_numbers = #tpu.dot_dimension_numbers<[1], [0], [0], [1], [0, 0, 1, 1], [], []>} : vector<8x15xf32>, vector<15x7xf32>, vector<8x7xf32> -> vector<8x7xf32>
    %118 = tpu.concatenate %113, %115, %117 in 0 : vector<8x7xf32>, vector<8x7xf32>, vector<8x7xf32> -> vector<24x7xf32>
    %c0_94 = arith.constant 0 : index
    %c292 = arith.constant 292 : index
    %119 = vector.load %arg3[%c0_94, %c292] : memref<8x1024xf32, #tpu.memory_space<vmem>>, vector<8x24xf32>
    %cst_95 = arith.constant dense<0.000000e+00> : vector<8x7xf32>
    %120 = tpu.matmul %119, %118, %cst_95 {dimension_numbers = #tpu.dot_dimension_numbers<[1], [0], [0], [1], [0, 0, 1, 1], [], []>} : vector<8x24xf32>, vector<24x7xf32>, vector<8x7xf32> -> vector<8x7xf32>
    %c0_96 = arith.constant 0 : index
    %c316 = arith.constant 316 : index
    %121 = vector.load %arg3[%c0_96, %c316] : memref<8x1024xf32, #tpu.memory_space<vmem>>, vector<8x1xf32>
    %122 = vector.broadcast %121 : vector<8x1xf32> to vector<8x7xf32>
    %123 = arith.addf %120, %122 : vector<8x7xf32>
    %cst_97 = arith.constant 0.000000e+00 : f32
    %124 = vector.broadcast %cst_97 : f32 to vector<8x7xf32>
    %125 = arith.maximumf %123, %124 : vector<8x7xf32>
    %c0_98 = arith.constant 0 : index
    %c418 = arith.constant 418 : index
    %126 = vector.load %arg4[%c0_98, %c418] : memref<128x768xf32, #tpu.memory_space<vmem>>, vector<7x3xf32>
    %cst_99 = arith.constant dense<0.000000e+00> : vector<8x3xf32>
    %127 = tpu.matmul %125, %126, %cst_99 {dimension_numbers = #tpu.dot_dimension_numbers<[1], [0], [0], [1], [0, 0, 1, 1], [], []>} : vector<8x7xf32>, vector<7x3xf32>, vector<8x3xf32> -> vector<8x3xf32>
    %c0_100 = arith.constant 0 : index
    %c421 = arith.constant 421 : index
    %128 = vector.load %arg4[%c0_100, %c421] : memref<128x768xf32, #tpu.memory_space<vmem>>, vector<7x3xf32>
    %cst_101 = arith.constant dense<0.000000e+00> : vector<8x3xf32>
    %129 = tpu.matmul %125, %128, %cst_101 {dimension_numbers = #tpu.dot_dimension_numbers<[1], [0], [0], [1], [0, 0, 1, 1], [], []>} : vector<8x7xf32>, vector<7x3xf32>, vector<8x3xf32> -> vector<8x3xf32>
    %c0_102 = arith.constant 0 : index
    %c424 = arith.constant 424 : index
    %130 = vector.load %arg4[%c0_102, %c424] : memref<128x768xf32, #tpu.memory_space<vmem>>, vector<7x3xf32>
    %cst_103 = arith.constant dense<0.000000e+00> : vector<8x3xf32>
    %131 = tpu.matmul %125, %130, %cst_103 {dimension_numbers = #tpu.dot_dimension_numbers<[1], [0], [0], [1], [0, 0, 1, 1], [], []>} : vector<8x7xf32>, vector<7x3xf32>, vector<8x3xf32> -> vector<8x3xf32>
    %132 = tpu.concatenate %127, %129, %131 in 0 : vector<8x3xf32>, vector<8x3xf32>, vector<8x3xf32> -> vector<24x3xf32>
    %c0_104 = arith.constant 0 : index
    %c317 = arith.constant 317 : index
    %133 = vector.load %arg3[%c0_104, %c317] : memref<8x1024xf32, #tpu.memory_space<vmem>>, vector<8x24xf32>
    %cst_105 = arith.constant dense<0.000000e+00> : vector<8x3xf32>
    %134 = tpu.matmul %133, %132, %cst_105 {dimension_numbers = #tpu.dot_dimension_numbers<[1], [0], [0], [1], [0, 0, 1, 1], [], []>} : vector<8x24xf32>, vector<24x3xf32>, vector<8x3xf32> -> vector<8x3xf32>
    %c0_106 = arith.constant 0 : index
    %c341 = arith.constant 341 : index
    %135 = vector.load %arg3[%c0_106, %c341] : memref<8x1024xf32, #tpu.memory_space<vmem>>, vector<8x1xf32>
    %136 = vector.broadcast %135 : vector<8x1xf32> to vector<8x3xf32>
    %137 = arith.addf %134, %136 : vector<8x3xf32>
    %c0_107 = arith.constant 0 : index
    %c427 = arith.constant 427 : index
    %138 = vector.load %arg4[%c0_107, %c427] : memref<128x768xf32, #tpu.memory_space<vmem>>, vector<3x3xf32>
    %cst_108 = arith.constant dense<0.000000e+00> : vector<8x3xf32>
    %139 = tpu.matmul %137, %138, %cst_108 {dimension_numbers = #tpu.dot_dimension_numbers<[1], [0], [0], [1], [0, 0, 1, 1], [], []>} : vector<8x3xf32>, vector<3x3xf32>, vector<8x3xf32> -> vector<8x3xf32>
    %c0_109 = arith.constant 0 : index
    %c430 = arith.constant 430 : index
    %140 = vector.load %arg4[%c0_109, %c430] : memref<128x768xf32, #tpu.memory_space<vmem>>, vector<3x3xf32>
    %cst_110 = arith.constant dense<0.000000e+00> : vector<8x3xf32>
    %141 = tpu.matmul %137, %140, %cst_110 {dimension_numbers = #tpu.dot_dimension_numbers<[1], [0], [0], [1], [0, 0, 1, 1], [], []>} : vector<8x3xf32>, vector<3x3xf32>, vector<8x3xf32> -> vector<8x3xf32>
    %c0_111 = arith.constant 0 : index
    %c433 = arith.constant 433 : index
    %142 = vector.load %arg4[%c0_111, %c433] : memref<128x768xf32, #tpu.memory_space<vmem>>, vector<3x3xf32>
    %cst_112 = arith.constant dense<0.000000e+00> : vector<8x3xf32>
    %143 = tpu.matmul %137, %142, %cst_112 {dimension_numbers = #tpu.dot_dimension_numbers<[1], [0], [0], [1], [0, 0, 1, 1], [], []>} : vector<8x3xf32>, vector<3x3xf32>, vector<8x3xf32> -> vector<8x3xf32>
    %144 = tpu.concatenate %139, %141, %143 in 0 : vector<8x3xf32>, vector<8x3xf32>, vector<8x3xf32> -> vector<24x3xf32>
    %c0_113 = arith.constant 0 : index
    %c342 = arith.constant 342 : index
    %145 = vector.load %arg3[%c0_113, %c342] : memref<8x1024xf32, #tpu.memory_space<vmem>>, vector<8x24xf32>
    %cst_114 = arith.constant dense<0.000000e+00> : vector<8x3xf32>
    %146 = tpu.matmul %145, %144, %cst_114 {dimension_numbers = #tpu.dot_dimension_numbers<[1], [0], [0], [1], [0, 0, 1, 1], [], []>} : vector<8x24xf32>, vector<24x3xf32>, vector<8x3xf32> -> vector<8x3xf32>
    %c0_115 = arith.constant 0 : index
    %c366 = arith.constant 366 : index
    %147 = vector.load %arg3[%c0_115, %c366] : memref<8x1024xf32, #tpu.memory_space<vmem>>, vector<8x1xf32>
    %148 = vector.broadcast %147 : vector<8x1xf32> to vector<8x3xf32>
    %149 = arith.addf %146, %148 : vector<8x3xf32>
    %cst_116 = arith.constant 0.000000e+00 : f32
    %150 = vector.broadcast %cst_116 : f32 to vector<8x3xf32>
    %151 = arith.maximumf %149, %150 : vector<8x3xf32>
    %c0_117 = arith.constant 0 : index
    %c427_118 = arith.constant 427 : index
    %152 = vector.load %arg4[%c0_117, %c427_118] : memref<128x768xf32, #tpu.memory_space<vmem>>, vector<3x3xf32>
    %cst_119 = arith.constant dense<0.000000e+00> : vector<8x3xf32>
    %153 = tpu.matmul %151, %152, %cst_119 {dimension_numbers = #tpu.dot_dimension_numbers<[1], [0], [0], [1], [0, 0, 1, 1], [], []>} : vector<8x3xf32>, vector<3x3xf32>, vector<8x3xf32> -> vector<8x3xf32>
    %c0_120 = arith.constant 0 : index
    %c430_121 = arith.constant 430 : index
    %154 = vector.load %arg4[%c0_120, %c430_121] : memref<128x768xf32, #tpu.memory_space<vmem>>, vector<3x3xf32>
    %cst_122 = arith.constant dense<0.000000e+00> : vector<8x3xf32>
    %155 = tpu.matmul %151, %154, %cst_122 {dimension_numbers = #tpu.dot_dimension_numbers<[1], [0], [0], [1], [0, 0, 1, 1], [], []>} : vector<8x3xf32>, vector<3x3xf32>, vector<8x3xf32> -> vector<8x3xf32>
    %c0_123 = arith.constant 0 : index
    %c433_124 = arith.constant 433 : index
    %156 = vector.load %arg4[%c0_123, %c433_124] : memref<128x768xf32, #tpu.memory_space<vmem>>, vector<3x3xf32>
    %cst_125 = arith.constant dense<0.000000e+00> : vector<8x3xf32>
    %157 = tpu.matmul %151, %156, %cst_125 {dimension_numbers = #tpu.dot_dimension_numbers<[1], [0], [0], [1], [0, 0, 1, 1], [], []>} : vector<8x3xf32>, vector<3x3xf32>, vector<8x3xf32> -> vector<8x3xf32>
    %158 = tpu.concatenate %153, %155, %157 in 0 : vector<8x3xf32>, vector<8x3xf32>, vector<8x3xf32> -> vector<24x3xf32>
    %c0_126 = arith.constant 0 : index
    %c367_127 = arith.constant 367 : index
    %159 = vector.load %arg3[%c0_126, %c367_127] : memref<8x1024xf32, #tpu.memory_space<vmem>>, vector<8x24xf32>
    %cst_128 = arith.constant dense<0.000000e+00> : vector<8x3xf32>
    %160 = tpu.matmul %159, %158, %cst_128 {dimension_numbers = #tpu.dot_dimension_numbers<[1], [0], [0], [1], [0, 0, 1, 1], [], []>} : vector<8x24xf32>, vector<24x3xf32>, vector<8x3xf32> -> vector<8x3xf32>
    %c0_129 = arith.constant 0 : index
    %c391 = arith.constant 391 : index
    %161 = vector.load %arg3[%c0_129, %c391] : memref<8x1024xf32, #tpu.memory_space<vmem>>, vector<8x1xf32>
    %162 = vector.broadcast %161 : vector<8x1xf32> to vector<8x3xf32>
    %163 = arith.addf %160, %162 : vector<8x3xf32>
    %164 = arith.addf %137, %163 : vector<8x3xf32>
    %c0_130 = arith.constant 0 : index
    %c436 = arith.constant 436 : index
    %165 = vector.load %arg4[%c0_130, %c436] : memref<128x768xf32, #tpu.memory_space<vmem>>, vector<3x7xf32>
    %cst_131 = arith.constant dense<0.000000e+00> : vector<8x7xf32>
    %166 = tpu.matmul %164, %165, %cst_131 {dimension_numbers = #tpu.dot_dimension_numbers<[1], [0], [0], [1], [0, 0, 1, 1], [], []>} : vector<8x3xf32>, vector<3x7xf32>, vector<8x7xf32> -> vector<8x7xf32>
    %c0_132 = arith.constant 0 : index
    %c443 = arith.constant 443 : index
    %167 = vector.load %arg4[%c0_132, %c443] : memref<128x768xf32, #tpu.memory_space<vmem>>, vector<3x7xf32>
    %cst_133 = arith.constant dense<0.000000e+00> : vector<8x7xf32>
    %168 = tpu.matmul %164, %167, %cst_133 {dimension_numbers = #tpu.dot_dimension_numbers<[1], [0], [0], [1], [0, 0, 1, 1], [], []>} : vector<8x3xf32>, vector<3x7xf32>, vector<8x7xf32> -> vector<8x7xf32>
    %c0_134 = arith.constant 0 : index
    %c450 = arith.constant 450 : index
    %169 = vector.load %arg4[%c0_134, %c450] : memref<128x768xf32, #tpu.memory_space<vmem>>, vector<3x7xf32>
    %cst_135 = arith.constant dense<0.000000e+00> : vector<8x7xf32>
    %170 = tpu.matmul %164, %169, %cst_135 {dimension_numbers = #tpu.dot_dimension_numbers<[1], [0], [0], [1], [0, 0, 1, 1], [], []>} : vector<8x3xf32>, vector<3x7xf32>, vector<8x7xf32> -> vector<8x7xf32>
    %171 = tpu.concatenate %166, %168, %170 in 0 : vector<8x7xf32>, vector<8x7xf32>, vector<8x7xf32> -> vector<24x7xf32>
    %c0_136 = arith.constant 0 : index
    %c392 = arith.constant 392 : index
    %172 = vector.load %arg3[%c0_136, %c392] : memref<8x1024xf32, #tpu.memory_space<vmem>>, vector<8x24xf32>
    %cst_137 = arith.constant dense<0.000000e+00> : vector<8x7xf32>
    %173 = tpu.matmul %172, %171, %cst_137 {dimension_numbers = #tpu.dot_dimension_numbers<[1], [0], [0], [1], [0, 0, 1, 1], [], []>} : vector<8x24xf32>, vector<24x7xf32>, vector<8x7xf32> -> vector<8x7xf32>
    %c0_138 = arith.constant 0 : index
    %c416 = arith.constant 416 : index
    %174 = vector.load %arg3[%c0_138, %c416] : memref<8x1024xf32, #tpu.memory_space<vmem>>, vector<8x1xf32>
    %175 = vector.broadcast %174 : vector<8x1xf32> to vector<8x7xf32>
    %176 = arith.addf %173, %175 : vector<8x7xf32>
    %cst_139 = arith.constant 0.000000e+00 : f32
    %177 = vector.broadcast %cst_139 : f32 to vector<8x7xf32>
    %178 = arith.maximumf %176, %177 : vector<8x7xf32>
    %c0_140 = arith.constant 0 : index
    %c457 = arith.constant 457 : index
    %179 = vector.load %arg4[%c0_140, %c457] : memref<128x768xf32, #tpu.memory_space<vmem>>, vector<7x15xf32>
    %cst_141 = arith.constant dense<0.000000e+00> : vector<8x15xf32>
    %180 = tpu.matmul %178, %179, %cst_141 {dimension_numbers = #tpu.dot_dimension_numbers<[1], [0], [0], [1], [0, 0, 1, 1], [], []>} : vector<8x7xf32>, vector<7x15xf32>, vector<8x15xf32> -> vector<8x15xf32>
    %c0_142 = arith.constant 0 : index
    %c472 = arith.constant 472 : index
    %181 = vector.load %arg4[%c0_142, %c472] : memref<128x768xf32, #tpu.memory_space<vmem>>, vector<7x15xf32>
    %cst_143 = arith.constant dense<0.000000e+00> : vector<8x15xf32>
    %182 = tpu.matmul %178, %181, %cst_143 {dimension_numbers = #tpu.dot_dimension_numbers<[1], [0], [0], [1], [0, 0, 1, 1], [], []>} : vector<8x7xf32>, vector<7x15xf32>, vector<8x15xf32> -> vector<8x15xf32>
    %c0_144 = arith.constant 0 : index
    %c487 = arith.constant 487 : index
    %183 = vector.load %arg4[%c0_144, %c487] : memref<128x768xf32, #tpu.memory_space<vmem>>, vector<7x15xf32>
    %cst_145 = arith.constant dense<0.000000e+00> : vector<8x15xf32>
    %184 = tpu.matmul %178, %183, %cst_145 {dimension_numbers = #tpu.dot_dimension_numbers<[1], [0], [0], [1], [0, 0, 1, 1], [], []>} : vector<8x7xf32>, vector<7x15xf32>, vector<8x15xf32> -> vector<8x15xf32>
    %185 = tpu.concatenate %180, %182, %184 in 0 : vector<8x15xf32>, vector<8x15xf32>, vector<8x15xf32> -> vector<24x15xf32>
    %c0_146 = arith.constant 0 : index
    %c417 = arith.constant 417 : index
    %186 = vector.load %arg3[%c0_146, %c417] : memref<8x1024xf32, #tpu.memory_space<vmem>>, vector<8x24xf32>
    %cst_147 = arith.constant dense<0.000000e+00> : vector<8x15xf32>
    %187 = tpu.matmul %186, %185, %cst_147 {dimension_numbers = #tpu.dot_dimension_numbers<[1], [0], [0], [1], [0, 0, 1, 1], [], []>} : vector<8x24xf32>, vector<24x15xf32>, vector<8x15xf32> -> vector<8x15xf32>
    %c0_148 = arith.constant 0 : index
    %c441 = arith.constant 441 : index
    %188 = vector.load %arg3[%c0_148, %c441] : memref<8x1024xf32, #tpu.memory_space<vmem>>, vector<8x1xf32>
    %189 = vector.broadcast %188 : vector<8x1xf32> to vector<8x15xf32>
    %190 = arith.addf %187, %189 : vector<8x15xf32>
    %cst_149 = arith.constant 0.000000e+00 : f32
    %191 = vector.broadcast %cst_149 : f32 to vector<8x15xf32>
    %192 = arith.maximumf %190, %191 : vector<8x15xf32>
    %c0_150 = arith.constant 0 : index
    %c502 = arith.constant 502 : index
    %193 = vector.load %arg4[%c0_150, %c502] : memref<128x768xf32, #tpu.memory_space<vmem>>, vector<15x31xf32>
    %cst_151 = arith.constant dense<0.000000e+00> : vector<8x31xf32>
    %194 = tpu.matmul %192, %193, %cst_151 {dimension_numbers = #tpu.dot_dimension_numbers<[1], [0], [0], [1], [0, 0, 1, 1], [], []>} : vector<8x15xf32>, vector<15x31xf32>, vector<8x31xf32> -> vector<8x31xf32>
    %c0_152 = arith.constant 0 : index
    %c533 = arith.constant 533 : index
    %195 = vector.load %arg4[%c0_152, %c533] : memref<128x768xf32, #tpu.memory_space<vmem>>, vector<15x31xf32>
    %cst_153 = arith.constant dense<0.000000e+00> : vector<8x31xf32>
    %196 = tpu.matmul %192, %195, %cst_153 {dimension_numbers = #tpu.dot_dimension_numbers<[1], [0], [0], [1], [0, 0, 1, 1], [], []>} : vector<8x15xf32>, vector<15x31xf32>, vector<8x31xf32> -> vector<8x31xf32>
    %c0_154 = arith.constant 0 : index
    %c564 = arith.constant 564 : index
    %197 = vector.load %arg4[%c0_154, %c564] : memref<128x768xf32, #tpu.memory_space<vmem>>, vector<15x31xf32>
    %cst_155 = arith.constant dense<0.000000e+00> : vector<8x31xf32>
    %198 = tpu.matmul %192, %197, %cst_155 {dimension_numbers = #tpu.dot_dimension_numbers<[1], [0], [0], [1], [0, 0, 1, 1], [], []>} : vector<8x15xf32>, vector<15x31xf32>, vector<8x31xf32> -> vector<8x31xf32>
    %199 = tpu.concatenate %194, %196, %198 in 0 : vector<8x31xf32>, vector<8x31xf32>, vector<8x31xf32> -> vector<24x31xf32>
    %c0_156 = arith.constant 0 : index
    %c442 = arith.constant 442 : index
    %200 = vector.load %arg3[%c0_156, %c442] : memref<8x1024xf32, #tpu.memory_space<vmem>>, vector<8x24xf32>
    %cst_157 = arith.constant dense<0.000000e+00> : vector<8x31xf32>
    %201 = tpu.matmul %200, %199, %cst_157 {dimension_numbers = #tpu.dot_dimension_numbers<[1], [0], [0], [1], [0, 0, 1, 1], [], []>} : vector<8x24xf32>, vector<24x31xf32>, vector<8x31xf32> -> vector<8x31xf32>
    %c0_158 = arith.constant 0 : index
    %c466 = arith.constant 466 : index
    %202 = vector.load %arg3[%c0_158, %c466] : memref<8x1024xf32, #tpu.memory_space<vmem>>, vector<8x1xf32>
    %203 = vector.broadcast %202 : vector<8x1xf32> to vector<8x31xf32>
    %204 = arith.addf %201, %203 : vector<8x31xf32>
    %cst_159 = arith.constant 0.000000e+00 : f32
    %205 = vector.broadcast %cst_159 : f32 to vector<8x1xf32>
    %206 = tpu.concatenate %204, %205 in 1 : vector<8x31xf32>, vector<8x1xf32> -> vector<8x32xf32>
    %207 = arith.mulf %97, %206 : vector<8x32xf32>
    %208 = arith.addf %43, %207 : vector<8x32xf32>
    %c0_160 = arith.constant 0 : index
    %c352_161 = arith.constant 352 : index
    %209 = vector.load %arg4[%c0_160, %c352_161] : memref<128x768xf32, #tpu.memory_space<vmem>>, vector<32x15xf32>
    %cst_162 = arith.constant dense<0.000000e+00> : vector<8x15xf32>
    %210 = tpu.matmul %208, %209, %cst_162 {dimension_numbers = #tpu.dot_dimension_numbers<[1], [0], [0], [1], [0, 0, 1, 1], [], []>} : vector<8x32xf32>, vector<32x15xf32>, vector<8x15xf32> -> vector<8x15xf32>
    %c0_163 = arith.constant 0 : index
    %c367_164 = arith.constant 367 : index
    %211 = vector.load %arg4[%c0_163, %c367_164] : memref<128x768xf32, #tpu.memory_space<vmem>>, vector<32x15xf32>
    %cst_165 = arith.constant dense<0.000000e+00> : vector<8x15xf32>
    %212 = tpu.matmul %208, %211, %cst_165 {dimension_numbers = #tpu.dot_dimension_numbers<[1], [0], [0], [1], [0, 0, 1, 1], [], []>} : vector<8x32xf32>, vector<32x15xf32>, vector<8x15xf32> -> vector<8x15xf32>
    %c0_166 = arith.constant 0 : index
    %c382_167 = arith.constant 382 : index
    %213 = vector.load %arg4[%c0_166, %c382_167] : memref<128x768xf32, #tpu.memory_space<vmem>>, vector<32x15xf32>
    %cst_168 = arith.constant dense<0.000000e+00> : vector<8x15xf32>
    %214 = tpu.matmul %208, %213, %cst_168 {dimension_numbers = #tpu.dot_dimension_numbers<[1], [0], [0], [1], [0, 0, 1, 1], [], []>} : vector<8x32xf32>, vector<32x15xf32>, vector<8x15xf32> -> vector<8x15xf32>
    %215 = tpu.concatenate %210, %212, %214 in 0 : vector<8x15xf32>, vector<8x15xf32>, vector<8x15xf32> -> vector<24x15xf32>
    %c0_169 = arith.constant 0 : index
    %c467 = arith.constant 467 : index
    %216 = vector.load %arg3[%c0_169, %c467] : memref<8x1024xf32, #tpu.memory_space<vmem>>, vector<8x24xf32>
    %cst_170 = arith.constant dense<0.000000e+00> : vector<8x15xf32>
    %217 = tpu.matmul %216, %215, %cst_170 {dimension_numbers = #tpu.dot_dimension_numbers<[1], [0], [0], [1], [0, 0, 1, 1], [], []>} : vector<8x24xf32>, vector<24x15xf32>, vector<8x15xf32> -> vector<8x15xf32>
    %c0_171 = arith.constant 0 : index
    %c491 = arith.constant 491 : index
    %218 = vector.load %arg3[%c0_171, %c491] : memref<8x1024xf32, #tpu.memory_space<vmem>>, vector<8x1xf32>
    %219 = vector.broadcast %218 : vector<8x1xf32> to vector<8x15xf32>
    %220 = arith.addf %217, %219 : vector<8x15xf32>
    %c0_172 = arith.constant 0 : index
    %c492 = arith.constant 492 : index
    %221 = vector.load %arg3[%c0_172, %c492] : memref<8x1024xf32, #tpu.memory_space<vmem>>, vector<8x8xf32>
    %222 = arith.mulf %220, %220 : vector<8x15xf32>
    %cst_173 = arith.constant dense<0.000000e+00> : vector<8x15xf32>
    %223 = tpu.matmul %221, %222, %cst_173 {dimension_numbers = #tpu.dot_dimension_numbers<[1], [0], [0], [1], [0, 0, 1, 1], [], []>} : vector<8x8xf32>, vector<8x15xf32>, vector<8x15xf32> -> vector<8x15xf32>
    %c0_174 = arith.constant 0 : index
    %c500 = arith.constant 500 : index
    %224 = vector.load %arg3[%c0_174, %c500] : memref<8x1024xf32, #tpu.memory_space<vmem>>, vector<8x1xf32>
    %225 = vector.broadcast %224 : vector<8x1xf32> to vector<8x15xf32>
    %226 = arith.addf %223, %225 : vector<8x15xf32>
    %227 = math.rsqrt %226 : vector<8x15xf32>
    %228 = arith.mulf %220, %227 : vector<8x15xf32>
    %c0_175 = arith.constant 0 : index
    %c595 = arith.constant 595 : index
    %229 = vector.load %arg4[%c0_175, %c595] : memref<128x768xf32, #tpu.memory_space<vmem>>, vector<15x8xf32>
    %cst_176 = arith.constant dense<0.000000e+00> : vector<8x8xf32>
    %230 = tpu.matmul %228, %229, %cst_176 {dimension_numbers = #tpu.dot_dimension_numbers<[1], [0], [0], [1], [0, 0, 1, 1], [], []>} : vector<8x15xf32>, vector<15x8xf32>, vector<8x8xf32> -> vector<8x8xf32>
    %c0_177 = arith.constant 0 : index
    %c603 = arith.constant 603 : index
    %231 = vector.load %arg4[%c0_177, %c603] : memref<128x768xf32, #tpu.memory_space<vmem>>, vector<15x8xf32>
    %cst_178 = arith.constant dense<0.000000e+00> : vector<8x8xf32>
    %232 = tpu.matmul %228, %231, %cst_178 {dimension_numbers = #tpu.dot_dimension_numbers<[1], [0], [0], [1], [0, 0, 1, 1], [], []>} : vector<8x15xf32>, vector<15x8xf32>, vector<8x8xf32> -> vector<8x8xf32>
    %c0_179 = arith.constant 0 : index
    %c611 = arith.constant 611 : index
    %233 = vector.load %arg4[%c0_179, %c611] : memref<128x768xf32, #tpu.memory_space<vmem>>, vector<15x8xf32>
    %cst_180 = arith.constant dense<0.000000e+00> : vector<8x8xf32>
    %234 = tpu.matmul %228, %233, %cst_180 {dimension_numbers = #tpu.dot_dimension_numbers<[1], [0], [0], [1], [0, 0, 1, 1], [], []>} : vector<8x15xf32>, vector<15x8xf32>, vector<8x8xf32> -> vector<8x8xf32>
    %235 = tpu.concatenate %230, %232, %234 in 0 : vector<8x8xf32>, vector<8x8xf32>, vector<8x8xf32> -> vector<24x8xf32>
    %c0_181 = arith.constant 0 : index
    %c501 = arith.constant 501 : index
    %236 = vector.load %arg3[%c0_181, %c501] : memref<8x1024xf32, #tpu.memory_space<vmem>>, vector<8x24xf32>
    %cst_182 = arith.constant dense<0.000000e+00> : vector<8x8xf32>
    %237 = tpu.matmul %236, %235, %cst_182 {dimension_numbers = #tpu.dot_dimension_numbers<[1], [0], [0], [1], [0, 0, 1, 1], [], []>} : vector<8x24xf32>, vector<24x8xf32>, vector<8x8xf32> -> vector<8x8xf32>
    %c0_183 = arith.constant 0 : index
    %c525 = arith.constant 525 : index
    %238 = vector.load %arg3[%c0_183, %c525] : memref<8x1024xf32, #tpu.memory_space<vmem>>, vector<8x1xf32>
    %239 = vector.broadcast %238 : vector<8x1xf32> to vector<8x8xf32>
    %240 = arith.addf %237, %239 : vector<8x8xf32>
    %c0_184 = arith.constant 0 : index
    %c619 = arith.constant 619 : index
    %241 = vector.load %arg4[%c0_184, %c619] : memref<128x768xf32, #tpu.memory_space<vmem>>, vector<8x8xf32>
    %cst_185 = arith.constant dense<0.000000e+00> : vector<8x8xf32>
    %242 = tpu.matmul %240, %241, %cst_185 {dimension_numbers = #tpu.dot_dimension_numbers<[1], [0], [0], [1], [0, 0, 1, 1], [], []>} : vector<8x8xf32>, vector<8x8xf32>, vector<8x8xf32> -> vector<8x8xf32>
    %c0_186 = arith.constant 0 : index
    %c627 = arith.constant 627 : index
    %243 = vector.load %arg4[%c0_186, %c627] : memref<128x768xf32, #tpu.memory_space<vmem>>, vector<8x8xf32>
    %cst_187 = arith.constant dense<0.000000e+00> : vector<8x8xf32>
    %244 = tpu.matmul %240, %243, %cst_187 {dimension_numbers = #tpu.dot_dimension_numbers<[1], [0], [0], [1], [0, 0, 1, 1], [], []>} : vector<8x8xf32>, vector<8x8xf32>, vector<8x8xf32> -> vector<8x8xf32>
    %c0_188 = arith.constant 0 : index
    %c635 = arith.constant 635 : index
    %245 = vector.load %arg4[%c0_188, %c635] : memref<128x768xf32, #tpu.memory_space<vmem>>, vector<8x8xf32>
    %cst_189 = arith.constant dense<0.000000e+00> : vector<8x8xf32>
    %246 = tpu.matmul %240, %245, %cst_189 {dimension_numbers = #tpu.dot_dimension_numbers<[1], [0], [0], [1], [0, 0, 1, 1], [], []>} : vector<8x8xf32>, vector<8x8xf32>, vector<8x8xf32> -> vector<8x8xf32>
    %247 = tpu.concatenate %242, %244, %246 in 0 : vector<8x8xf32>, vector<8x8xf32>, vector<8x8xf32> -> vector<24x8xf32>
    %c0_190 = arith.constant 0 : index
    %c526 = arith.constant 526 : index
    %248 = vector.load %arg3[%c0_190, %c526] : memref<8x1024xf32, #tpu.memory_space<vmem>>, vector<8x24xf32>
    %cst_191 = arith.constant dense<0.000000e+00> : vector<8x8xf32>
    %249 = tpu.matmul %248, %247, %cst_191 {dimension_numbers = #tpu.dot_dimension_numbers<[1], [0], [0], [1], [0, 0, 1, 1], [], []>} : vector<8x24xf32>, vector<24x8xf32>, vector<8x8xf32> -> vector<8x8xf32>
    %c0_192 = arith.constant 0 : index
    %c550 = arith.constant 550 : index
    %250 = vector.load %arg3[%c0_192, %c550] : memref<8x1024xf32, #tpu.memory_space<vmem>>, vector<8x1xf32>
    %251 = vector.broadcast %250 : vector<8x1xf32> to vector<8x8xf32>
    %252 = arith.addf %249, %251 : vector<8x8xf32>
    %cst_193 = arith.constant 0.000000e+00 : f32
    %253 = vector.broadcast %cst_193 : f32 to vector<8x8xf32>
    %254 = arith.maximumf %252, %253 : vector<8x8xf32>
    %c0_194 = arith.constant 0 : index
    %c619_195 = arith.constant 619 : index
    %255 = vector.load %arg4[%c0_194, %c619_195] : memref<128x768xf32, #tpu.memory_space<vmem>>, vector<8x8xf32>
    %cst_196 = arith.constant dense<0.000000e+00> : vector<8x8xf32>
    %256 = tpu.matmul %254, %255, %cst_196 {dimension_numbers = #tpu.dot_dimension_numbers<[1], [0], [0], [1], [0, 0, 1, 1], [], []>} : vector<8x8xf32>, vector<8x8xf32>, vector<8x8xf32> -> vector<8x8xf32>
    %c0_197 = arith.constant 0 : index
    %c627_198 = arith.constant 627 : index
    %257 = vector.load %arg4[%c0_197, %c627_198] : memref<128x768xf32, #tpu.memory_space<vmem>>, vector<8x8xf32>
    %cst_199 = arith.constant dense<0.000000e+00> : vector<8x8xf32>
    %258 = tpu.matmul %254, %257, %cst_199 {dimension_numbers = #tpu.dot_dimension_numbers<[1], [0], [0], [1], [0, 0, 1, 1], [], []>} : vector<8x8xf32>, vector<8x8xf32>, vector<8x8xf32> -> vector<8x8xf32>
    %c0_200 = arith.constant 0 : index
    %c635_201 = arith.constant 635 : index
    %259 = vector.load %arg4[%c0_200, %c635_201] : memref<128x768xf32, #tpu.memory_space<vmem>>, vector<8x8xf32>
    %cst_202 = arith.constant dense<0.000000e+00> : vector<8x8xf32>
    %260 = tpu.matmul %254, %259, %cst_202 {dimension_numbers = #tpu.dot_dimension_numbers<[1], [0], [0], [1], [0, 0, 1, 1], [], []>} : vector<8x8xf32>, vector<8x8xf32>, vector<8x8xf32> -> vector<8x8xf32>
    %261 = tpu.concatenate %256, %258, %260 in 0 : vector<8x8xf32>, vector<8x8xf32>, vector<8x8xf32> -> vector<24x8xf32>
    %c0_203 = arith.constant 0 : index
    %c551 = arith.constant 551 : index
    %262 = vector.load %arg3[%c0_203, %c551] : memref<8x1024xf32, #tpu.memory_space<vmem>>, vector<8x24xf32>
    %cst_204 = arith.constant dense<0.000000e+00> : vector<8x8xf32>
    %263 = tpu.matmul %262, %261, %cst_204 {dimension_numbers = #tpu.dot_dimension_numbers<[1], [0], [0], [1], [0, 0, 1, 1], [], []>} : vector<8x24xf32>, vector<24x8xf32>, vector<8x8xf32> -> vector<8x8xf32>
    %c0_205 = arith.constant 0 : index
    %c575 = arith.constant 575 : index
    %264 = vector.load %arg3[%c0_205, %c575] : memref<8x1024xf32, #tpu.memory_space<vmem>>, vector<8x1xf32>
    %265 = vector.broadcast %264 : vector<8x1xf32> to vector<8x8xf32>
    %266 = arith.addf %263, %265 : vector<8x8xf32>
    %267 = arith.addf %240, %266 : vector<8x8xf32>
    %c0_206 = arith.constant 0 : index
    %c619_207 = arith.constant 619 : index
    %268 = vector.load %arg4[%c0_206, %c619_207] : memref<128x768xf32, #tpu.memory_space<vmem>>, vector<8x8xf32>
    %cst_208 = arith.constant dense<0.000000e+00> : vector<8x8xf32>
    %269 = tpu.matmul %267, %268, %cst_208 {dimension_numbers = #tpu.dot_dimension_numbers<[1], [0], [0], [1], [0, 0, 1, 1], [], []>} : vector<8x8xf32>, vector<8x8xf32>, vector<8x8xf32> -> vector<8x8xf32>
    %c0_209 = arith.constant 0 : index
    %c627_210 = arith.constant 627 : index
    %270 = vector.load %arg4[%c0_209, %c627_210] : memref<128x768xf32, #tpu.memory_space<vmem>>, vector<8x8xf32>
    %cst_211 = arith.constant dense<0.000000e+00> : vector<8x8xf32>
    %271 = tpu.matmul %267, %270, %cst_211 {dimension_numbers = #tpu.dot_dimension_numbers<[1], [0], [0], [1], [0, 0, 1, 1], [], []>} : vector<8x8xf32>, vector<8x8xf32>, vector<8x8xf32> -> vector<8x8xf32>
    %c0_212 = arith.constant 0 : index
    %c635_213 = arith.constant 635 : index
    %272 = vector.load %arg4[%c0_212, %c635_213] : memref<128x768xf32, #tpu.memory_space<vmem>>, vector<8x8xf32>
    %cst_214 = arith.constant dense<0.000000e+00> : vector<8x8xf32>
    %273 = tpu.matmul %267, %272, %cst_214 {dimension_numbers = #tpu.dot_dimension_numbers<[1], [0], [0], [1], [0, 0, 1, 1], [], []>} : vector<8x8xf32>, vector<8x8xf32>, vector<8x8xf32> -> vector<8x8xf32>
    %274 = tpu.concatenate %269, %271, %273 in 0 : vector<8x8xf32>, vector<8x8xf32>, vector<8x8xf32> -> vector<24x8xf32>
    %c0_215 = arith.constant 0 : index
    %c576 = arith.constant 576 : index
    %275 = vector.load %arg3[%c0_215, %c576] : memref<8x1024xf32, #tpu.memory_space<vmem>>, vector<8x24xf32>
    %cst_216 = arith.constant dense<0.000000e+00> : vector<8x8xf32>
    %276 = tpu.matmul %275, %274, %cst_216 {dimension_numbers = #tpu.dot_dimension_numbers<[1], [0], [0], [1], [0, 0, 1, 1], [], []>} : vector<8x24xf32>, vector<24x8xf32>, vector<8x8xf32> -> vector<8x8xf32>
    %c0_217 = arith.constant 0 : index
    %c600 = arith.constant 600 : index
    %277 = vector.load %arg3[%c0_217, %c600] : memref<8x1024xf32, #tpu.memory_space<vmem>>, vector<8x1xf32>
    %278 = vector.broadcast %277 : vector<8x1xf32> to vector<8x8xf32>
    %279 = arith.addf %276, %278 : vector<8x8xf32>
    %cst_218 = arith.constant 0.000000e+00 : f32
    %280 = vector.broadcast %cst_218 : f32 to vector<8x8xf32>
    %281 = arith.maximumf %279, %280 : vector<8x8xf32>
    %c0_219 = arith.constant 0 : index
    %c619_220 = arith.constant 619 : index
    %282 = vector.load %arg4[%c0_219, %c619_220] : memref<128x768xf32, #tpu.memory_space<vmem>>, vector<8x8xf32>
    %cst_221 = arith.constant dense<0.000000e+00> : vector<8x8xf32>
    %283 = tpu.matmul %281, %282, %cst_221 {dimension_numbers = #tpu.dot_dimension_numbers<[1], [0], [0], [1], [0, 0, 1, 1], [], []>} : vector<8x8xf32>, vector<8x8xf32>, vector<8x8xf32> -> vector<8x8xf32>
    %c0_222 = arith.constant 0 : index
    %c627_223 = arith.constant 627 : index
    %284 = vector.load %arg4[%c0_222, %c627_223] : memref<128x768xf32, #tpu.memory_space<vmem>>, vector<8x8xf32>
    %cst_224 = arith.constant dense<0.000000e+00> : vector<8x8xf32>
    %285 = tpu.matmul %281, %284, %cst_224 {dimension_numbers = #tpu.dot_dimension_numbers<[1], [0], [0], [1], [0, 0, 1, 1], [], []>} : vector<8x8xf32>, vector<8x8xf32>, vector<8x8xf32> -> vector<8x8xf32>
    %c0_225 = arith.constant 0 : index
    %c635_226 = arith.constant 635 : index
    %286 = vector.load %arg4[%c0_225, %c635_226] : memref<128x768xf32, #tpu.memory_space<vmem>>, vector<8x8xf32>
    %cst_227 = arith.constant dense<0.000000e+00> : vector<8x8xf32>
    %287 = tpu.matmul %281, %286, %cst_227 {dimension_numbers = #tpu.dot_dimension_numbers<[1], [0], [0], [1], [0, 0, 1, 1], [], []>} : vector<8x8xf32>, vector<8x8xf32>, vector<8x8xf32> -> vector<8x8xf32>
    %288 = tpu.concatenate %283, %285, %287 in 0 : vector<8x8xf32>, vector<8x8xf32>, vector<8x8xf32> -> vector<24x8xf32>
    %c0_228 = arith.constant 0 : index
    %c601 = arith.constant 601 : index
    %289 = vector.load %arg3[%c0_228, %c601] : memref<8x1024xf32, #tpu.memory_space<vmem>>, vector<8x24xf32>
    %cst_229 = arith.constant dense<0.000000e+00> : vector<8x8xf32>
    %290 = tpu.matmul %289, %288, %cst_229 {dimension_numbers = #tpu.dot_dimension_numbers<[1], [0], [0], [1], [0, 0, 1, 1], [], []>} : vector<8x24xf32>, vector<24x8xf32>, vector<8x8xf32> -> vector<8x8xf32>
    %c0_230 = arith.constant 0 : index
    %c625 = arith.constant 625 : index
    %291 = vector.load %arg3[%c0_230, %c625] : memref<8x1024xf32, #tpu.memory_space<vmem>>, vector<8x1xf32>
    %292 = vector.broadcast %291 : vector<8x1xf32> to vector<8x8xf32>
    %293 = arith.addf %290, %292 : vector<8x8xf32>
    %294 = arith.addf %267, %293 : vector<8x8xf32>
    %c0_231 = arith.constant 0 : index
    %c643 = arith.constant 643 : index
    %295 = vector.load %arg4[%c0_231, %c643] : memref<128x768xf32, #tpu.memory_space<vmem>>, vector<8x7xf32>
    %cst_232 = arith.constant dense<0.000000e+00> : vector<8x7xf32>
    %296 = tpu.matmul %240, %295, %cst_232 {dimension_numbers = #tpu.dot_dimension_numbers<[1], [0], [0], [1], [0, 0, 1, 1], [], []>} : vector<8x8xf32>, vector<8x7xf32>, vector<8x7xf32> -> vector<8x7xf32>
    %c0_233 = arith.constant 0 : index
    %c650 = arith.constant 650 : index
    %297 = vector.load %arg4[%c0_233, %c650] : memref<128x768xf32, #tpu.memory_space<vmem>>, vector<8x7xf32>
    %cst_234 = arith.constant dense<0.000000e+00> : vector<8x7xf32>
    %298 = tpu.matmul %240, %297, %cst_234 {dimension_numbers = #tpu.dot_dimension_numbers<[1], [0], [0], [1], [0, 0, 1, 1], [], []>} : vector<8x8xf32>, vector<8x7xf32>, vector<8x7xf32> -> vector<8x7xf32>
    %299 = tpu.concatenate %296, %298 in 0 : vector<8x7xf32>, vector<8x7xf32> -> vector<16x7xf32>
    %c0_235 = arith.constant 0 : index
    %c626 = arith.constant 626 : index
    %300 = vector.load %arg3[%c0_235, %c626] : memref<8x1024xf32, #tpu.memory_space<vmem>>, vector<8x16xf32>
    %cst_236 = arith.constant dense<0.000000e+00> : vector<8x7xf32>
    %301 = tpu.matmul %300, %299, %cst_236 {dimension_numbers = #tpu.dot_dimension_numbers<[1], [0], [0], [1], [0, 0, 1, 1], [], []>} : vector<8x16xf32>, vector<16x7xf32>, vector<8x7xf32> -> vector<8x7xf32>
    %c0_237 = arith.constant 0 : index
    %c642 = arith.constant 642 : index
    %302 = vector.load %arg3[%c0_237, %c642] : memref<8x1024xf32, #tpu.memory_space<vmem>>, vector<8x1xf32>
    %303 = vector.broadcast %302 : vector<8x1xf32> to vector<8x7xf32>
    %304 = arith.addf %301, %303 : vector<8x7xf32>
    %cst_238 = arith.constant 0.000000e+00 : f32
    %305 = vector.broadcast %cst_238 : f32 to vector<8x7xf32>
    %306 = arith.maximumf %304, %305 : vector<8x7xf32>
    %c0_239 = arith.constant 0 : index
    %c418_240 = arith.constant 418 : index
    %307 = vector.load %arg4[%c0_239, %c418_240] : memref<128x768xf32, #tpu.memory_space<vmem>>, vector<7x3xf32>
    %cst_241 = arith.constant dense<0.000000e+00> : vector<8x3xf32>
    %308 = tpu.matmul %306, %307, %cst_241 {dimension_numbers = #tpu.dot_dimension_numbers<[1], [0], [0], [1], [0, 0, 1, 1], [], []>} : vector<8x7xf32>, vector<7x3xf32>, vector<8x3xf32> -> vector<8x3xf32>
    %c0_242 = arith.constant 0 : index
    %c421_243 = arith.constant 421 : index
    %309 = vector.load %arg4[%c0_242, %c421_243] : memref<128x768xf32, #tpu.memory_space<vmem>>, vector<7x3xf32>
    %cst_244 = arith.constant dense<0.000000e+00> : vector<8x3xf32>
    %310 = tpu.matmul %306, %309, %cst_244 {dimension_numbers = #tpu.dot_dimension_numbers<[1], [0], [0], [1], [0, 0, 1, 1], [], []>} : vector<8x7xf32>, vector<7x3xf32>, vector<8x3xf32> -> vector<8x3xf32>
    %c0_245 = arith.constant 0 : index
    %c424_246 = arith.constant 424 : index
    %311 = vector.load %arg4[%c0_245, %c424_246] : memref<128x768xf32, #tpu.memory_space<vmem>>, vector<7x3xf32>
    %cst_247 = arith.constant dense<0.000000e+00> : vector<8x3xf32>
    %312 = tpu.matmul %306, %311, %cst_247 {dimension_numbers = #tpu.dot_dimension_numbers<[1], [0], [0], [1], [0, 0, 1, 1], [], []>} : vector<8x7xf32>, vector<7x3xf32>, vector<8x3xf32> -> vector<8x3xf32>
    %313 = tpu.concatenate %308, %310, %312 in 0 : vector<8x3xf32>, vector<8x3xf32>, vector<8x3xf32> -> vector<24x3xf32>
    %c0_248 = arith.constant 0 : index
    %c643_249 = arith.constant 643 : index
    %314 = vector.load %arg3[%c0_248, %c643_249] : memref<8x1024xf32, #tpu.memory_space<vmem>>, vector<8x24xf32>
    %cst_250 = arith.constant dense<0.000000e+00> : vector<8x3xf32>
    %315 = tpu.matmul %314, %313, %cst_250 {dimension_numbers = #tpu.dot_dimension_numbers<[1], [0], [0], [1], [0, 0, 1, 1], [], []>} : vector<8x24xf32>, vector<24x3xf32>, vector<8x3xf32> -> vector<8x3xf32>
    %c0_251 = arith.constant 0 : index
    %c667 = arith.constant 667 : index
    %316 = vector.load %arg3[%c0_251, %c667] : memref<8x1024xf32, #tpu.memory_space<vmem>>, vector<8x1xf32>
    %317 = vector.broadcast %316 : vector<8x1xf32> to vector<8x3xf32>
    %318 = arith.addf %315, %317 : vector<8x3xf32>
    %cst_252 = arith.constant 0.000000e+00 : f32
    %319 = vector.broadcast %cst_252 : f32 to vector<8x3xf32>
    %320 = arith.maximumf %318, %319 : vector<8x3xf32>
    %c0_253 = arith.constant 0 : index
    %c657 = arith.constant 657 : index
    %321 = vector.load %arg4[%c0_253, %c657] : memref<128x768xf32, #tpu.memory_space<vmem>>, vector<3x2xf32>
    %cst_254 = arith.constant dense<0.000000e+00> : vector<8x2xf32>
    %322 = tpu.matmul %320, %321, %cst_254 {dimension_numbers = #tpu.dot_dimension_numbers<[1], [0], [0], [1], [0, 0, 1, 1], [], []>} : vector<8x3xf32>, vector<3x2xf32>, vector<8x2xf32> -> vector<8x2xf32>
    %c0_255 = arith.constant 0 : index
    %c659 = arith.constant 659 : index
    %323 = vector.load %arg4[%c0_255, %c659] : memref<128x768xf32, #tpu.memory_space<vmem>>, vector<3x2xf32>
    %cst_256 = arith.constant dense<0.000000e+00> : vector<8x2xf32>
    %324 = tpu.matmul %320, %323, %cst_256 {dimension_numbers = #tpu.dot_dimension_numbers<[1], [0], [0], [1], [0, 0, 1, 1], [], []>} : vector<8x3xf32>, vector<3x2xf32>, vector<8x2xf32> -> vector<8x2xf32>
    %325 = tpu.concatenate %322, %324 in 0 : vector<8x2xf32>, vector<8x2xf32> -> vector<16x2xf32>
    %c0_257 = arith.constant 0 : index
    %c668 = arith.constant 668 : index
    %326 = vector.load %arg3[%c0_257, %c668] : memref<8x1024xf32, #tpu.memory_space<vmem>>, vector<8x16xf32>
    %cst_258 = arith.constant dense<0.000000e+00> : vector<8x2xf32>
    %327 = tpu.matmul %326, %325, %cst_258 {dimension_numbers = #tpu.dot_dimension_numbers<[1], [0], [0], [1], [0, 0, 1, 1], [], []>} : vector<8x16xf32>, vector<16x2xf32>, vector<8x2xf32> -> vector<8x2xf32>
    %c0_259 = arith.constant 0 : index
    %c684 = arith.constant 684 : index
    %328 = vector.load %arg3[%c0_259, %c684] : memref<8x1024xf32, #tpu.memory_space<vmem>>, vector<8x1xf32>
    %329 = vector.broadcast %328 : vector<8x1xf32> to vector<8x2xf32>
    %330 = arith.addf %327, %329 : vector<8x2xf32>
    %c0_260 = arith.constant 0 : index
    %c661 = arith.constant 661 : index
    %331 = vector.load %arg4[%c0_260, %c661] : memref<128x768xf32, #tpu.memory_space<vmem>>, vector<2x2xf32>
    %cst_261 = arith.constant dense<0.000000e+00> : vector<8x2xf32>
    %332 = tpu.matmul %330, %331, %cst_261 {dimension_numbers = #tpu.dot_dimension_numbers<[1], [0], [0], [1], [0, 0, 1, 1], [], []>} : vector<8x2xf32>, vector<2x2xf32>, vector<8x2xf32> -> vector<8x2xf32>
    %c0_262 = arith.constant 0 : index
    %c663 = arith.constant 663 : index
    %333 = vector.load %arg4[%c0_262, %c663] : memref<128x768xf32, #tpu.memory_space<vmem>>, vector<2x2xf32>
    %cst_263 = arith.constant dense<0.000000e+00> : vector<8x2xf32>
    %334 = tpu.matmul %330, %333, %cst_263 {dimension_numbers = #tpu.dot_dimension_numbers<[1], [0], [0], [1], [0, 0, 1, 1], [], []>} : vector<8x2xf32>, vector<2x2xf32>, vector<8x2xf32> -> vector<8x2xf32>
    %c0_264 = arith.constant 0 : index
    %c665 = arith.constant 665 : index
    %335 = vector.load %arg4[%c0_264, %c665] : memref<128x768xf32, #tpu.memory_space<vmem>>, vector<2x2xf32>
    %cst_265 = arith.constant dense<0.000000e+00> : vector<8x2xf32>
    %336 = tpu.matmul %330, %335, %cst_265 {dimension_numbers = #tpu.dot_dimension_numbers<[1], [0], [0], [1], [0, 0, 1, 1], [], []>} : vector<8x2xf32>, vector<2x2xf32>, vector<8x2xf32> -> vector<8x2xf32>
    %337 = tpu.concatenate %332, %334, %336 in 0 : vector<8x2xf32>, vector<8x2xf32>, vector<8x2xf32> -> vector<24x2xf32>
    %c0_266 = arith.constant 0 : index
    %c685 = arith.constant 685 : index
    %338 = vector.load %arg3[%c0_266, %c685] : memref<8x1024xf32, #tpu.memory_space<vmem>>, vector<8x24xf32>
    %cst_267 = arith.constant dense<0.000000e+00> : vector<8x2xf32>
    %339 = tpu.matmul %338, %337, %cst_267 {dimension_numbers = #tpu.dot_dimension_numbers<[1], [0], [0], [1], [0, 0, 1, 1], [], []>} : vector<8x24xf32>, vector<24x2xf32>, vector<8x2xf32> -> vector<8x2xf32>
    %c0_268 = arith.constant 0 : index
    %c709 = arith.constant 709 : index
    %340 = vector.load %arg3[%c0_268, %c709] : memref<8x1024xf32, #tpu.memory_space<vmem>>, vector<8x1xf32>
    %341 = vector.broadcast %340 : vector<8x1xf32> to vector<8x2xf32>
    %342 = arith.addf %339, %341 : vector<8x2xf32>
    %cst_269 = arith.constant 0.000000e+00 : f32
    %343 = vector.broadcast %cst_269 : f32 to vector<8x2xf32>
    %344 = arith.maximumf %342, %343 : vector<8x2xf32>
    %c0_270 = arith.constant 0 : index
    %c661_271 = arith.constant 661 : index
    %345 = vector.load %arg4[%c0_270, %c661_271] : memref<128x768xf32, #tpu.memory_space<vmem>>, vector<2x2xf32>
    %cst_272 = arith.constant dense<0.000000e+00> : vector<8x2xf32>
    %346 = tpu.matmul %344, %345, %cst_272 {dimension_numbers = #tpu.dot_dimension_numbers<[1], [0], [0], [1], [0, 0, 1, 1], [], []>} : vector<8x2xf32>, vector<2x2xf32>, vector<8x2xf32> -> vector<8x2xf32>
    %c0_273 = arith.constant 0 : index
    %c663_274 = arith.constant 663 : index
    %347 = vector.load %arg4[%c0_273, %c663_274] : memref<128x768xf32, #tpu.memory_space<vmem>>, vector<2x2xf32>
    %cst_275 = arith.constant dense<0.000000e+00> : vector<8x2xf32>
    %348 = tpu.matmul %344, %347, %cst_275 {dimension_numbers = #tpu.dot_dimension_numbers<[1], [0], [0], [1], [0, 0, 1, 1], [], []>} : vector<8x2xf32>, vector<2x2xf32>, vector<8x2xf32> -> vector<8x2xf32>
    %c0_276 = arith.constant 0 : index
    %c665_277 = arith.constant 665 : index
    %349 = vector.load %arg4[%c0_276, %c665_277] : memref<128x768xf32, #tpu.memory_space<vmem>>, vector<2x2xf32>
    %cst_278 = arith.constant dense<0.000000e+00> : vector<8x2xf32>
    %350 = tpu.matmul %344, %349, %cst_278 {dimension_numbers = #tpu.dot_dimension_numbers<[1], [0], [0], [1], [0, 0, 1, 1], [], []>} : vector<8x2xf32>, vector<2x2xf32>, vector<8x2xf32> -> vector<8x2xf32>
    %351 = tpu.concatenate %346, %348, %350 in 0 : vector<8x2xf32>, vector<8x2xf32>, vector<8x2xf32> -> vector<24x2xf32>
    %c0_279 = arith.constant 0 : index
    %c710 = arith.constant 710 : index
    %352 = vector.load %arg3[%c0_279, %c710] : memref<8x1024xf32, #tpu.memory_space<vmem>>, vector<8x24xf32>
    %cst_280 = arith.constant dense<0.000000e+00> : vector<8x2xf32>
    %353 = tpu.matmul %352, %351, %cst_280 {dimension_numbers = #tpu.dot_dimension_numbers<[1], [0], [0], [1], [0, 0, 1, 1], [], []>} : vector<8x24xf32>, vector<24x2xf32>, vector<8x2xf32> -> vector<8x2xf32>
    %c0_281 = arith.constant 0 : index
    %c734 = arith.constant 734 : index
    %354 = vector.load %arg3[%c0_281, %c734] : memref<8x1024xf32, #tpu.memory_space<vmem>>, vector<8x1xf32>
    %355 = vector.broadcast %354 : vector<8x1xf32> to vector<8x2xf32>
    %356 = arith.addf %353, %355 : vector<8x2xf32>
    %357 = arith.addf %330, %356 : vector<8x2xf32>
    %c0_282 = arith.constant 0 : index
    %c667_283 = arith.constant 667 : index
    %358 = vector.load %arg4[%c0_282, %c667_283] : memref<128x768xf32, #tpu.memory_space<vmem>>, vector<2x3xf32>
    %cst_284 = arith.constant dense<0.000000e+00> : vector<8x3xf32>
    %359 = tpu.matmul %357, %358, %cst_284 {dimension_numbers = #tpu.dot_dimension_numbers<[1], [0], [0], [1], [0, 0, 1, 1], [], []>} : vector<8x2xf32>, vector<2x3xf32>, vector<8x3xf32> -> vector<8x3xf32>
    %c0_285 = arith.constant 0 : index
    %c670 = arith.constant 670 : index
    %360 = vector.load %arg4[%c0_285, %c670] : memref<128x768xf32, #tpu.memory_space<vmem>>, vector<2x3xf32>
    %cst_286 = arith.constant dense<0.000000e+00> : vector<8x3xf32>
    %361 = tpu.matmul %357, %360, %cst_286 {dimension_numbers = #tpu.dot_dimension_numbers<[1], [0], [0], [1], [0, 0, 1, 1], [], []>} : vector<8x2xf32>, vector<2x3xf32>, vector<8x3xf32> -> vector<8x3xf32>
    %362 = tpu.concatenate %359, %361 in 0 : vector<8x3xf32>, vector<8x3xf32> -> vector<16x3xf32>
    %c0_287 = arith.constant 0 : index
    %c735 = arith.constant 735 : index
    %363 = vector.load %arg3[%c0_287, %c735] : memref<8x1024xf32, #tpu.memory_space<vmem>>, vector<8x16xf32>
    %cst_288 = arith.constant dense<0.000000e+00> : vector<8x3xf32>
    %364 = tpu.matmul %363, %362, %cst_288 {dimension_numbers = #tpu.dot_dimension_numbers<[1], [0], [0], [1], [0, 0, 1, 1], [], []>} : vector<8x16xf32>, vector<16x3xf32>, vector<8x3xf32> -> vector<8x3xf32>
    %c0_289 = arith.constant 0 : index
    %c751 = arith.constant 751 : index
    %365 = vector.load %arg3[%c0_289, %c751] : memref<8x1024xf32, #tpu.memory_space<vmem>>, vector<8x1xf32>
    %366 = vector.broadcast %365 : vector<8x1xf32> to vector<8x3xf32>
    %367 = arith.addf %364, %366 : vector<8x3xf32>
    %cst_290 = arith.constant 0.000000e+00 : f32
    %368 = vector.broadcast %cst_290 : f32 to vector<8x3xf32>
    %369 = arith.maximumf %367, %368 : vector<8x3xf32>
    %c0_291 = arith.constant 0 : index
    %c436_292 = arith.constant 436 : index
    %370 = vector.load %arg4[%c0_291, %c436_292] : memref<128x768xf32, #tpu.memory_space<vmem>>, vector<3x7xf32>
    %cst_293 = arith.constant dense<0.000000e+00> : vector<8x7xf32>
    %371 = tpu.matmul %369, %370, %cst_293 {dimension_numbers = #tpu.dot_dimension_numbers<[1], [0], [0], [1], [0, 0, 1, 1], [], []>} : vector<8x3xf32>, vector<3x7xf32>, vector<8x7xf32> -> vector<8x7xf32>
    %c0_294 = arith.constant 0 : index
    %c443_295 = arith.constant 443 : index
    %372 = vector.load %arg4[%c0_294, %c443_295] : memref<128x768xf32, #tpu.memory_space<vmem>>, vector<3x7xf32>
    %cst_296 = arith.constant dense<0.000000e+00> : vector<8x7xf32>
    %373 = tpu.matmul %369, %372, %cst_296 {dimension_numbers = #tpu.dot_dimension_numbers<[1], [0], [0], [1], [0, 0, 1, 1], [], []>} : vector<8x3xf32>, vector<3x7xf32>, vector<8x7xf32> -> vector<8x7xf32>
    %c0_297 = arith.constant 0 : index
    %c450_298 = arith.constant 450 : index
    %374 = vector.load %arg4[%c0_297, %c450_298] : memref<128x768xf32, #tpu.memory_space<vmem>>, vector<3x7xf32>
    %cst_299 = arith.constant dense<0.000000e+00> : vector<8x7xf32>
    %375 = tpu.matmul %369, %374, %cst_299 {dimension_numbers = #tpu.dot_dimension_numbers<[1], [0], [0], [1], [0, 0, 1, 1], [], []>} : vector<8x3xf32>, vector<3x7xf32>, vector<8x7xf32> -> vector<8x7xf32>
    %376 = tpu.concatenate %371, %373, %375 in 0 : vector<8x7xf32>, vector<8x7xf32>, vector<8x7xf32> -> vector<24x7xf32>
    %c0_300 = arith.constant 0 : index
    %c752 = arith.constant 752 : index
    %377 = vector.load %arg3[%c0_300, %c752] : memref<8x1024xf32, #tpu.memory_space<vmem>>, vector<8x24xf32>
    %cst_301 = arith.constant dense<0.000000e+00> : vector<8x7xf32>
    %378 = tpu.matmul %377, %376, %cst_301 {dimension_numbers = #tpu.dot_dimension_numbers<[1], [0], [0], [1], [0, 0, 1, 1], [], []>} : vector<8x24xf32>, vector<24x7xf32>, vector<8x7xf32> -> vector<8x7xf32>
    %c0_302 = arith.constant 0 : index
    %c776 = arith.constant 776 : index
    %379 = vector.load %arg3[%c0_302, %c776] : memref<8x1024xf32, #tpu.memory_space<vmem>>, vector<8x1xf32>
    %380 = vector.broadcast %379 : vector<8x1xf32> to vector<8x7xf32>
    %381 = arith.addf %378, %380 : vector<8x7xf32>
    %cst_303 = arith.constant 0.000000e+00 : f32
    %382 = vector.broadcast %cst_303 : f32 to vector<8x7xf32>
    %383 = arith.maximumf %381, %382 : vector<8x7xf32>
    %c0_304 = arith.constant 0 : index
    %c673 = arith.constant 673 : index
    %384 = vector.load %arg4[%c0_304, %c673] : memref<128x768xf32, #tpu.memory_space<vmem>>, vector<7x8xf32>
    %cst_305 = arith.constant dense<0.000000e+00> : vector<8x8xf32>
    %385 = tpu.matmul %383, %384, %cst_305 {dimension_numbers = #tpu.dot_dimension_numbers<[1], [0], [0], [1], [0, 0, 1, 1], [], []>} : vector<8x7xf32>, vector<7x8xf32>, vector<8x8xf32> -> vector<8x8xf32>
    %c0_306 = arith.constant 0 : index
    %c681 = arith.constant 681 : index
    %386 = vector.load %arg4[%c0_306, %c681] : memref<128x768xf32, #tpu.memory_space<vmem>>, vector<7x8xf32>
    %cst_307 = arith.constant dense<0.000000e+00> : vector<8x8xf32>
    %387 = tpu.matmul %383, %386, %cst_307 {dimension_numbers = #tpu.dot_dimension_numbers<[1], [0], [0], [1], [0, 0, 1, 1], [], []>} : vector<8x7xf32>, vector<7x8xf32>, vector<8x8xf32> -> vector<8x8xf32>
    %388 = tpu.concatenate %385, %387 in 0 : vector<8x8xf32>, vector<8x8xf32> -> vector<16x8xf32>
    %c0_308 = arith.constant 0 : index
    %c777 = arith.constant 777 : index
    %389 = vector.load %arg3[%c0_308, %c777] : memref<8x1024xf32, #tpu.memory_space<vmem>>, vector<8x16xf32>
    %cst_309 = arith.constant dense<0.000000e+00> : vector<8x8xf32>
    %390 = tpu.matmul %389, %388, %cst_309 {dimension_numbers = #tpu.dot_dimension_numbers<[1], [0], [0], [1], [0, 0, 1, 1], [], []>} : vector<8x16xf32>, vector<16x8xf32>, vector<8x8xf32> -> vector<8x8xf32>
    %c0_310 = arith.constant 0 : index
    %c793 = arith.constant 793 : index
    %391 = vector.load %arg3[%c0_310, %c793] : memref<8x1024xf32, #tpu.memory_space<vmem>>, vector<8x1xf32>
    %392 = vector.broadcast %391 : vector<8x1xf32> to vector<8x8xf32>
    %393 = arith.addf %390, %392 : vector<8x8xf32>
    %394 = arith.mulf %294, %393 : vector<8x8xf32>
    %395 = arith.addf %240, %394 : vector<8x8xf32>
    %c0_311 = arith.constant 0 : index
    %c689 = arith.constant 689 : index
    %396 = vector.load %arg4[%c0_311, %c689] : memref<128x768xf32, #tpu.memory_space<vmem>>, vector<64x8xf32>
    %cst_312 = arith.constant dense<0.000000e+00> : vector<8x8xf32>
    %397 = tpu.matmul %25, %396, %cst_312 {dimension_numbers = #tpu.dot_dimension_numbers<[1], [0], [0], [1], [0, 0, 1, 1], [], []>} : vector<8x64xf32>, vector<64x8xf32>, vector<8x8xf32> -> vector<8x8xf32>
    %c0_313 = arith.constant 0 : index
    %c697 = arith.constant 697 : index
    %398 = vector.load %arg4[%c0_313, %c697] : memref<128x768xf32, #tpu.memory_space<vmem>>, vector<64x8xf32>
    %cst_314 = arith.constant dense<0.000000e+00> : vector<8x8xf32>
    %399 = tpu.matmul %25, %398, %cst_314 {dimension_numbers = #tpu.dot_dimension_numbers<[1], [0], [0], [1], [0, 0, 1, 1], [], []>} : vector<8x64xf32>, vector<64x8xf32>, vector<8x8xf32> -> vector<8x8xf32>
    %c0_315 = arith.constant 0 : index
    %c705 = arith.constant 705 : index
    %400 = vector.load %arg4[%c0_315, %c705] : memref<128x768xf32, #tpu.memory_space<vmem>>, vector<64x8xf32>
    %cst_316 = arith.constant dense<0.000000e+00> : vector<8x8xf32>
    %401 = tpu.matmul %25, %400, %cst_316 {dimension_numbers = #tpu.dot_dimension_numbers<[1], [0], [0], [1], [0, 0, 1, 1], [], []>} : vector<8x64xf32>, vector<64x8xf32>, vector<8x8xf32> -> vector<8x8xf32>
    %402 = tpu.concatenate %397, %399, %401 in 0 : vector<8x8xf32>, vector<8x8xf32>, vector<8x8xf32> -> vector<24x8xf32>
    %c0_317 = arith.constant 0 : index
    %c794 = arith.constant 794 : index
    %403 = vector.load %arg3[%c0_317, %c794] : memref<8x1024xf32, #tpu.memory_space<vmem>>, vector<8x24xf32>
    %cst_318 = arith.constant dense<0.000000e+00> : vector<8x8xf32>
    %404 = tpu.matmul %403, %402, %cst_318 {dimension_numbers = #tpu.dot_dimension_numbers<[1], [0], [0], [1], [0, 0, 1, 1], [], []>} : vector<8x24xf32>, vector<24x8xf32>, vector<8x8xf32> -> vector<8x8xf32>
    %c0_319 = arith.constant 0 : index
    %c818 = arith.constant 818 : index
    %405 = vector.load %arg3[%c0_319, %c818] : memref<8x1024xf32, #tpu.memory_space<vmem>>, vector<8x1xf32>
    %406 = vector.broadcast %405 : vector<8x1xf32> to vector<8x8xf32>
    %407 = arith.addf %404, %406 : vector<8x8xf32>
    %c0_320 = arith.constant 0 : index
    %c713 = arith.constant 713 : index
    %408 = vector.load %arg4[%c0_320, %c713] : memref<128x768xf32, #tpu.memory_space<vmem>>, vector<32x8xf32>
    %cst_321 = arith.constant dense<0.000000e+00> : vector<8x8xf32>
    %409 = tpu.matmul %43, %408, %cst_321 {dimension_numbers = #tpu.dot_dimension_numbers<[1], [0], [0], [1], [0, 0, 1, 1], [], []>} : vector<8x32xf32>, vector<32x8xf32>, vector<8x8xf32> -> vector<8x8xf32>
    %c0_322 = arith.constant 0 : index
    %c721 = arith.constant 721 : index
    %410 = vector.load %arg4[%c0_322, %c721] : memref<128x768xf32, #tpu.memory_space<vmem>>, vector<32x8xf32>
    %cst_323 = arith.constant dense<0.000000e+00> : vector<8x8xf32>
    %411 = tpu.matmul %43, %410, %cst_323 {dimension_numbers = #tpu.dot_dimension_numbers<[1], [0], [0], [1], [0, 0, 1, 1], [], []>} : vector<8x32xf32>, vector<32x8xf32>, vector<8x8xf32> -> vector<8x8xf32>
    %c0_324 = arith.constant 0 : index
    %c729 = arith.constant 729 : index
    %412 = vector.load %arg4[%c0_324, %c729] : memref<128x768xf32, #tpu.memory_space<vmem>>, vector<32x8xf32>
    %cst_325 = arith.constant dense<0.000000e+00> : vector<8x8xf32>
    %413 = tpu.matmul %43, %412, %cst_325 {dimension_numbers = #tpu.dot_dimension_numbers<[1], [0], [0], [1], [0, 0, 1, 1], [], []>} : vector<8x32xf32>, vector<32x8xf32>, vector<8x8xf32> -> vector<8x8xf32>
    %414 = tpu.concatenate %409, %411, %413 in 0 : vector<8x8xf32>, vector<8x8xf32>, vector<8x8xf32> -> vector<24x8xf32>
    %c0_326 = arith.constant 0 : index
    %c819 = arith.constant 819 : index
    %415 = vector.load %arg3[%c0_326, %c819] : memref<8x1024xf32, #tpu.memory_space<vmem>>, vector<8x24xf32>
    %cst_327 = arith.constant dense<0.000000e+00> : vector<8x8xf32>
    %416 = tpu.matmul %415, %414, %cst_327 {dimension_numbers = #tpu.dot_dimension_numbers<[1], [0], [0], [1], [0, 0, 1, 1], [], []>} : vector<8x24xf32>, vector<24x8xf32>, vector<8x8xf32> -> vector<8x8xf32>
    %c0_328 = arith.constant 0 : index
    %c843 = arith.constant 843 : index
    %417 = vector.load %arg3[%c0_328, %c843] : memref<8x1024xf32, #tpu.memory_space<vmem>>, vector<8x1xf32>
    %418 = vector.broadcast %417 : vector<8x1xf32> to vector<8x8xf32>
    %419 = arith.addf %416, %418 : vector<8x8xf32>
    %c0_329 = arith.constant 0 : index
    %c595_330 = arith.constant 595 : index
    %420 = vector.load %arg4[%c0_329, %c595_330] : memref<128x768xf32, #tpu.memory_space<vmem>>, vector<15x8xf32>
    %cst_331 = arith.constant dense<0.000000e+00> : vector<8x8xf32>
    %421 = tpu.matmul %228, %420, %cst_331 {dimension_numbers = #tpu.dot_dimension_numbers<[1], [0], [0], [1], [0, 0, 1, 1], [], []>} : vector<8x15xf32>, vector<15x8xf32>, vector<8x8xf32> -> vector<8x8xf32>
    %c0_332 = arith.constant 0 : index
    %c603_333 = arith.constant 603 : index
    %422 = vector.load %arg4[%c0_332, %c603_333] : memref<128x768xf32, #tpu.memory_space<vmem>>, vector<15x8xf32>
    %cst_334 = arith.constant dense<0.000000e+00> : vector<8x8xf32>
    %423 = tpu.matmul %228, %422, %cst_334 {dimension_numbers = #tpu.dot_dimension_numbers<[1], [0], [0], [1], [0, 0, 1, 1], [], []>} : vector<8x15xf32>, vector<15x8xf32>, vector<8x8xf32> -> vector<8x8xf32>
    %c0_335 = arith.constant 0 : index
    %c611_336 = arith.constant 611 : index
    %424 = vector.load %arg4[%c0_335, %c611_336] : memref<128x768xf32, #tpu.memory_space<vmem>>, vector<15x8xf32>
    %cst_337 = arith.constant dense<0.000000e+00> : vector<8x8xf32>
    %425 = tpu.matmul %228, %424, %cst_337 {dimension_numbers = #tpu.dot_dimension_numbers<[1], [0], [0], [1], [0, 0, 1, 1], [], []>} : vector<8x15xf32>, vector<15x8xf32>, vector<8x8xf32> -> vector<8x8xf32>
    %426 = tpu.concatenate %421, %423, %425 in 0 : vector<8x8xf32>, vector<8x8xf32>, vector<8x8xf32> -> vector<24x8xf32>
    %c0_338 = arith.constant 0 : index
    %c844 = arith.constant 844 : index
    %427 = vector.load %arg3[%c0_338, %c844] : memref<8x1024xf32, #tpu.memory_space<vmem>>, vector<8x24xf32>
    %cst_339 = arith.constant dense<0.000000e+00> : vector<8x8xf32>
    %428 = tpu.matmul %427, %426, %cst_339 {dimension_numbers = #tpu.dot_dimension_numbers<[1], [0], [0], [1], [0, 0, 1, 1], [], []>} : vector<8x24xf32>, vector<24x8xf32>, vector<8x8xf32> -> vector<8x8xf32>
    %c0_340 = arith.constant 0 : index
    %c868 = arith.constant 868 : index
    %429 = vector.load %arg3[%c0_340, %c868] : memref<8x1024xf32, #tpu.memory_space<vmem>>, vector<8x1xf32>
    %430 = vector.broadcast %429 : vector<8x1xf32> to vector<8x8xf32>
    %431 = arith.addf %428, %430 : vector<8x8xf32>
    %c0_341 = arith.constant 0 : index
    %c737 = arith.constant 737 : index
    %432 = vector.load %arg4[%c0_341, %c737] : memref<128x768xf32, #tpu.memory_space<vmem>>, vector<8x4xf32>
    %cst_342 = arith.constant dense<0.000000e+00> : vector<8x4xf32>
    %433 = tpu.matmul %395, %432, %cst_342 {dimension_numbers = #tpu.dot_dimension_numbers<[1], [0], [0], [1], [0, 0, 1, 1], [], []>} : vector<8x8xf32>, vector<8x4xf32>, vector<8x4xf32> -> vector<8x4xf32>
    %c0_343 = arith.constant 0 : index
    %c741 = arith.constant 741 : index
    %434 = vector.load %arg4[%c0_343, %c741] : memref<128x768xf32, #tpu.memory_space<vmem>>, vector<8x4xf32>
    %cst_344 = arith.constant dense<0.000000e+00> : vector<8x4xf32>
    %435 = tpu.matmul %395, %434, %cst_344 {dimension_numbers = #tpu.dot_dimension_numbers<[1], [0], [0], [1], [0, 0, 1, 1], [], []>} : vector<8x8xf32>, vector<8x4xf32>, vector<8x4xf32> -> vector<8x4xf32>
    %436 = tpu.concatenate %433, %435 in 0 : vector<8x4xf32>, vector<8x4xf32> -> vector<16x4xf32>
    %c0_345 = arith.constant 0 : index
    %c869 = arith.constant 869 : index
    %437 = vector.load %arg3[%c0_345, %c869] : memref<8x1024xf32, #tpu.memory_space<vmem>>, vector<8x16xf32>
    %cst_346 = arith.constant dense<0.000000e+00> : vector<8x4xf32>
    %438 = tpu.matmul %437, %436, %cst_346 {dimension_numbers = #tpu.dot_dimension_numbers<[1], [0], [0], [1], [0, 0, 1, 1], [], []>} : vector<8x16xf32>, vector<16x4xf32>, vector<8x4xf32> -> vector<8x4xf32>
    %c0_347 = arith.constant 0 : index
    %c737_348 = arith.constant 737 : index
    %439 = vector.load %arg4[%c0_347, %c737_348] : memref<128x768xf32, #tpu.memory_space<vmem>>, vector<8x4xf32>
    %cst_349 = arith.constant dense<0.000000e+00> : vector<8x4xf32>
    %440 = tpu.matmul %407, %439, %cst_349 {dimension_numbers = #tpu.dot_dimension_numbers<[1], [0], [0], [1], [0, 0, 1, 1], [], []>} : vector<8x8xf32>, vector<8x4xf32>, vector<8x4xf32> -> vector<8x4xf32>
    %c0_350 = arith.constant 0 : index
    %c741_351 = arith.constant 741 : index
    %441 = vector.load %arg4[%c0_350, %c741_351] : memref<128x768xf32, #tpu.memory_space<vmem>>, vector<8x4xf32>
    %cst_352 = arith.constant dense<0.000000e+00> : vector<8x4xf32>
    %442 = tpu.matmul %407, %441, %cst_352 {dimension_numbers = #tpu.dot_dimension_numbers<[1], [0], [0], [1], [0, 0, 1, 1], [], []>} : vector<8x8xf32>, vector<8x4xf32>, vector<8x4xf32> -> vector<8x4xf32>
    %443 = tpu.concatenate %440, %442 in 0 : vector<8x4xf32>, vector<8x4xf32> -> vector<16x4xf32>
    %c0_353 = arith.constant 0 : index
    %c885 = arith.constant 885 : index
    %444 = vector.load %arg3[%c0_353, %c885] : memref<8x1024xf32, #tpu.memory_space<vmem>>, vector<8x16xf32>
    %cst_354 = arith.constant dense<0.000000e+00> : vector<8x4xf32>
    %445 = tpu.matmul %444, %443, %cst_354 {dimension_numbers = #tpu.dot_dimension_numbers<[1], [0], [0], [1], [0, 0, 1, 1], [], []>} : vector<8x16xf32>, vector<16x4xf32>, vector<8x4xf32> -> vector<8x4xf32>
    %446 = arith.addf %438, %445 : vector<8x4xf32>
    %c0_355 = arith.constant 0 : index
    %c737_356 = arith.constant 737 : index
    %447 = vector.load %arg4[%c0_355, %c737_356] : memref<128x768xf32, #tpu.memory_space<vmem>>, vector<8x4xf32>
    %cst_357 = arith.constant dense<0.000000e+00> : vector<8x4xf32>
    %448 = tpu.matmul %419, %447, %cst_357 {dimension_numbers = #tpu.dot_dimension_numbers<[1], [0], [0], [1], [0, 0, 1, 1], [], []>} : vector<8x8xf32>, vector<8x4xf32>, vector<8x4xf32> -> vector<8x4xf32>
    %c0_358 = arith.constant 0 : index
    %c741_359 = arith.constant 741 : index
    %449 = vector.load %arg4[%c0_358, %c741_359] : memref<128x768xf32, #tpu.memory_space<vmem>>, vector<8x4xf32>
    %cst_360 = arith.constant dense<0.000000e+00> : vector<8x4xf32>
    %450 = tpu.matmul %419, %449, %cst_360 {dimension_numbers = #tpu.dot_dimension_numbers<[1], [0], [0], [1], [0, 0, 1, 1], [], []>} : vector<8x8xf32>, vector<8x4xf32>, vector<8x4xf32> -> vector<8x4xf32>
    %451 = tpu.concatenate %448, %450 in 0 : vector<8x4xf32>, vector<8x4xf32> -> vector<16x4xf32>
    %c0_361 = arith.constant 0 : index
    %c901 = arith.constant 901 : index
    %452 = vector.load %arg3[%c0_361, %c901] : memref<8x1024xf32, #tpu.memory_space<vmem>>, vector<8x16xf32>
    %cst_362 = arith.constant dense<0.000000e+00> : vector<8x4xf32>
    %453 = tpu.matmul %452, %451, %cst_362 {dimension_numbers = #tpu.dot_dimension_numbers<[1], [0], [0], [1], [0, 0, 1, 1], [], []>} : vector<8x16xf32>, vector<16x4xf32>, vector<8x4xf32> -> vector<8x4xf32>
    %454 = arith.addf %446, %453 : vector<8x4xf32>
    %c0_363 = arith.constant 0 : index
    %c737_364 = arith.constant 737 : index
    %455 = vector.load %arg4[%c0_363, %c737_364] : memref<128x768xf32, #tpu.memory_space<vmem>>, vector<8x4xf32>
    %cst_365 = arith.constant dense<0.000000e+00> : vector<8x4xf32>
    %456 = tpu.matmul %431, %455, %cst_365 {dimension_numbers = #tpu.dot_dimension_numbers<[1], [0], [0], [1], [0, 0, 1, 1], [], []>} : vector<8x8xf32>, vector<8x4xf32>, vector<8x4xf32> -> vector<8x4xf32>
    %c0_366 = arith.constant 0 : index
    %c741_367 = arith.constant 741 : index
    %457 = vector.load %arg4[%c0_366, %c741_367] : memref<128x768xf32, #tpu.memory_space<vmem>>, vector<8x4xf32>
    %cst_368 = arith.constant dense<0.000000e+00> : vector<8x4xf32>
    %458 = tpu.matmul %431, %457, %cst_368 {dimension_numbers = #tpu.dot_dimension_numbers<[1], [0], [0], [1], [0, 0, 1, 1], [], []>} : vector<8x8xf32>, vector<8x4xf32>, vector<8x4xf32> -> vector<8x4xf32>
    %459 = tpu.concatenate %456, %458 in 0 : vector<8x4xf32>, vector<8x4xf32> -> vector<16x4xf32>
    %c0_369 = arith.constant 0 : index
    %c917 = arith.constant 917 : index
    %460 = vector.load %arg3[%c0_369, %c917] : memref<8x1024xf32, #tpu.memory_space<vmem>>, vector<8x16xf32>
    %cst_370 = arith.constant dense<0.000000e+00> : vector<8x4xf32>
    %461 = tpu.matmul %460, %459, %cst_370 {dimension_numbers = #tpu.dot_dimension_numbers<[1], [0], [0], [1], [0, 0, 1, 1], [], []>} : vector<8x16xf32>, vector<16x4xf32>, vector<8x4xf32> -> vector<8x4xf32>
    %462 = arith.addf %454, %461 : vector<8x4xf32>
    %c0_371 = arith.constant 0 : index
    %c933 = arith.constant 933 : index
    %463 = vector.load %arg3[%c0_371, %c933] : memref<8x1024xf32, #tpu.memory_space<vmem>>, vector<8x1xf32>
    %464 = vector.broadcast %463 : vector<8x1xf32> to vector<8x4xf32>
    %465 = arith.addf %462, %464 : vector<8x4xf32>
    %c0_372 = arith.constant 0 : index
    %c0_373 = arith.constant 0 : index
    %c0_374 = arith.constant 0 : index
    %466 = vector.load %arg5[%c0_372, %c0_373, %c0_374] : memref<1x8x4xf32, #tpu.memory_space<vmem>>, vector<1x8x4xf32>
    %467 = vector.shape_cast %466 : vector<1x8x4xf32> to vector<8x4xf32>
    %468 = vector.shape_cast %465 : vector<8x4xf32> to vector<1x8x4xf32>
    tpu.vector_store %arg5[%c0_372, %c0_373, %c0_374], %468 {strides = array<i32>} : memref<1x8x4xf32, #tpu.memory_space<vmem>>, vector<1x8x4xf32>,
    return
  }
  func.func @transform_0(%arg0: i32) -> (i32, i32, i32) {
    %c0_i32 = arith.constant 0 : i32
    %c0_i32_0 = arith.constant 0 : i32
    %c0_i32_1 = arith.constant 0 : i32
    return %arg0, %c0_i32, %c0_i32_0 : i32, i32, i32
  }
  func.func @transform_1(%arg0: i32) -> (i32, i32) {
    %c0_i32 = arith.constant 0 : i32
    %c0_i32_0 = arith.constant 0 : i32
    %c0_i32_1 = arith.constant 0 : i32
    return %c0_i32, %c0_i32_0 : i32, i32
  }
  func.func @transform_2(%arg0: i32) -> (i32, i32) {
    %c0_i32 = arith.constant 0 : i32
    %c0_i32_0 = arith.constant 0 : i32
    %c0_i32_1 = arith.constant 0 : i32
    return %c0_i32, %c0_i32_0 : i32, i32
  }
  func.func @transform_3(%arg0: i32) -> (i32, i32) {
    %c0_i32 = arith.constant 0 : i32
    %c0_i32_0 = arith.constant 0 : i32
    %c0_i32_1 = arith.constant 0 : i32
    return %c0_i32, %c0_i32_0 : i32, i32
  }
  func.func @transform_4(%arg0: i32) -> (i32, i32, i32) {
    %c0_i32 = arith.constant 0 : i32
    %c0_i32_0 = arith.constant 0 : i32
    %c0_i32_1 = arith.constant 0 : i32
    return %arg0, %c0_i32, %c0_i32_0 : i32, i32, i32
  }
}

</mosaic_0001>

<bundles_post_ra>
// kernel: _fwd.1
= control target key start
LH: loop header
LB: loop body
LE: loop exit
PB: predicated region body
PF: predicated region fallthrough
CT: control target
= control target key end

     0   :  { %9 = vsyncpa [#allocation3], 0  ;;  %s14608_s0 = inlined_call_operand.hbm [shape: f32[2,1,200], index: 0, kind: input, shape index: {}]   ;;  %s14609_s1 = inlined_call_operand.hbm [shape: f32[200,128], index: 1, kind: input, shape index: {}]   ;;  %s14610_s2 = inlined_call_operand.hbm [shape: f32[8,1024], index: 2, kind: input, shape index: {}]   ;;  %s14611_s3 = inlined_call_operand.hbm [shape: f32[128,768], index: 3, kind: input, shape index: {}]   ;;  %s14612_s4 = inlined_call_operand.vmem [shape: f32[2,8,4], index: 4, kind: output, shape index: {}]  }
   0x1   :  { %11 = vsyncpa [#allocation3 + $0x1], 0 }
   0x2   :  { %12 = vsyncpa [#allocation5], 0 }
   0x3   :  { %13 = vsyncpa [#allocation8], 0  ;;  %s12949_s15 = smov 0   ;;  %s12951_s16 = smov 0  }
   0x4   :  { %s12953_s17 = smov 0   ;;  %s12955_s18 = smov 0  }
   0x5 LB: > { %s12968_s19 = sadd.s32 4294967295, %s12816_s18   ;;  %p39_p0 = scmp.ne.s32.totalorder %s12808_s16, %s12804_s15  ;;  %s12816_s18 = sphi %s12955_s18, %s14629_s18   ;;  %s12812_s17 = sphi %s12953_s17, %s14628_s17   ;;  %s12808_s16 = sphi %s12951_s16, %s14627_s16   ;;  %s12804_s15 = sphi %s12949_s15, %s14626_s15  }
   0x6   : > { %p14613_p1 = scmp.eq.s32.totalorder %s12968_s19, 0  ;;  %p10714_p2 = scmp.ge.s32.totalorder %s12816_s18, 1 }
   0x7   : > { %p139_p3 = scmp.lt.s32.totalorder %s12816_s18, 3  ;;  %s12818_s22 = smov [#allocation4]  }
   0x8   : > { %p12976_p4 = por %p14613_p1, %p39_p0  ;;  %s151_s23 = sshll.u32 %s12818_s22, 4  ;;  %s152_s23 = int_to_ptr.vmem [resolvable:$true] %s151_s23 }
   0x9   : > { %p12980_p5 = pnand %p10714_p2, %p139_p3  ;;  %s12819_s25 = smov [#allocation6]  }
   0xa   : > { %s14616_s20 = scalar_select %p12976_p4, 1, 0 }
   0xb   : > { %s14617_s21 = scalar_select %p12980_p5, 1, 0 }
   0xc   : > { %p12467_p6 = pneg %p12980_p5  ;;  %s165_s26 = sshll.u32 %s12819_s25, 4  ;;  %s166_s26 = int_to_ptr.vmem [resolvable:$true] %s165_s26 }
   0xd   : > { %s12820_s27 = smov [#allocation7]   ;;  %s12679_s29 = scalar_lea.vmem %s152_s23, 3200 }
   0xe   : > { %p12988_p7 = pnand %p12467_p6, %p14613_p1  ;;  %s175_s28 = sshll.u32 %s12820_s27, 4  ;;  %s176_s28 = int_to_ptr.vmem [resolvable:$true] %s175_s28 }
   0xf   : > { %p12680_p9 = scmp.ne.s32.totalorder %s152_s23, %s12679_s29  ;;  %p12687_p12 = scmp.lt.s32.totalorder %s152_s23, %s152_s23 }
  0x10   : > { %p12670_p8 = pneg %p12988_p7  ;;  %p12688_p13 = scmp.lt.s32.totalorder %s12679_s29, %s12679_s29 }
  0x12   : > { %p12682_p10 = pnand %p12680_p9, %p12670_p8  ;;  %p12689_p0 = por %p12688_p13, %p12687_p12 }
  0x14   : > { %p12683_p11 = pneg %p12682_p10 }
  0x16   : > { %p12690_p2 = pnand %p12689_p0, %p12683_p11 }
  0x18   : > { %12693 = shalt.err (!%p12690_p2)
}
  0x19   : > { %s12821_s30 = smov 128   ;;  %s12822_s5 = smov 8  }
  0x1a   : > { %12470 = dma.hbm_to_vmem [thread:$0]  (!%p12988_p7), %s14609_s1, 3200, %s152_s23, [#allocation5], %s12821_s30, %s12821_s30, %s12822_s5  }
  0x1b   : > { %s12705_s8 = scalar_lea.vmem %s166_s26, 1024  ;;  %p12713_p10 = scmp.lt.s32.totalorder %s166_s26, %s166_s26 }
  0x1c   : > { %p12706_p3 = scmp.ne.s32.totalorder %s166_s26, %s12705_s8  ;;  %p12714_p1 = scmp.lt.s32.totalorder %s12705_s8, %s12705_s8 }
  0x1e   : > { %p12708_p6 = pnand %p12706_p3, %p12670_p8  ;;  %p12715_p12 = por %p12714_p1, %p12713_p10 }
  0x20   : > { %p12709_p9 = pneg %p12708_p6 }
  0x22   : > { %p12716_p11 = pnand %p12715_p12, %p12709_p9 }
  0x24   : > { %12719 = shalt.err (!%p12716_p11)
}
  0x25   : > { %12473 = dma.hbm_to_vmem [thread:$0]  (!%p12988_p7), %s14610_s2, 1024, %s166_s26, [#allocation5]  }
  0x26   : > { %s12731_s11 = scalar_lea.vmem %s176_s28, 12288  ;;  %p12739_p3 = scmp.lt.s32.totalorder %s176_s28, %s176_s28 }
  0x27   : > { %p12732_p13 = scmp.ne.s32.totalorder %s176_s28, %s12731_s11  ;;  %p12740_p6 = scmp.lt.s32.totalorder %s12731_s11, %s12731_s11 }
  0x29   : > { %p12734_p0 = pnand %p12732_p13, %p12670_p8  ;;  %p12741_p4 = por %p12740_p6, %p12739_p3 }
  0x2b   : > { %p12735_p2 = pneg %p12734_p0 }
  0x2d   : > { %p12742_p1 = pnand %p12741_p4, %p12735_p2 }
  0x2f   : > { %12745 = shalt.err (!%p12742_p1)
}
  0x30   : > { %s12823_s12 = smov 768   ;;  %s12824_s13 = smov 48  }
  0x31   : > { %12476 = dma.hbm_to_vmem [thread:$0]  (!%p12988_p7), %s14611_s3, 12288, %s176_s28, [#allocation8], %s12823_s12, %s12823_s12, %s12824_s13  }
  0x32   : > { %s13019_s22 = sadd.s32 1, %s12816_s18   ;;  %s26_s25 = sadd.s32 1, %s12812_s17 }
  0x33   : > { %s23_s23 = ssub.s32 %s12816_s18, %s13019_s22  ;;  %p33_p8 = scmp.ne.s32.totalorder %s12812_s17, %s12808_s16 }
  0x34   : > { %p24_p4 = scmp.eq.s32.totalorder %s23_s23, 0  ;;  %p34_p9 = scmp.eq.s32.totalorder %s12816_s18, 0 }
  0x35   : > { %p12484_p10 = scmp.lt.s32.totalorder %s12816_s18, 2  ;;  %s189_s27 = sand.u32 1, %s12812_s17  }
  0x36   : > { %s13029_s26 = scalar_select %p24_p4, %s12812_s17, %s26_s25  }
  0x37   : > { %p35_p12 = por %p34_p9, %p33_p8  ;;  %s10719_s29 = sshll.u32 %s189_s27, 1 }
  0x38   : > { %s10902_s30 = sshll.u32 %s12816_s18, 5  ;;  %s193_s28 = scalar_lea.vmem [#allocation2], %s10719_s29 }
  0x39   : > { %s13036_s6 = scalar_lea.hbm %s14608_s0, %s10902_s30  ;;  %s201_s7 = sshll.u32 %s193_s28, 4  ;;  %s202_s7 = int_to_ptr.vmem [resolvable:$true] %s201_s7 }
  0x3a   : > { %p13038_p7 = pnand %p12484_p10, %p35_p12  ;;  %s190_s9 = scalar_lea.sflag [#allocation3], %s189_s27 }
  0x3b   : > { %s12746_s10 = scalar_lea.hbm %s13036_s6, 32  ;;  %s12751_s12 = scalar_lea.hbm %s14608_s0, 64 }
  0x3c   : > { %p12747_p11 = scmp.ne.s32.totalorder %s13036_s6, %s12746_s10  ;;  %p12748_p13 = pneg %p13038_p7 }
  0x3d   : > { %p12752_p3 = scmp.lt.s32.totalorder %s13036_s6, %s14608_s0  ;;  %p12753_p6 = scmp.lt.s32.totalorder %s12751_s12, %s12746_s10 }
  0x3e   : > { %p12749_p0 = pnand %p12748_p13, %p12747_p11 }
  0x3f   : > { %p12754_p1 = por %p12753_p6, %p12752_p3 }
  0x40   : > { %p12750_p2 = pneg %p12749_p0 }
  0x42   : > { %p12755_p4 = pnand %p12754_p1, %p12750_p2 }
  0x44   : > { %12758 = shalt.err (!%p12755_p4)
}
  0x45   : > { %s12759_s15 = scalar_lea.vmem %s202_s7, 32  ;;  %s12825_s23 = smov [#allocation2]  }
  0x46   : > { %p12760_p8 = scmp.ne.s32.totalorder %s202_s7, %s12759_s15  ;;  %s12764_s25 = sshll.u32 %s12825_s23, 4  ;;  %s12765_s25 = int_to_ptr.vmem [resolvable:$false] %s12764_s25 }
  0x47   : > { %s12766_s27 = scalar_lea.vmem %s12765_s25, 64  ;;  %p12767_p12 = scmp.lt.s32.totalorder %s202_s7, %s12765_s25 }
  0x48   : > { %p12762_p9 = pnand %p12760_p8, %p12748_p13  ;;  %p12768_p11 = scmp.lt.s32.totalorder %s12766_s27, %s12759_s15 }
  0x4a   : > { %p12763_p10 = pneg %p12762_p9  ;;  %p12769_p0 = por %p12768_p11, %p12767_p12 }
  0x4c   : > { %p12770_p5 = pnand %p12769_p0, %p12763_p10 }
  0x4e   : > { %12773 = shalt.err (!%p12770_p5)
}
  0x4f   : > { %12480 = dma.hbm_to_vmem [thread:$0]  (!%p13038_p7), %s13036_s6, 32, %s202_s7, %s190_s9  }
  0x50   : > { %p14620_p2 = scmp.ne.s32.totalorder %s14617_s21, 0 }
  0x51   : > { %s212_s29 = sand.u32 (!%p14620_p2), 1, %s12808_s16   ;;  %p14621_p13 = scmp.ne.s32.totalorder (!%p14620_p2), %s14616_s20, 0 }
  0x52   : > { %210 = sbr.rel (%p14620_p2) target bundleno = 12603 (0x313b), region = 36  ;;  %s13059_s30 = sshll.u32 (!%p14620_p2), %s212_s29, 1 }
  0x53   : > { %s213_s24 = scalar_lea.sflag (!%p14620_p2), [#allocation3], %s212_s29  ;;  %s216_s5 = scalar_lea.vmem (!%p14620_p2), [#allocation2], %s13059_s30 }
  0x57   : > { %12791 = dma.done.wait (%p14621_p13), %s213_s24, 32  }
  0x58   : > { %12793 = vsyncadd (%p14621_p13), %s213_s24, 4294967264  ;;  %p14622_p5 = scmp.eq.s32.totalorder %s12968_s19, 0 }
  0x5a   : > { %12795 = dma.done.wait (%p14622_p5), [#allocation5], 4224   ;;  %p14623_p7 = pmov %p14622_p5 }
  0x5b   : > { %p14624_p3 = pmov %p14622_p5 }
  0x5c   : > { %12797 = vsyncadd (%p14623_p7), [#allocation5], 4294963072 }
  0x5d   : > { %12799 = dma.done.wait (%p14624_p3), [#allocation8], 12288   ;;  %p14625_p6 = pmov %p14624_p3 }
  0x5e   : > { %v12826_v0 = vmov 0.0   ;;  %v284_v1 = vlaneseq  ;;  %v272_v2 = vld [vmem:[#allocation4 + $0x78] sm:$0xff]  ;;  %v271_v3 = vld [vmem:[#allocation4 + $0x70] sm:$0xff]  ;;  %v270_v5 = vld [vmem:[#allocation4 + $0x68] sm:$0xff]  ;;  %vm293_vm0 = vcmask 588800   ;;  %s12827_s20 = smov 64  }
  0x5f   : > { %12801 = vsyncadd (%p14625_p6), [#allocation8], 4294955008  ;;  %296 = vmatprep.subr.mxu0 %v12826_v0  ;;  %11376 = vmatprep.subr.mxu1 %v12826_v0  ;;  %v269_v6 = vld [vmem:[#allocation4 + $0x60] sm:$0xff]  ;;  %v268_v8 = vld [vmem:[#allocation4 + $0x58] sm:$0xff]  ;;  %vm12828_vm1 = vmmov 0   ;;  %s12830_s21 = smov 124  }
  0x60   : > { %297 = vmatpush1.msra.mxu0 %v272_v2  ;;  %v13076_v4 = vshrl.u32 %v284_v1, 7  ;;  %v267_v9 = vld [vmem:[#allocation4 + $0x50] sm:$0xff]  ;;  %v13083_v10 = vld [vmem:[%s216_s5] sm:$0x3]  ;;  %v266_v14 = vld [vmem:[#allocation4 + $0x48] sm:$0xff]  ;;  %11408 = vmatprep.mubr.msk.f32.mxu1 %vm12828_vm1, %v12826_v0  ;;  %vm678_vm2 = vcmask 1040384  }
  0x61   : > { %298 = vmatprep.subr.mxu0 %v12826_v0  ;;  %v381_v11 = vld [vmem:[#allocation7 + $0x2d0] sm:$0xff]  ;;  %v380_v15 = vld [vmem:[#allocation7 + $0x2a0] sm:$0xff]  ;;  %v265_v17 = vld [vmem:[#allocation4 + $0x40] sm:$0xff]  ;;  %vm680_vm3 = vcmask 1041408   ;;  %vm691_vm4 = vcmask 1042432   ;;  %vm688_vm5 = vcmask 23552  }
  0x62   : > { %299 = vmatpush1.msra.mxu0 %v271_v3  ;;  %v290_v7 = vsub.s32 1, %v13076_v4  ;;  %498 = vrot.lane.b32.xlu0 %v381_v11, %s12827_s20  ;;  %v379_v13 = vld [vmem:[#allocation7 + $0x270] sm:$0xff]  ;;  %v378_v16 = vld [vmem:[#allocation7 + $0x240] sm:$0xff]  ;;  %v263_v21 = vld [vmem:[#allocation4 + $0x30] sm:$0xff]  ;;  %v286_v45 = vsub.s32 0, %v13076_v4  ;;  %s12832_s6 = smov 32  }
  0x63   : > { %300 = vmatprep.subr.mxu0 %v12826_v0  ;;  %494 = vrot.lane.b32.xlu1 %v379_v13, %s12827_s20  ;;  %v264_v18 = vld [vmem:[#allocation4 + $0x38] sm:$0xff]  ;;  %v376_v20 = vld [vmem:[#allocation7 + $0x1e0] sm:$0xff]  ;;  %v261_v25 = vld [vmem:[#allocation4 + $0x20] sm:$0xff]  ;;  %vm772_vm6 = vcmask 64512   ;;  %s12833_s28 = smov 115   ;;  %vm887_vm7 = vcmask 523264  }
  0x64   : > { %301 = vmatpush1.msra.mxu0 %v270_v5  ;;  %v291_v12 = vrot.slane %v13083_v10, %v290_v7  ;;  %11377 = vmatpush3.msra.mxu1 %v381_v11  ;;  %v377_v19 = vld [vmem:[#allocation7 + $0x210] sm:$0xff]  ;;  %v262_v22 = vld [vmem:[#allocation4 + $0x28] sm:$0xff]  ;;  %v259_v29 = vld [vmem:[#allocation4 + $0x10] sm:$0xff]  ;;  %v287_v48 = vrot.slane %v13083_v10, %v286_v45  ;;  %s12835_s7 = smov 98   ;;  %vm1061_vm8 = vcmask 130048   ;;  %s12837_s8 = smov 96  }
  0x65   : > { %302 = vmatprep.subr.mxu0 %v12826_v0  ;;  %11378 = vmatprep.subr.mxu1 %v12826_v0  ;;  %v375_v23 = vld [vmem:[#allocation7 + $0x1b0] sm:$0xff]  ;;  %v374_v24 = vld [vmem:[#allocation7 + $0x180] sm:$0xff]  ;;  %v257_v33 = vld [vmem:[#allocation4] sm:$0xff]  ;;  %s12838_s9 = smov 89   ;;  %vm1219_vm9 = vcmask 261120   ;;  %vm1467_vm10 = vcmask 195584  }
  0x66   : > { %303 = vmatpush1.msra.mxu0 %v269_v6  ;;  %10728 = vmatprep.mubr.msk.f32.mxu0 %vm293_vm0, %v291_v12  ;;  %v260_v26 = vld [vmem:[#allocation4 + $0x18] sm:$0xff]  ;;  %v372_v28 = vld [vmem:[#allocation7 + $0x120] sm:$0xff]  ;;  %v281_v34 = vld [vmem:[#allocation4 + $0xc0] sm:$0xff]  ;;  %s12841_s10 = smov 39   ;;  %s12843_s18 = smov 14   ;;  %vm2350_vm11 = vcmask 113664  }
  0x67   : > { %304 = vmatprep.subr.mxu0 %v12826_v0  ;;  %496 = vrot.lane.b32.xlu0 %v380_v15, %s12827_s20  ;;  %v373_v27 = vld [vmem:[#allocation7 + $0x150] sm:$0xff]  ;;  %v258_v30 = vld [vmem:[#allocation4 + $0x8] sm:$0xff]  ;;  %v279_v38 = vld [vmem:[#allocation4 + $0xb0] sm:$0xff]  ;;  %s12844_s11 = smov 2   ;;  %s12845_s12 = smov 17   ;;  %vm2621_vm12 = vcmask 15360  }
  0x68   : > { %305 = vmatpush1.msra.mxu0 %v268_v8  ;;  %492 = vrot.lane.b32.xlu1 %v378_v16, %s12827_s20  ;;  %v371_v31 = vld [vmem:[#allocation7 + $0xf0] sm:$0xff]  ;;  %v370_v32 = vld [vmem:[#allocation7 + $0xc0] sm:$0xff]  ;;  %v277_v42 = vld [vmem:[#allocation4 + $0xa0] sm:$0xff]  ;;  %s12847_s13 = smov 108   ;;  %s12849_s14 = smov 88   ;;  %vm2792_vm13 = vcmask 1046528  }
  0x69   : > { %306 = vmatprep.subr.mxu0 %v12826_v0  ;;  %11379 = vmatpush3.msra.mxu1 %v380_v15  ;;  %v369_v35 = vld [vmem:[#allocation7 + $0x90] sm:$0xff]  ;;  %v368_v36 = vld [vmem:[#allocation7 + $0x60] sm:$0xff]  ;;  %v275_v44 = vld [vmem:[#allocation4 + $0x90] sm:$0xff]  ;;  %s12850_s15 = smov 67   ;;  %s12851_s23 = smov 85   ;;  %vm2788_vm14 = vcmask 121856  }
  0x6a   : > { %307 = vmatpush1.msra.mxu0 %v267_v9  ;;  %11380 = vmatprep.subr.mxu1 %v12826_v0  ;;  %v280_v37 = vld [vmem:[#allocation4 + $0xb8] sm:$0xff]  ;;  %v366_v40 = vld [vmem:[#allocation7] sm:$0xff]  ;;  %v273_v47 = vld [vmem:[#allocation4 + $0x80] sm:$0xff]  ;;  %s12852_s25 = smov 79   ;;  %s12853_s27 = smov 42   ;;  %vm3102_vm15 = vcmask 56320  }
  0x6b   : > { %308 = vmatprep.subr.mxu0 %v12826_v0  ;;  %490 = vrot.lane.b32.xlu0 %v377_v19, %s12827_s20  ;;  %v367_v39 = vld [vmem:[#allocation7 + $0x30] sm:$0xff]  ;;  %v278_v41 = vld [vmem:[#allocation4 + $0xa8] sm:$0xff]  ;;  %v601_v49 = vld [vmem:[#allocation7 + $0x2d8] sm:$0xff]  ;;  %s12855_s29 = smov 117   ;;  %s12856_s30 = smov 76   ;;  %vm3935_vm0 = vcmask 138240  }
  0x6c   : > { %309 = vmatpush1.msra.mxu0 %v266_v14  ;;  %488 = vrot.lane.b32.xlu1 %v376_v20, %s12827_s20  ;;  %v276_v43 = vld [vmem:[#allocation4 + $0x98] sm:$0xff]  ;;  %v274_v46 = vld [vmem:[#allocation4 + $0x88] sm:$0xff]  ;;  %v600_v50 = vld [vmem:[#allocation7 + $0x2a8] sm:$0xff]  ;;  %s12857_s24 = smov 62   ;;  %s12858_s5 = smov 120  }
  0x6d   : > { %310 = vmatprep.subr.mxu0 %v12826_v0  ;;  %11381 = vmatpush3.msra.mxu1 %v379_v13  ;;  %v599_v51 = vld [vmem:[#allocation7 + $0x278] sm:$0xff]  ;;  %v598_v52 = vld [vmem:[#allocation7 + $0x248] sm:$0xff]  ;;  %v282_v6 = vld [vmem:[#allocation6] ss:$0 sm:$0xff]  ;;  %p252_p1 = scmp.lt.s32.totalorder %s12968_s19, 1 }
  0x6e   : > { %311 = vmatpush1.msra.mxu0 %v265_v17  ;;  %11382 = vmatprep.subr.mxu1 %v12826_v0  ;;  %v597_v53 = vld [vmem:[#allocation7 + $0x218] sm:$0xff]  ;;  %v596_v54 = vld [vmem:[#allocation7 + $0x1e8] sm:$0xff] }
  0x6f   : > { %312 = vmatprep.subr.mxu0 %v12826_v0  ;;  %486 = vrot.lane.b32.xlu0 %v375_v23, %s12827_s20  ;;  %v595_v55 = vld [vmem:[#allocation7 + $0x1b8] sm:$0xff]  ;;  %v594_v56 = vld [vmem:[#allocation7 + $0x188] sm:$0xff]  ;;  %s14631_s19 = smov (!%p252_p1, %s12968_s19), 1 }
  0x70   : > { %313 = vmatpush1.msra.mxu0 %v264_v18  ;;  %484 = vrot.lane.b32.xlu1 %v374_v24, %s12827_s20  ;;  %v13148_v57 = vld [vmem:[#allocation7 + $0x158] sm:$0xff]  ;;  %v13151_v58 = vld [vmem:[#allocation7 + $0x128] sm:$0xff] }
  0x71   : > { %314 = vmatprep.subr.mxu0 %v12826_v0  ;;  %11383 = vmatpush3.msra.mxu1 %v378_v16  ;;  %v13155_v59 = vld [vmem:[#allocation7 + $0xf8] sm:$0xff]  ;;  %v13159_v60 = vld [vmem:[#allocation7 + $0xc8] sm:$0xff] }
  0x72   : > { %315 = vmatpush1.msra.mxu0 %v263_v21  ;;  %11384 = vmatprep.subr.mxu1 %v12826_v0  ;;  %v13163_v61 = vld [vmem:[#allocation7 + $0x98] sm:$0xff]  ;;  %v13167_v62 = vld [vmem:[#allocation7 + $0x68] sm:$0xff] }
  0x73   : > { %316 = vmatprep.subr.mxu0 %v12826_v0  ;;  %482 = vrot.lane.b32.xlu0 %v373_v27, %s12827_s20  ;;  %v13173_v63 = vld [vmem:[#allocation7 + $0x38] sm:$0xff]  ;;  %v13177_v1 = vld [vmem:[#allocation7 + $0x8] sm:$0xff] }
  0x74   : > { %317 = vmatpush1.msra.mxu0 %v262_v22  ;;  %480 = vrot.lane.b32.xlu1 %v372_v28, %s12827_s20  ;;  %v13207_v22 = vld [vmem:[#allocation6 + $0x8] sm:$0xff] }
  0x75   : > { %318 = vmatprep.subr.mxu0 %v12826_v0  ;;  %11385 = vmatpush3.msra.mxu1 %v377_v19 }
  0x76   : > { %319 = vmatpush1.msra.mxu0 %v261_v25  ;;  %11386 = vmatprep.subr.mxu1 %v12826_v0 }
  0x77   : > { %320 = vmatprep.subr.mxu0 %v12826_v0  ;;  %478 = vrot.lane.b32.xlu0 %v371_v31, %s12827_s20 }
  0x78   : > { %321 = vmatpush1.msra.mxu0 %v260_v26  ;;  %476 = vrot.lane.b32.xlu1 %v370_v32, %s12827_s20 }
  0x79   : > { %322 = vmatprep.subr.mxu0 %v12826_v0  ;;  %11387 = vmatpush3.msra.mxu1 %v376_v20 }
  0x7a   : > { %323 = vmatpush1.msra.mxu0 %v259_v29  ;;  %11388 = vmatprep.subr.mxu1 %v12826_v0 }
  0x7b   : > { %324 = vmatprep.subr.mxu0 %v12826_v0  ;;  %474 = vrot.lane.b32.xlu0 %v369_v35, %s12827_s20 }
  0x7c   : > { %325 = vmatpush1.msra.mxu0 %v258_v30  ;;  %472 = vrot.lane.b32.xlu1 %v368_v36, %s12827_s20 }
  0x7d   : > { %326 = vmatprep.subr.mxu0 %v12826_v0  ;;  %11389 = vmatpush3.msra.mxu1 %v375_v23  ;;  %v12829_v23 = vmov 3  }
  0x7e   : > { %327 = vmatpush1.msra.mxu0 %v257_v33  ;;  %11390 = vmatprep.subr.mxu1 %v12826_v0 }
  0x7f   : > { %342 = vmatprep.subr.mxu0 %v12826_v0  ;;  %470 = vrot.lane.b32.xlu0 %v367_v39, %s12827_s20 }
  0x80   : > { %343 = vmatpush2.msra.mxu0 %v281_v34  ;;  %468 = vrot.lane.b32.xlu1 %v366_v40, %s12827_s20  ;;  %v12831_v34 = vmov 12  }
  0x81   : > { %344 = vmatprep.subr.mxu0 %v12826_v0  ;;  %11391 = vmatpush3.msra.mxu1 %v374_v24 }
  0x82   : > { %345 = vmatpush2.msra.mxu0 %v280_v37  ;;  %11392 = vmatprep.subr.mxu1 %v12826_v0 }
  0x83   : > { %346 = vmatprep.subr.mxu0 %v12826_v0  ;;  %11393 = vmatpush3.msra.mxu1 %v373_v27 }
  0x84   : > { %347 = vmatpush2.msra.mxu0 %v279_v38  ;;  %11394 = vmatprep.subr.mxu1 %v12826_v0 }
  0x85   : > { %348 = vmatprep.subr.mxu0 %v12826_v0  ;;  %11395 = vmatpush3.msra.mxu1 %v372_v28 }
  0x86   : > { %349 = vmatpush2.msra.mxu0 %v278_v41  ;;  %11396 = vmatprep.subr.mxu1 %v12826_v0 }
  0x87   : > { %350 = vmatprep.subr.mxu0 %v12826_v0  ;;  %11397 = vmatpush3.msra.mxu1 %v371_v31 }
  0x88   : > { %351 = vmatpush2.msra.mxu0 %v277_v42  ;;  %11398 = vmatprep.subr.mxu1 %v12826_v0 }
  0x89   : > { %352 = vmatprep.subr.mxu0 %v12826_v0  ;;  %11399 = vmatpush3.msra.mxu1 %v370_v32 }
  0x8a   : > { %353 = vmatpush2.msra.mxu0 %v276_v43  ;;  %11400 = vmatprep.subr.mxu1 %v12826_v0 }
  0x8b   : > { %354 = vmatprep.subr.mxu0 %v12826_v0  ;;  %11401 = vmatpush3.msra.mxu1 %v369_v35 }
  0x8c   : > { %355 = vmatpush2.msra.mxu0 %v275_v44  ;;  %11402 = vmatprep.subr.mxu1 %v12826_v0 }
  0x8d   : > { %356 = vmatprep.subr.mxu0 %v12826_v0  ;;  %11403 = vmatpush3.msra.mxu1 %v368_v36 }
  0x8e   : > { %357 = vmatpush2.msra.mxu0 %v274_v46  ;;  %11404 = vmatprep.subr.mxu1 %v12826_v0 }
  0x8f   : > { %358 = vmatprep.subr.mxu0 %v12826_v0  ;;  %11405 = vmatpush3.msra.mxu1 %v367_v39 }
  0x90   : > { %359 = vmatpush2.msra.mxu0 %v273_v47  ;;  %11406 = vmatprep.subr.mxu1 %v12826_v0 }
  0x91   : > { %361 = vmatmul.mubr.f32.vlgmr.msra.gmra.mxu0 %v287_v48  ;;  %11446 = vmatprep.subr.mxu0 %v12826_v0 }
  0x92   : > { %11447 = vmatpush3.msra.mxu0 %v601_v49  ;;  %11407 = vmatpush3.msra.mxu1 %v366_v40 }
  0x93   : > { %11448 = vmatprep.subr.mxu0 %v12826_v0  ;;  %11411 = vmatprep.subr.mxu1 %v12826_v0 }
  0x94   : > { %11449 = vmatpush3.msra.mxu0 %v600_v50  ;;  %11478 = vmatprep.mubr.msk.f32.mxu0 %vm12828_vm1, %v12826_v0 }
  0x95   : > { %11450 = vmatprep.subr.mxu0 %v12826_v0  ;;  %12625 = vset.pattern.permute.xlu0 %v12829_v23 }
  0x96   : > { %11451 = vmatpush3.msra.mxu0 %v599_v51  ;;  %770 = vrot.lane.b32.xlu1 %v13207_v22, %s12830_s21  ;;  %s12859_s21 = smov 55  }
  0x97   : > { %11452 = vmatprep.subr.mxu0 %v12826_v0  ;;  %685 = vperm.xlu0 %12625, %v13207_v22  }
  0x98   : > { %11453 = vmatpush3.msra.mxu0 %v598_v52  ;;  %12626 = vset.pattern.permute.xlu1 %v12831_v34 }
  0x99   : > { %11454 = vmatprep.subr.mxu0 %v12826_v0 }
  0x9a   : > { %11455 = vmatpush3.msra.mxu0 %v597_v53  ;;  %767 = vperm.xlu1 %12626, %v13207_v22  }
  0x9b   : > { %11456 = vmatprep.subr.mxu0 %v12826_v0  ;;  %975 = vrot.lane.b32.xlu0 %v13148_v57, %s12832_s6 }
  0x9c   : > { %11457 = vmatpush3.msra.mxu0 %v596_v54 }
  0x9d   : > { %11458 = vmatprep.subr.mxu0 %v12826_v0 }
  0x9e   : > { %11459 = vmatpush3.msra.mxu0 %v595_v55  ;;  %877 = vrot.lane.b32.xlu1 %v13148_v57, %s12827_s20 }
  0x9f   : > { %11460 = vmatprep.subr.mxu0 %v12826_v0  ;;  %973 = vrot.lane.b32.xlu0 %v13151_v58, %s12832_s6 }
  0xa0   : > { %11461 = vmatpush3.msra.mxu0 %v594_v56 }
  0xa1   : > { %11462 = vmatprep.subr.mxu0 %v12826_v0 }
  0xa2   : > { %11463 = vmatpush3.msra.mxu0 %v13148_v57  ;;  %875 = vrot.lane.b32.xlu1 %v13151_v58, %s12827_s20 }
  0xa3   : > { %11464 = vmatprep.subr.mxu0 %v12826_v0  ;;  %971 = vrot.lane.b32.xlu0 %v13155_v59, %s12832_s6 }
  0xa4   : > { %11465 = vmatpush3.msra.mxu0 %v13151_v58 }
  0xa5   : > { %11466 = vmatprep.subr.mxu0 %v12826_v0 }
  0xa6   : > { %11467 = vmatpush3.msra.mxu0 %v13155_v59  ;;  %873 = vrot.lane.b32.xlu1 %v13155_v59, %s12827_s20 }
  0xa7   : > { %11468 = vmatprep.subr.mxu0 %v12826_v0  ;;  %969 = vrot.lane.b32.xlu0 %v13159_v60, %s12832_s6 }
  0xa8   : > { %11469 = vmatpush3.msra.mxu0 %v13159_v60 }
  0xa9   : > { %11470 = vmatprep.subr.mxu0 %v12826_v0 }
  0xaa   : > { %11471 = vmatpush3.msra.mxu0 %v13163_v61  ;;  %871 = vrot.lane.b32.xlu1 %v13159_v60, %s12827_s20 }
  0xab   : > { %11472 = vmatprep.subr.mxu0 %v12826_v0  ;;  %967 = vrot.lane.b32.xlu0 %v13163_v61, %s12832_s6 }
  0xac   : > { %11473 = vmatpush3.msra.mxu0 %v13167_v62 }
  0xad   : > { %11474 = vmatprep.subr.mxu0 %v12826_v0 }
  0xae   : > { %11475 = vmatpush3.msra.mxu0 %v13173_v63  ;;  %869 = vrot.lane.b32.xlu1 %v13163_v61, %s12827_s20 }
  0xaf   : > { %11476 = vmatprep.subr.mxu0 %v12826_v0  ;;  %965 = vrot.lane.b32.xlu0 %v13167_v62, %s12832_s6 }
  0xb0   : > { %11477 = vmatpush3.msra.mxu0 %v13177_v1 }
  0xb1   : > { %11510 = vmatprep.subr.mxu0 %v12826_v0 }
  0xb2   : > { %867 = vrot.lane.b32.xlu1 %v13167_v62, %s12827_s20 }
  0xb3   : > { %963 = vrot.lane.b32.xlu0 %v13173_v63, %s12832_s6 }
  0xb6   : > { %865 = vrot.lane.b32.xlu1 %v13173_v63, %s12827_s20  ;;  %v12834_v63 = vmov 29  }
  0xb7   : > { %961 = vrot.lane.b32.xlu0 %v13177_v1, %s12832_s6  ;;  %12627 = vset.pattern.permute.xlu1 %v12834_v63  ;;  %v13497_v63 = vld [vmem:[#allocation7 + $0x18] sm:$0xff] }
  0xba   : > { %863 = vrot.lane.b32.xlu1 %v13177_v1, %s12827_s20 }
  0xbb   : > { %1059 = vrot.lane.b32.xlu0 %v13207_v22, %s12833_s28 }
  0xbe   : > { %1056 = vperm.xlu1 %12627, %v13207_v22  }
  0xbf   : > { %1139 = vrot.lane.b32.xlu0 %v13207_v22, %s12835_s7 }
  0xd4   : > { %v499_v2 = vpop.permute.xlu0 %498 }
  0xd5   : > { %v495_v3 = vpop.permute.xlu1 %494 }
  0xd9   : > { %v497_v4 = vpop.permute.xlu0 %496 }
  0xda   : > { %v493_v5 = vpop.permute.xlu1 %492 }
  0xdd   : > { %v491_v7 = vpop.permute.xlu0 %490 }
  0xde   : > { %v489_v10 = vpop.permute.xlu1 %488 }
  0xe1   : > { %v487_v12 = vpop.permute.xlu0 %486 }
  0xe2   : > { %v485_v13 = vpop.permute.xlu1 %484 }
  0xe5   : > { %v483_v14 = vpop.permute.xlu0 %482 }
  0xe6   : > { %v481_v15 = vpop.permute.xlu1 %480 }
  0xe9   : > { %v479_v16 = vpop.permute.xlu0 %478 }
  0xea   : > { %v477_v17 = vpop.permute.xlu1 %476 }
  0xed   : > { %v475_v18 = vpop.permute.xlu0 %474 }
  0xee   : > { %v473_v19 = vpop.permute.xlu1 %472 }
  0xf1   : > { %v471_v20 = vpop.permute.xlu0 %470 }
  0xf2   : > { %v469_v21 = vpop.permute.xlu1 %468 }
 0x108   : > { %v771_v38 = vpop.permute.xlu1 %770 }
 0x112   : > { %v686_v35 = vpop.permute.xlu0 %685 }
 0x115   : > { %v768_v44 = vpop.permute.xlu1 %767 }
 0x116   : > { %v976_v36 = vpop.permute.xlu0 %975 }
 0x119   : > { %v878_v45 = vpop.permute.xlu1 %877 }
 0x11a   : > { %v974_v37 = vpop.permute.xlu0 %973 }
 0x11d   : > { %v876_v46 = vpop.permute.xlu1 %875 }
 0x11e   : > { %v972_v41 = vpop.permute.xlu0 %971 }
 0x121   : > { %v874_v47 = vpop.permute.xlu1 %873 }
 0x122   : > { %v970_v48 = vpop.permute.xlu0 %969 }
 0x125   : > { %v872_v49 = vpop.permute.xlu1 %871 }
 0x126   : > { %v968_v50 = vpop.permute.xlu0 %967 }
 0x129   : > { %v870_v51 = vpop.permute.xlu1 %869 }
 0x12a   : > { %v966_v52 = vpop.permute.xlu0 %965 }
 0x12d   : > { %v868_v53 = vpop.permute.xlu1 %867 }
 0x12e   : > { %v964_v54 = vpop.permute.xlu0 %963 }
 0x131   : > { %v866_v55 = vpop.permute.xlu1 %865 }
 0x132   : > { %v962_v56 = vpop.permute.xlu0 %961 }
 0x135   : > { %v864_v57 = vpop.permute.xlu1 %863 }
 0x151   : > { %v362_v8 = vpop.f32.mrf.mxu0 }
 0x152   : > { %v363_v9 = vadd.f32 %v362_v8, %v282_v6  ;;  %v13291_v6 = vld [vmem:[#allocation7 + $0xa0] sm:$0xff]  ;;  %v13297_v8 = vld [vmem:[#allocation7 + $0x70] sm:$0xff] }
 0x153   : > { %v364_v11 = vpop.f32.mrf.mxu0  ;;  %1385 = vrot.lane.b32.xlu0 %v13291_v6, %s12827_s20 }
 0x154   : > { %11409 = vmatmul.mubr.f32.vlgmr.msra.gmra.mxu1 %v363_v9  ;;  %11479 = vmatmul.mubr.f32.vlgmr.msra.gmra.mxu0 %v363_v9  ;;  %v1057_v11 = vpop.permute.xlu1 %1056 }
 0x155   : > { %11412 = vmatpush3.msra.mxu1 %v499_v2  ;;  %11443 = vmatprep.mubr.msk.f32.mxu1 %vm12828_vm1, %v12826_v0 }
 0x156   : > { %11413 = vmatprep.subr.mxu1 %v12826_v0  ;;  %11526 = vmatprep.mubr.msk.f32.mxu0 %vm12828_vm1, %v12826_v0 }
 0x157   : > { %11414 = vmatpush3.msra.mxu1 %v497_v4  ;;  %11511 = vmatpush3.msra.mxu0 %v976_v36 }
 0x158   : > { %11415 = vmatprep.subr.mxu1 %v12826_v0  ;;  %11512 = vmatprep.subr.mxu0 %v12826_v0 }
 0x159   : > { %11416 = vmatpush3.msra.mxu1 %v495_v3  ;;  %11513 = vmatpush3.msra.mxu0 %v974_v37  ;;  %v1060_v3 = vpop.permute.xlu0 %1059 }
 0x15a   : > { %11417 = vmatprep.subr.mxu1 %v12826_v0  ;;  %11514 = vmatprep.subr.mxu0 %v12826_v0 }
 0x15b   : > { %11418 = vmatpush3.msra.mxu1 %v493_v5  ;;  %11515 = vmatpush3.msra.mxu0 %v972_v41 }
 0x15c   : > { %11419 = vmatprep.subr.mxu1 %v12826_v0  ;;  %11516 = vmatprep.subr.mxu0 %v12826_v0 }
 0x15d   : > { %11420 = vmatpush3.msra.mxu1 %v491_v7  ;;  %11517 = vmatpush3.msra.mxu0 %v970_v48  ;;  %v12836_v7 = vmov 38  }
 0x15e   : > { %11421 = vmatprep.subr.mxu1 %v12826_v0  ;;  %11518 = vmatprep.subr.mxu0 %v12826_v0 }
 0x15f   : > { %11422 = vmatpush3.msra.mxu1 %v489_v10  ;;  %11519 = vmatpush3.msra.mxu0 %v968_v50  ;;  %v13307_v10 = vld [vmem:[#allocation7 + $0x10] sm:$0xff] }
 0x160   : > { %11423 = vmatprep.subr.mxu1 %v12826_v0  ;;  %11520 = vmatprep.subr.mxu0 %v12826_v0 }
 0x161   : > { %11424 = vmatpush3.msra.mxu1 %v487_v12  ;;  %11521 = vmatpush3.msra.mxu0 %v966_v52 }
 0x162   : > { %11425 = vmatprep.subr.mxu1 %v12826_v0  ;;  %11522 = vmatprep.subr.mxu0 %v12826_v0 }
 0x163   : > { %11426 = vmatpush3.msra.mxu1 %v485_v13  ;;  %11523 = vmatpush3.msra.mxu0 %v964_v54 }
 0x164   : > { %11427 = vmatprep.subr.mxu1 %v12826_v0  ;;  %11524 = vmatprep.subr.mxu0 %v12826_v0 }
 0x165   : > { %11428 = vmatpush3.msra.mxu1 %v483_v14  ;;  %11525 = vmatpush3.msra.mxu0 %v962_v56 }
 0x166   : > { %11429 = vmatprep.subr.mxu1 %v12826_v0  ;;  %11552 = vmatprep.subr.mxu0 %v12826_v0 }
 0x167   : > { %11430 = vmatpush3.msra.mxu1 %v481_v15  ;;  %12628 = vset.pattern.permute.xlu1 %v12836_v7 }
 0x168   : > { %11431 = vmatprep.subr.mxu1 %v12826_v0  ;;  %1136 = vperm.xlu1 %12628, %v13207_v22  }
 0x169   : > { %11432 = vmatpush3.msra.mxu1 %v479_v16  ;;  %1383 = vrot.lane.b32.xlu0 %v13297_v8, %s12827_s20  ;;  %v1140_v16 = vpop.permute.xlu0 %1139 }
 0x16a   : > { %11433 = vmatprep.subr.mxu1 %v12826_v0 }
 0x16b   : > { %11434 = vmatpush3.msra.mxu1 %v477_v17 }
 0x16c   : > { %11435 = vmatprep.subr.mxu1 %v12826_v0  ;;  %1303 = vrot.lane.b32.xlu1 %v13291_v6, %s12837_s8 }
 0x16d   : > { %11436 = vmatpush3.msra.mxu1 %v475_v18 }
 0x16e   : > { %11437 = vmatprep.subr.mxu1 %v12826_v0 }
 0x16f   : > { %11438 = vmatpush3.msra.mxu1 %v473_v19 }
 0x170   : > { %11439 = vmatprep.subr.mxu1 %v12826_v0  ;;  %1301 = vrot.lane.b32.xlu1 %v13297_v8, %s12837_s8 }
 0x171   : > { %11440 = vmatpush3.msra.mxu1 %v471_v20 }
 0x172   : > { %11441 = vmatprep.subr.mxu1 %v12826_v0 }
 0x173   : > { %11442 = vmatpush3.msra.mxu1 %v469_v21 }
 0x174   : > { %11444 = vmatmul.mubr.f32.vlgmr.msra.gmra.mxu1 %v363_v9  ;;  %11481 = vmatprep.subr.mxu1 %v12826_v0  ;;  %v13302_v9 = vld [vmem:[#allocation7 + $0x40] sm:$0xff] }
 0x175   : > { %11483 = vmatprep.mubr.msk.f32.mxu1 %vm12828_vm1, %v12826_v0  ;;  %1381 = vrot.lane.b32.xlu0 %v13302_v9, %s12827_s20 }
 0x176   : > { %1299 = vrot.lane.b32.xlu1 %v13302_v9, %s12837_s8 }
 0x179   : > { %1379 = vrot.lane.b32.xlu0 %v13307_v10, %s12827_s20 }
 0x17a   : > { %1297 = vrot.lane.b32.xlu1 %v13307_v10, %s12837_s8  ;;  %s12861_s8 = smov 95  }
 0x17d   : > { %1465 = vrot.lane.b32.xlu0 %v13207_v22, %s12838_s9 }
 0x181   : > { %1758 = vrot.lane.b32.xlu0 %v13207_v22, %s12827_s20 }
 0x185   : > { %2050 = vrot.lane.b32.xlu0 %v13207_v22, %s12841_s10 }
 0x189   : > { %2346 = vrot.lane.b32.xlu0 %v13207_v22, %s12843_s18 }
 0x18d   : > { %2431 = vrot.lane.b32.xlu0 %v13291_v6, %s12832_s6 }
 0x191   : > { %2427 = vrot.lane.b32.xlu0 %v13302_v9, %s12832_s6 }
 0x195   : > { %2617 = vrot.lane.b32.xlu0 %v13291_v6, %s12844_s11 }
 0x199   : > { %2613 = vrot.lane.b32.xlu0 %v13297_v8, %s12844_s11 }
 0x19d   : > { %2513 = vrot.lane.b32.xlu0 %v13291_v6, %s12845_s12 }
 0x1e3   : > { %v1137_v17 = vpop.permute.xlu1 %1136 }
 0x1e7   : > { %v13325_v18 = vpop.permute.xlu1 %1303 }
 0x1eb   : > { %v13329_v19 = vpop.permute.xlu1 %1301 }
 0x1ef   : > { %v13333_v20 = vpop.permute.xlu1 %1299 }
 0x1f3   : > { %v13337_v21 = vpop.permute.xlu1 %1297 }
 0x214   : > { %v448_v24 = vpop.f32.mrf.mxu1  ;;  %v668_v25 = vpop.f32.mrf.mxu0 }
 0x215   : > { %v676_v30 = vrot.slane %v668_v25, 6 }
 0x216   : > { %v11410_v26 = vpop.f32.mrf.mxu1  ;;  %v11480_v27 = vpop.f32.mrf.mxu0 }
 0x217   : > { %v13345_v26 = vpop.permute.xlu0 %1385 }
 0x21b   : > { %v13347_v27 = vpop.permute.xlu0 %1383 }
 0x234   : > { %v582_v28 = vpop.f32.mrf.mxu1 }
 0x235   : > { %v673_v29 = vrot.slane %v582_v28, 7 }
 0x236   : > { %v11445_v31 = vpop.f32.mrf.mxu1 }
 0x237   : > { %v679_v32 = vsel %vm678_vm2, %v448_v24, %v673_v29  ;;  %vm4634_vm2 = vcmask 80896  }
 0x238   : > { %v681_v33 = vsel %vm680_vm3, %v679_v32, %v676_v30  ;;  %v13351_v30 = vpop.permute.xlu0 %1381  ;;  %v12839_v32 = vmov 63  }
 0x239   : > { %11482 = vmatpush3.msk.msra.mxu1 %vm691_vm4, %v681_v33  ;;  %12629 = vset.pattern.permute.xlu1 %v12839_v32 }
 0x23a   : > { %11484 = vmatmul.mubr.msk.f32.vlgmr.msra.gmra.mxu1 %vm688_vm5, %v13207_v22  ;;  %11486 = vmatprep.subr.mxu1 %v12826_v0 }
 0x23b   : > { %11488 = vmatprep.mubr.msk.f32.mxu1 %vm12828_vm1, %v12826_v0  ;;  %1462 = vperm.xlu1 %12629, %v13207_v22  }
 0x23c   : > { %v13365_v31 = vpop.permute.xlu0 %1379 }
 0x2fa   : > { %v761_v39 = vpop.f32.mrf.mxu1 }
 0x2fb   : > { %v762_v40 = vadd.f32 %v761_v39, %v686_v35  ;;  %v1466_v39 = vpop.permute.xlu0 %1465 }
 0x2fc   : > { %v11485_v42 = vpop.f32.mrf.mxu1 }
 0x2fd   : > { %v765_v43 = vmul.f32 %v762_v40, %v762_v40 }
 0x2ff   : > { %11487 = vmatpush3.msra.mxu1 %v765_v43  ;;  %v1759_v52 = vpop.permute.xlu0 %1758 }
 0x300   : > { %11489 = vmatmul.mubr.msk.f32.vlgmr.msra.gmra.mxu1 %vm772_vm6, %v771_v38  ;;  %11491 = vmatprep.subr.mxu1 %v12826_v0 }
 0x301   : > { %11507 = vmatprep.mubr.msk.f32.mxu1 %vm12828_vm1, %v12826_v0  ;;  %11492 = vmatpush3.msra.mxu1 %v878_v45  ;;  %v12840_v45 = vmov 88  }
 0x302   : > { %11493 = vmatprep.subr.mxu1 %v12826_v0  ;;  %12630 = vset.pattern.permute.xlu1 %v12840_v45 }
 0x303   : > { %11494 = vmatpush3.msra.mxu1 %v876_v46  ;;  %1755 = vperm.xlu1 %12630, %v13207_v22  }
 0x304   : > { %11495 = vmatprep.subr.mxu1 %v12826_v0 }
 0x305   : > { %11496 = vmatpush3.msra.mxu1 %v874_v47 }
 0x306   : > { %11497 = vmatprep.subr.mxu1 %v12826_v0 }
 0x307   : > { %11498 = vmatpush3.msra.mxu1 %v872_v49 }
 0x308   : > { %11499 = vmatprep.subr.mxu1 %v12826_v0 }
 0x309   : > { %11500 = vmatpush3.msra.mxu1 %v870_v51 }
 0x30a   : > { %11501 = vmatprep.subr.mxu1 %v12826_v0 }
 0x30b   : > { %11502 = vmatpush3.msra.mxu1 %v868_v53 }
 0x30c   : > { %11503 = vmatprep.subr.mxu1 %v12826_v0 }
 0x30d   : > { %11504 = vmatpush3.msra.mxu1 %v866_v55 }
 0x30e   : > { %11505 = vmatprep.subr.mxu1 %v12826_v0 }
 0x30f   : > { %11506 = vmatpush3.msra.mxu1 %v864_v57 }
 0x310   : > { %11529 = vmatprep.subr.mxu1 %v12826_v0 }
 0x3c0   : > { %v841_v58 = vpop.f32.mrf.mxu1 }
 0x3c1   : > { %v842_v59 = vadd.f32 %v841_v58, %v768_v44  ;;  %v12842_v58 = vmov 113  }
 0x3c2   : > { %v11490_v60 = vpop.f32.mrf.mxu1  ;;  %12631 = vset.pattern.permute.xlu1 %v12842_v58 }
 0x3c3   : > { %12660 = vrsqrt.f32 %v842_v59  ;;  %2047 = vperm.xlu1 %12631, %v13207_v22   ;;  %v13477_v59 = vld [vmem:[#allocation6 + $0x10] sm:$0xff]  ;;  %v2596_v22 = vld [vmem:[#allocation7 + $0xa8] sm:$0xff]  ;;  %v2594_v60 = vld [vmem:[#allocation7 + $0x78] sm:$0xff] }
 0x3c7   : > { %2348 = vrot.lane.b32.xlu1 %v13477_v59, %s12843_s18 }
 0x3cb   : > { %2429 = vrot.lane.b32.xlu1 %v13297_v8, %s12832_s6 }
 0x3cf   : > { %2425 = vrot.lane.b32.xlu1 %v13307_v10, %s12832_s6  ;;  %s12860_s6 = smov 25  }
 0x3d0   : > { %v12661_v61 = vpop.eup %12660 }
 0x3d1   : > { %v13273_v62 = vmul.f32 %v12661_v61, %v762_v40  ;;  %v1463_v40 = vpop.permute.xlu1 %1462  ;;  %v2592_v61 = vld [vmem:[#allocation7 + $0x48] sm:$0xff] }
 0x3d2   : > { %2611 = vrot.lane.b32.xlu0 %v2592_v61, %s12844_s11 }
 0x3d3   : > { %11508 = vmatmul.mubr.msk.f32.vlgmr.msra.gmra.mxu1 %vm887_vm7, %v13273_v62  ;;  %11527 = vmatmul.mubr.msk.f32.vlgmr.msra.gmra.mxu0 %vm887_vm7, %v13273_v62 }
 0x3d4   : > { %11533 = vmatprep.mubr.msk.f32.mxu1 %vm12828_vm1, %v12826_v0  ;;  %11560 = vmatprep.mubr.msk.f32.mxu0 %vm12828_vm1, %v12826_v0 }
 0x3d5   : > { %11553 = vmatpush3.msra.mxu0 %v13325_v18  ;;  %v1756_v53 = vpop.permute.xlu1 %1755  ;;  %2619 = vrot.lane.b32.xlu1 %v2596_v22, %s12844_s11 }
 0x3d6   : > { %11554 = vmatprep.subr.mxu0 %v12826_v0  ;;  %2605 = vrot.lane.b32.xlu0 %v13307_v10, %s12844_s11 }
 0x3d7   : > { %11555 = vmatpush3.msra.mxu0 %v13329_v19 }
 0x3d8   : > { %11556 = vmatprep.subr.mxu0 %v12826_v0 }
 0x3d9   : > { %11557 = vmatpush3.msra.mxu0 %v13333_v20  ;;  %2615 = vrot.lane.b32.xlu1 %v2594_v60, %s12844_s11 }
 0x3da   : > { %11558 = vmatprep.subr.mxu0 %v12826_v0  ;;  %2509 = vrot.lane.b32.xlu0 %v13302_v9, %s12845_s12 }
 0x3db   : > { %11559 = vmatpush3.msra.mxu0 %v13337_v21 }
 0x3dc   : > { %11574 = vmatprep.subr.mxu0 %v12826_v0 }
 0x3dd   : > { %2609 = vrot.lane.b32.xlu1 %v13302_v9, %s12844_s11 }
 0x3de   : > { %2704 = vrot.lane.b32.xlu0 %v13477_v59, %s12855_s29  ;;  %s12874_s29 = smov 40  }
 0x3e1   : > { %2511 = vrot.lane.b32.xlu1 %v13297_v8, %s12845_s12 }
 0x3e5   : > { %2607 = vrot.lane.b32.xlu1 %v13497_v63, %s12844_s11  ;;  %s12862_s11 = smov 10  }
 0x3e9   : > { %2507 = vrot.lane.b32.xlu1 %v13307_v10, %s12845_s12 }
 0x493   : > { %v957_v1 = vpop.f32.mrf.mxu1  ;;  %v1051_v2 = vpop.f32.mrf.mxu0 }
 0x494   : > { %11530 = vmatpush3.msra.mxu1 %v1051_v2 }
 0x495   : > { %v11509_v4 = vpop.f32.mrf.mxu1  ;;  %v11528_v5 = vpop.f32.mrf.mxu0  ;;  %11531 = vmatprep.subr.mxu1 %v12826_v0 }
 0x496   : > { %11532 = vmatpush3.msra.mxu1 %v957_v1 }
 0x497   : > { %11534 = vmatmul.mubr.msk.f32.vlgmr.msra.gmra.mxu1 %vm1061_vm8, %v1060_v3  ;;  %11536 = vmatprep.subr.mxu1 %v12826_v0 }
 0x498   : > { %11538 = vmatprep.mubr.msk.f32.mxu1 %vm12828_vm1, %v12826_v0 }
 0x557   : > { %v1130_v12 = vpop.f32.mrf.mxu1 }
 0x558   : > { %v1131_v13 = vadd.f32 %v1130_v12, %v1057_v11  ;;  %v2051_v12 = vpop.permute.xlu0 %2050 }
 0x559   : > { %v11535_v14 = vpop.f32.mrf.mxu1 }
 0x55a   : > { %v1134_v15 = vmul.f32 %v1131_v13, %v1131_v13 }
 0x55c   : > { %11537 = vmatpush3.msra.mxu1 %v1134_v15 }
 0x55d   : > { %11539 = vmatmul.mubr.msk.f32.vlgmr.msra.gmra.mxu1 %vm772_vm6, %v1140_v16  ;;  %11541 = vmatprep.subr.mxu1 %v12826_v0 }
 0x55e   : > { %11542 = vmatpush3.msra.mxu1 %v13291_v6  ;;  %11549 = vmatprep.mubr.msk.f32.mxu1 %vm12828_vm1, %v12826_v0 }
 0x55f   : > { %11543 = vmatprep.subr.mxu1 %v12826_v0 }
 0x560   : > { %11544 = vmatpush3.msra.mxu1 %v13297_v8 }
 0x561   : > { %11545 = vmatprep.subr.mxu1 %v12826_v0 }
 0x562   : > { %11546 = vmatpush3.msra.mxu1 %v13302_v9 }
 0x563   : > { %11547 = vmatprep.subr.mxu1 %v12826_v0 }
 0x564   : > { %11548 = vmatpush3.msra.mxu1 %v13307_v10 }
 0x565   : > { %11563 = vmatprep.subr.mxu1 %v12826_v0 }
 0x61d   : > { %v1209_v23 = vpop.f32.mrf.mxu1 }
 0x61e   : > { %v1210_v24 = vadd.f32 %v1209_v23, %v1137_v17 }
 0x61f   : > { %v11540_v25 = vpop.f32.mrf.mxu1 }
 0x620   : > { %12662 = vrsqrt.f32 %v1210_v24 }
 0x62d   : > { %v12663_v28 = vpop.eup %12662 }
 0x62e   : > { %v13349_v29 = vmul.f32 %v12663_v28, %v1131_v13  ;;  %v12846_v13 = vmov 35  }
 0x62f   : > { %12632 = vset.pattern.permute.xlu1 %v12846_v13 }
 0x630   : > { %11550 = vmatmul.mubr.msk.f32.vlgmr.msra.gmra.mxu1 %vm1219_vm9, %v13349_v29  ;;  %11561 = vmatmul.mubr.msk.f32.vlgmr.msra.gmra.mxu0 %vm1219_vm9, %v13349_v29 }
 0x631   : > { %11564 = vmatpush3.msra.mxu1 %v13345_v26  ;;  %11571 = vmatprep.mubr.msk.f32.mxu1 %vm12828_vm1, %v12826_v0 }
 0x632   : > { %11565 = vmatprep.subr.mxu1 %v12826_v0  ;;  %11580 = vmatprep.mubr.msk.f32.mxu0 %vm12828_vm1, %v12826_v0 }
 0x633   : > { %11566 = vmatpush3.msra.mxu1 %v13347_v27  ;;  %2701 = vperm.xlu1 %12632, %v13477_v59  }
 0x634   : > { %11567 = vmatprep.subr.mxu1 %v12826_v0 }
 0x635   : > { %11568 = vmatpush3.msra.mxu1 %v13351_v30 }
 0x636   : > { %11569 = vmatprep.subr.mxu1 %v12826_v0 }
 0x637   : > { %11570 = vmatpush3.msra.mxu1 %v13365_v31  ;;  %2783 = vrot.lane.b32.xlu1 %v13497_v63, %s12833_s28 }
 0x638   : > { %11572 = vmatmul.mubr.msk.f32.vlgmr.msra.gmra.mxu1 %vm1219_vm9, %v13349_v29  ;;  %11594 = vmatprep.subr.mxu1 %v12826_v0 }
 0x639   : > { %11595 = vmatpush3.msra.mxu1 %v13325_v18  ;;  %11602 = vmatprep.mubr.msk.f32.mxu1 %vm12828_vm1, %v12826_v0 }
 0x63a   : > { %11596 = vmatprep.subr.mxu1 %v12826_v0 }
 0x63b   : > { %11597 = vmatpush3.msra.mxu1 %v13329_v19 }
 0x63c   : > { %11598 = vmatprep.subr.mxu1 %v12826_v0 }
 0x63d   : > { %11599 = vmatpush3.msra.mxu1 %v13333_v20 }
 0x63e   : > { %11600 = vmatprep.subr.mxu1 %v12826_v0 }
 0x63f   : > { %11601 = vmatpush3.msra.mxu1 %v13337_v21 }
 0x640   : > { %11616 = vmatprep.subr.mxu1 %v12826_v0 }
 0x6f0   : > { %v1289_v33 = vpop.f32.mrf.mxu1  ;;  %v1375_v34 = vpop.f32.mrf.mxu0 }
 0x6f2   : > { %v11551_v35 = vpop.f32.mrf.mxu1  ;;  %v11562_v36 = vpop.f32.mrf.mxu0 }
 0x6f8   : > { %v1457_v37 = vpop.f32.mrf.mxu1 }
 0x6f9   : > { %11575 = vmatpush3.msra.mxu0 %v1457_v37 }
 0x6fa   : > { %v11573_v38 = vpop.f32.mrf.mxu1  ;;  %11576 = vmatprep.subr.mxu0 %v12826_v0 }
 0x6fb   : > { %11577 = vmatpush3.msra.mxu0 %v1375_v34 }
 0x6fc   : > { %11578 = vmatprep.subr.mxu0 %v12826_v0 }
 0x6fd   : > { %11579 = vmatpush3.msra.mxu0 %v1289_v33 }
 0x6fe   : > { %11581 = vmatmul.mubr.msk.f32.vlgmr.msra.gmra.mxu0 %vm1467_vm10, %v1466_v39  ;;  %11583 = vmatprep.subr.mxu0 %v12826_v0  ;;  %v13595_v39 = vld [vmem:[#allocation7 + $0x18] sm:$0x7] }
 0x6ff   : > { %11584 = vmatpush3.msra.mxu0 %v13291_v6  ;;  %11591 = vmatprep.mubr.msk.f32.mxu0 %vm12828_vm1, %v12826_v0 }
 0x700   : > { %11585 = vmatprep.subr.mxu0 %v12826_v0 }
 0x701   : > { %11586 = vmatpush3.msra.mxu0 %v13297_v8 }
 0x702   : > { %11587 = vmatprep.subr.mxu0 %v12826_v0 }
 0x703   : > { %11588 = vmatpush3.msra.mxu0 %v13302_v9 }
 0x704   : > { %11589 = vmatprep.subr.mxu0 %v12826_v0 }
 0x705   : > { %11590 = vmatpush3.msra.mxu0 %v13307_v10 }
 0x706   : > { %11605 = vmatprep.subr.mxu0 %v12826_v0 }
 0x7be   : > { %v1536_v41 = vpop.f32.mrf.mxu0 }
 0x7bf   : > { %v1537_v42 = vadd.f32 %v1536_v41, %v1463_v40  ;;  %v13603_v40 = vld [vmem:[#allocation6 + $0x18] sm:$0xff]  ;;  %v12854_v41 = vmov 10  }
 0x7c0   : > { %v11582_v43 = vpop.f32.mrf.mxu0 }
 0x7c1   : > { %v1540_v44 = vmax.f32 %v1537_v42, 0.0  ;;  %v4620_v42 = vld [vmem:[#allocation7 + $0x48] sm:$0x7f]  ;;  %v13620_v43 = vld [vmem:[#allocation7 + $0x50] sm:$0x7f] }
 0x7c3   : > { %11592 = vmatmul.mubr.msk.f32.vlgmr.msra.gmra.mxu0 %vm1219_vm9, %v1540_v44  ;;  %11603 = vmatmul.mubr.msk.f32.vlgmr.msra.gmra.mxu1 %vm1219_vm9, %v1540_v44 }
 0x7c4   : > { %11606 = vmatpush3.msra.mxu0 %v13345_v26  ;;  %11613 = vmatprep.mubr.msk.f32.mxu0 %vm12828_vm1, %v12826_v0 }
 0x7c5   : > { %11607 = vmatprep.subr.mxu0 %v12826_v0  ;;  %11622 = vmatprep.mubr.msk.f32.mxu1 %vm12828_vm1, %v12826_v0 }
 0x7c6   : > { %11608 = vmatpush3.msra.mxu0 %v13347_v27 }
 0x7c7   : > { %11609 = vmatprep.subr.mxu0 %v12826_v0 }
 0x7c8   : > { %11610 = vmatpush3.msra.mxu0 %v13351_v30 }
 0x7c9   : > { %11611 = vmatprep.subr.mxu0 %v12826_v0 }
 0x7ca   : > { %11612 = vmatpush3.msra.mxu0 %v13365_v31 }
 0x7cb   : > { %11614 = vmatmul.mubr.msk.f32.vlgmr.msra.gmra.mxu0 %vm1219_vm9, %v1540_v44  ;;  %11636 = vmatprep.subr.mxu0 %v12826_v0  ;;  %v13624_v44 = vld [vmem:[#allocation7 + $0x20] sm:$0xff] }
 0x7cc   : > { %11637 = vmatpush3.msra.mxu0 %v13325_v18  ;;  %11644 = vmatprep.mubr.msk.f32.mxu0 %vm12828_vm1, %v12826_v0 }
 0x7cd   : > { %11638 = vmatprep.subr.mxu0 %v12826_v0 }
 0x7ce   : > { %11639 = vmatpush3.msra.mxu0 %v13329_v19 }
 0x7cf   : > { %11640 = vmatprep.subr.mxu0 %v12826_v0 }
 0x7d0   : > { %11641 = vmatpush3.msra.mxu0 %v13333_v20 }
 0x7d1   : > { %11642 = vmatprep.subr.mxu0 %v12826_v0 }
 0x7d2   : > { %11643 = vmatpush3.msra.mxu0 %v13337_v21 }
 0x7d3   : > { %11658 = vmatprep.subr.mxu0 %v12826_v0 }
 0x883   : > { %v1610_v46 = vpop.f32.mrf.mxu0  ;;  %v1680_v47 = vpop.f32.mrf.mxu1 }
 0x885   : > { %v11593_v48 = vpop.f32.mrf.mxu0  ;;  %v11604_v49 = vpop.f32.mrf.mxu1 }
 0x88b   : > { %v1750_v50 = vpop.f32.mrf.mxu0 }
 0x88c   : > { %11617 = vmatpush3.msra.mxu1 %v1750_v50 }
 0x88d   : > { %v11615_v51 = vpop.f32.mrf.mxu0  ;;  %11618 = vmatprep.subr.mxu1 %v12826_v0 }
 0x88e   : > { %11619 = vmatpush3.msra.mxu1 %v1680_v47 }
 0x88f   : > { %11620 = vmatprep.subr.mxu1 %v12826_v0 }
 0x890   : > { %11621 = vmatpush3.msra.mxu1 %v1610_v46 }
 0x891   : > { %11623 = vmatmul.mubr.msk.f32.vlgmr.msra.gmra.mxu1 %vm1467_vm10, %v1759_v52  ;;  %11625 = vmatprep.subr.mxu1 %v12826_v0 }
 0x892   : > { %11626 = vmatpush3.msra.mxu1 %v13291_v6  ;;  %11633 = vmatprep.mubr.msk.f32.mxu1 %vm12828_vm1, %v12826_v0 }
 0x893   : > { %11627 = vmatprep.subr.mxu1 %v12826_v0 }
 0x894   : > { %11628 = vmatpush3.msra.mxu1 %v13297_v8 }
 0x895   : > { %11629 = vmatprep.subr.mxu1 %v12826_v0 }
 0x896   : > { %11630 = vmatpush3.msra.mxu1 %v13302_v9 }
 0x897   : > { %11631 = vmatprep.subr.mxu1 %v12826_v0 }
 0x898   : > { %11632 = vmatpush3.msra.mxu1 %v13307_v10 }
 0x899   : > { %11647 = vmatprep.subr.mxu1 %v12826_v0 }
 0x951   : > { %v1828_v54 = vpop.f32.mrf.mxu1 }
 0x952   : > { %v1829_v55 = vadd.f32 %v1828_v54, %v1756_v53 }
 0x953   : > { %v11624_v56 = vpop.f32.mrf.mxu1 }
 0x954   : > { %v13443_v57 = vadd.f32 %v1829_v55, %v13349_v29 }
 0x956   : > { %11634 = vmatmul.mubr.msk.f32.vlgmr.msra.gmra.mxu1 %vm1219_vm9, %v13443_v57  ;;  %11645 = vmatmul.mubr.msk.f32.vlgmr.msra.gmra.mxu0 %vm1219_vm9, %v13443_v57 }
 0x957   : > { %11648 = vmatpush3.msra.mxu1 %v13345_v26  ;;  %11655 = vmatprep.mubr.msk.f32.mxu1 %vm12828_vm1, %v12826_v0 }
 0x958   : > { %11649 = vmatprep.subr.mxu1 %v12826_v0  ;;  %11664 = vmatprep.mubr.msk.f32.mxu0 %vm12828_vm1, %v12826_v0 }
 0x959   : > { %11650 = vmatpush3.msra.mxu1 %v13347_v27 }
 0x95a   : > { %11651 = vmatprep.subr.mxu1 %v12826_v0 }
 0x95b   : > { %11652 = vmatpush3.msra.mxu1 %v13351_v30 }
 0x95c   : > { %11653 = vmatprep.subr.mxu1 %v12826_v0 }
 0x95d   : > { %11654 = vmatpush3.msra.mxu1 %v13365_v31 }
 0x95e   : > { %11656 = vmatmul.mubr.msk.f32.vlgmr.msra.gmra.mxu1 %vm1219_vm9, %v13443_v57  ;;  %11678 = vmatprep.subr.mxu1 %v12826_v0 }
 0x95f   : > { %11679 = vmatpush3.msra.mxu1 %v13325_v18  ;;  %11686 = vmatprep.mubr.msk.f32.mxu1 %vm12828_vm1, %v12826_v0 }
 0x960   : > { %11680 = vmatprep.subr.mxu1 %v12826_v0 }
 0x961   : > { %11681 = vmatpush3.msra.mxu1 %v13329_v19 }
 0x962   : > { %11682 = vmatprep.subr.mxu1 %v12826_v0 }
 0x963   : > { %11683 = vmatpush3.msra.mxu1 %v13333_v20 }
 0x964   : > { %11684 = vmatprep.subr.mxu1 %v12826_v0 }
 0x965   : > { %11685 = vmatpush3.msra.mxu1 %v13337_v21 }
 0x966   : > { %11700 = vmatprep.subr.mxu1 %v12826_v0 }
 0xa16   : > { %v1902_v1 = vpop.f32.mrf.mxu1  ;;  %v1972_v2 = vpop.f32.mrf.mxu0 }
 0xa18   : > { %v11635_v3 = vpop.f32.mrf.mxu1  ;;  %v11646_v4 = vpop.f32.mrf.mxu0 }
 0xa1e   : > { %v2042_v5 = vpop.f32.mrf.mxu1 }
 0xa1f   : > { %11659 = vmatpush3.msra.mxu0 %v2042_v5 }
 0xa20   : > { %v11657_v11 = vpop.f32.mrf.mxu1  ;;  %11660 = vmatprep.subr.mxu0 %v12826_v0 }
 0xa21   : > { %11661 = vmatpush3.msra.mxu0 %v1972_v2 }
 0xa22   : > { %11662 = vmatprep.subr.mxu0 %v12826_v0 }
 0xa23   : > { %11663 = vmatpush3.msra.mxu0 %v1902_v1 }
 0xa24   : > { %11665 = vmatmul.mubr.msk.f32.vlgmr.msra.gmra.mxu0 %vm1467_vm10, %v2051_v12  ;;  %11667 = vmatprep.subr.mxu0 %v12826_v0 }
 0xa25   : > { %11668 = vmatpush3.msra.mxu0 %v13291_v6  ;;  %11675 = vmatprep.mubr.msk.f32.mxu0 %vm12828_vm1, %v12826_v0  ;;  %v13521_v6 = vld [vmem:[#allocation7 + $0x48] sm:$0x7f] }
 0xa26   : > { %11669 = vmatprep.subr.mxu0 %v12826_v0  ;;  %2867 = vrot.lane.b32.xlu1 %v13521_v6, %s12847_s13 }
 0xa27   : > { %11670 = vmatpush3.msra.mxu0 %v13297_v8  ;;  %v2048_v8 = vpop.permute.xlu1 %2047  ;;  %2785 = vrot.lane.b32.xlu0 %v13521_v6, %s12833_s28  ;;  %s12863_s28 = smov 107  }
 0xa28   : > { %11671 = vmatprep.subr.mxu0 %v12826_v0 }
 0xa29   : > { %11672 = vmatpush3.msra.mxu0 %v13302_v9  ;;  %v13525_v9 = vpop.permute.xlu0 %2346 }
 0xa2a   : > { %11673 = vmatprep.subr.mxu0 %v12826_v0  ;;  %2865 = vrot.lane.b32.xlu1 %v13497_v63, %s12847_s13  ;;  %s12865_s13 = smov 92  }
 0xa2b   : > { %11674 = vmatpush3.msra.mxu0 %v13307_v10  ;;  %v13527_v10 = vpop.permute.xlu1 %2348 }
 0xa2c   : > { %11689 = vmatprep.subr.mxu0 %v12826_v0  ;;  %v2351_v52 = vsel %vm2350_vm11, %v13525_v9, %v13527_v10 }
 0xa2d   : > { %v13529_v14 = vpop.permute.xlu0 %2431 }
 0xa2f   : > { %v13531_v15 = vpop.permute.xlu1 %2429 }
 0xa31   : > { %v13533_v16 = vpop.permute.xlu0 %2427 }
 0xa33   : > { %v13535_v17 = vpop.permute.xlu1 %2425 }
 0xa35   : > { %v13537_v18 = vpop.permute.xlu0 %2617 }
 0xa37   : > { %v13539_v19 = vpop.permute.xlu1 %2619 }
 0xa38   : > { %v13652_v55 = vsel %vm2621_vm12, %v13537_v18, %v13539_v19 }
 0xa39   : > { %v13541_v20 = vpop.permute.xlu0 %2613 }
 0xa3b   : > { %v13543_v21 = vpop.permute.xlu1 %2615 }
 0xa3c   : > { %v13663_v56 = vsel %vm2621_vm12, %v13541_v20, %v13543_v21 }
 0xa3d   : > { %v13545_v23 = vpop.permute.xlu0 %2513 }
 0xa3f   : > { %v13547_v24 = vpop.permute.xlu1 %2609 }
 0xa41   : > { %v13549_v35 = vpop.permute.xlu0 %2611 }
 0xa42   : > { %v13670_v22 = vsel %vm2621_vm12, %v13547_v24, %v13549_v35 }
 0xa43   : > { %v13553_v36 = vpop.permute.xlu1 %2511 }
 0xa45   : > { %v13563_v37 = vpop.permute.xlu0 %2605 }
 0xa47   : > { %v13567_v38 = vpop.permute.xlu1 %2607 }
 0xa48   : > { %v13677_v60 = vsel %vm2621_vm12, %v13563_v37, %v13567_v38 }
 0xae4   : > { %v2120_v25 = vpop.f32.mrf.mxu0 }
 0xae5   : > { %v2121_v28 = vadd.f32 %v2120_v25, %v2048_v8 }
 0xae6   : > { %v11666_v33 = vpop.f32.mrf.mxu0 }
 0xae7   : > { %v2124_v34 = vmax.f32 %v2121_v28, 0.0 }
 0xae9   : > { %11676 = vmatmul.mubr.msk.f32.vlgmr.msra.gmra.mxu0 %vm1219_vm9, %v2124_v34  ;;  %11687 = vmatmul.mubr.msk.f32.vlgmr.msra.gmra.mxu1 %vm1219_vm9, %v2124_v34 }
 0xaea   : > { %11690 = vmatpush3.msra.mxu0 %v13345_v26  ;;  %11697 = vmatprep.mubr.msk.f32.mxu0 %vm12828_vm1, %v12826_v0  ;;  %v13576_v26 = vpop.permute.xlu0 %2509 }
 0xaeb   : > { %11691 = vmatprep.subr.mxu0 %v12826_v0  ;;  %11706 = vmatprep.mubr.msk.f32.mxu1 %vm12828_vm1, %v12826_v0 }
 0xaec   : > { %11692 = vmatpush3.msra.mxu0 %v13347_v27  ;;  %v13580_v27 = vpop.permute.xlu1 %2507 }
 0xaed   : > { %11693 = vmatprep.subr.mxu0 %v12826_v0 }
 0xaee   : > { %11694 = vmatpush3.msra.mxu0 %v13351_v30  ;;  %v12848_v30 = vmov 60   ;;  %v2705_v11 = vpop.permute.xlu0 %2704 }
 0xaef   : > { %11695 = vmatprep.subr.mxu0 %v12826_v0  ;;  %12633 = vset.pattern.permute.xlu1 %v12848_v30 }
 0xaf0   : > { %11696 = vmatpush3.msra.mxu0 %v13365_v31  ;;  %3020 = vperm.xlu1 %12633, %v13477_v59   ;;  %v13591_v31 = vld [vmem:[#allocation7 + $0x18] sm:$0x7f]  ;;  %v2702_v12 = vpop.permute.xlu1 %2701 }
 0xaf1   : > { %11698 = vmatmul.mubr.msk.f32.vlgmr.msra.gmra.mxu0 %vm1219_vm9, %v2124_v34  ;;  %11720 = vmatprep.subr.mxu0 %v12826_v0 }
 0xaf2   : > { %11721 = vmatpush3.msra.mxu0 %v13545_v23  ;;  %11728 = vmatprep.mubr.msk.f32.mxu0 %vm12828_vm1, %v12826_v0  ;;  %v2786_v8 = vpop.permute.xlu0 %2785 }
 0xaf3   : > { %11722 = vmatprep.subr.mxu0 %v12826_v0 }
 0xaf4   : > { %11723 = vmatpush3.msra.mxu0 %v13553_v36  ;;  %3252 = vrot.lane.b32.xlu1 %v13591_v31, %s12849_s14  ;;  %v2784_v13 = vpop.permute.xlu1 %2783  ;;  %s12866_s14 = smov 94  }
 0xaf5   : > { %11724 = vmatprep.subr.mxu0 %v12826_v0  ;;  %12639 = vset.pattern.permute.xlu1 %v12854_v41 }
 0xaf6   : > { %11725 = vmatpush3.msra.mxu0 %v13576_v26 }
 0xaf7   : > { %11726 = vmatprep.subr.mxu0 %v12826_v0 }
 0xaf8   : > { %11727 = vmatpush3.msra.mxu0 %v13580_v27  ;;  %3330 = vrot.lane.b32.xlu1 %v13477_v59, %s12850_s15  ;;  %s12867_s15 = smov 91  }
 0xaf9   : > { %11729 = vmatmul.mubr.msk.f32.vlgmr.msra.gmra.mxu0 %vm1219_vm9, %v13349_v29  ;;  %11742 = vmatprep.subr.mxu0 %v12826_v0 }
 0xafa   : > { %11748 = vmatprep.mubr.msk.f32.mxu0 %vm12828_vm1, %v12826_v0 }
 0xafc   : > { %3406 = vrot.lane.b32.xlu1 %v13595_v39, %s12851_s23  ;;  %s12869_s23 = smov 82  }
 0xb00   : > { %3557 = vrot.lane.b32.xlu1 %v13595_v39, %s12852_s25 }
 0xb04   : > { %3635 = vrot.lane.b32.xlu1 %v13477_v59, %s12853_s27  ;;  %s12872_s27 = smov 69  }
 0xb08   : > { %3931 = vrot.lane.b32.xlu1 %v13477_v59, %s12845_s12 }
 0xb0c   : > { %3933 = vrot.lane.b32.xlu1 %v13603_v40, %s12845_s12  ;;  %s12864_s12 = smov 101  }
 0xb0d   : > { %2944 = vrot.lane.b32.xlu0 %v13521_v6, %s12864_s12  ;;  %v2868_v6 = vpop.permute.xlu1 %2867 }
 0xb10   : > { %4010 = vrot.lane.b32.xlu1 %v13595_v39, %s12856_s30 }
 0xb11   : > { %2942 = vrot.lane.b32.xlu0 %v13497_v63, %s12864_s12  ;;  %v2866_v9 = vpop.permute.xlu1 %2865 }
 0xb14   : > { %4161 = vrot.lane.b32.xlu1 %v13595_v39, %s12857_s24  ;;  %s12878_s24 = smov 45  }
 0xb15   : > { %3023 = vrot.lane.b32.xlu0 %v13477_v59, %s12865_s13  ;;  %s12884_s13 = smov 11  }
 0xb18   : > { %4239 = vrot.lane.b32.xlu1 %v13603_v40, %s12858_s5  ;;  %s12880_s5 = smov 20  }
 0xb19   : > { %3100 = vrot.lane.b32.xlu0 %v13591_v31, %s12866_s14  ;;  %s12886_s14 = smov 21  }
 0xb1c   : > { %4314 = vrot.lane.b32.xlu1 %v13591_v31, %s12859_s21 }
 0xb1d   : > { %3178 = vrot.lane.b32.xlu0 %v13591_v31, %s12867_s15  ;;  %s12887_s15 = smov 5  }
 0xb20   : > { %4465 = vrot.lane.b32.xlu1 %v13591_v31, %s12860_s6  ;;  %s12882_s6 = smov 29  }
 0xb24   : > { %4543 = vrot.lane.b32.xlu1 %v13603_v40, %s12861_s8 }
 0xb28   : > { %4630 = vrot.lane.b32.xlu1 %v4620_v42, %s12862_s11 }
 0xb2c   : > { %4632 = vrot.lane.b32.xlu1 %v13620_v43, %s12862_s11 }
 0xb30   : > { %4628 = vrot.lane.b32.xlu1 %v13624_v44, %s12862_s11 }
 0xb34   : > { %4715 = vrot.lane.b32.xlu1 %v13620_v43, %s12863_s28 }
 0xb38   : > { %4713 = vrot.lane.b32.xlu1 %v13624_v44, %s12863_s28 }
 0xb3c   : > { %2342 = vperm.xlu1 %12639, %v13477_v59  }
 0xb40   : > { %5166 = vrot.lane.b32.xlu1 %v13603_v40, %s12878_s24 }
 0xb6b   : > { %v3021_v42 = vpop.permute.xlu1 %3020 }
 0xb7f   : > { %v2945_v10 = vpop.permute.xlu0 %2944 }
 0xb83   : > { %v2943_v24 = vpop.permute.xlu0 %2942 }
 0xb87   : > { %v3024_v25 = vpop.permute.xlu0 %3023 }
 0xb8b   : > { %v13719_v28 = vpop.permute.xlu0 %3100 }
 0xb8f   : > { %v13730_v41 = vpop.permute.xlu0 %3178 }
 0xba9   : > { %v2194_v46 = vpop.f32.mrf.mxu0  ;;  %v2264_v47 = vpop.f32.mrf.mxu1 }
 0xbab   : > { %v11677_v48 = vpop.f32.mrf.mxu0  ;;  %v11688_v49 = vpop.f32.mrf.mxu1 }
 0xbb1   : > { %v2334_v50 = vpop.f32.mrf.mxu0 }
 0xbb2   : > { %11701 = vmatpush3.msra.mxu1 %v2334_v50 }
 0xbb3   : > { %v11699_v51 = vpop.f32.mrf.mxu0  ;;  %11702 = vmatprep.subr.mxu1 %v12826_v0 }
 0xbb4   : > { %11703 = vmatpush3.msra.mxu1 %v2264_v47 }
 0xbb5   : > { %11704 = vmatprep.subr.mxu1 %v12826_v0 }
 0xbb6   : > { %11705 = vmatpush3.msra.mxu1 %v2194_v46  ;;  %v13735_v46 = vpop.permute.xlu1 %3252 }
 0xbb7   : > { %11707 = vmatmul.mubr.msk.f32.vlgmr.msra.gmra.mxu1 %vm1467_vm10, %v2351_v52  ;;  %11709 = vmatprep.subr.mxu1 %v12826_v0 }
 0xbb8   : > { %11710 = vmatpush3.msra.mxu1 %v13529_v14  ;;  %11717 = vmatprep.mubr.msk.f32.mxu1 %vm12828_vm1, %v12826_v0 }
 0xbb9   : > { %11711 = vmatprep.subr.mxu1 %v12826_v0  ;;  %v2585_v53 = vpop.f32.mrf.mxu0 }
 0xbba   : > { %11712 = vmatpush3.msra.mxu1 %v13531_v15  ;;  %v3331_v50 = vpop.permute.xlu1 %3330 }
 0xbbb   : > { %11713 = vmatprep.subr.mxu1 %v12826_v0  ;;  %v11730_v54 = vpop.f32.mrf.mxu0 }
 0xbbc   : > { %11714 = vmatpush3.msra.mxu1 %v13533_v16 }
 0xbbd   : > { %11715 = vmatprep.subr.mxu1 %v12826_v0 }
 0xbbe   : > { %11716 = vmatpush3.msra.mxu1 %v13535_v17  ;;  %v3407_v52 = vpop.permute.xlu1 %3406 }
 0xbbf   : > { %11718 = vmatmul.mubr.msk.f32.vlgmr.msra.gmra.mxu1 %vm1219_vm9, %v13349_v29  ;;  %11731 = vmatprep.subr.mxu1 %v12826_v0 }
 0xbc0   : > { %11732 = vmatpush3.msra.mxu1 %v13652_v55  ;;  %11739 = vmatprep.mubr.msk.f32.mxu1 %vm12828_vm1, %v12826_v0 }
 0xbc1   : > { %11733 = vmatprep.subr.mxu1 %v12826_v0 }
 0xbc2   : > { %11734 = vmatpush3.msra.mxu1 %v13663_v56 }
 0xbc3   : > { %11735 = vmatprep.subr.mxu1 %v12826_v0 }
 0xbc4   : > { %11736 = vmatpush3.msra.mxu1 %v13670_v22 }
 0xbc5   : > { %11737 = vmatprep.subr.mxu1 %v12826_v0 }
 0xbc6   : > { %11738 = vmatpush3.msra.mxu1 %v13677_v60 }
 0xbc7   : > { %11740 = vmatmul.mubr.msk.f32.vlgmr.msra.gmra.mxu1 %vm1219_vm9, %v13349_v29  ;;  %11758 = vmatprep.subr.mxu1 %v12826_v0 }
 0xbc8   : > { %11762 = vmatprep.mubr.msk.f32.mxu1 %vm12828_vm1, %v12826_v0  ;;  %11759 = vmatpush3.msk.msra.mxu1 %vm2792_vm13, %v2868_v6 }
 0xbc9   : > { %11760 = vmatprep.subr.mxu1 %v12826_v0 }
 0xbca   : > { %11761 = vmatpush3.msra.mxu1 %v2866_v9 }
 0xbcb   : > { %11772 = vmatprep.subr.mxu1 %v12826_v0 }
 0xc77   : > { %v13690_v61 = vpop.f32.mrf.mxu1 }
 0xc79   : > { %v11708_v1 = vpop.f32.mrf.mxu1 }
 0xc7f   : > { %v2503_v2 = vpop.f32.mrf.mxu1 }
 0xc81   : > { %v11719_v3 = vpop.f32.mrf.mxu1 }
 0xc87   : > { %v2696_v4 = vpop.f32.mrf.mxu1 }
 0xc88   : > { %11743 = vmatpush3.msra.mxu0 %v2696_v4 }
 0xc89   : > { %v11741_v5 = vpop.f32.mrf.mxu1  ;;  %11744 = vmatprep.subr.mxu0 %v12826_v0 }
 0xc8a   : > { %11745 = vmatpush3.msra.mxu0 %v2585_v53  ;;  %v12868_v53 = vmov 85  }
 0xc8b   : > { %11746 = vmatprep.subr.mxu0 %v12826_v0  ;;  %12634 = vset.pattern.permute.xlu0 %v12868_v53 }
 0xc8c   : > { %11747 = vmatpush3.msra.mxu0 %v2503_v2  ;;  %3327 = vperm.xlu0 %12634, %v13477_v59  }
 0xc8d   : > { %11749 = vmatmul.mubr.msk.f32.vlgmr.msra.gmra.mxu0 %vm1467_vm10, %v2705_v11  ;;  %11751 = vmatprep.subr.mxu0 %v12826_v0  ;;  %v3558_v11 = vpop.permute.xlu1 %3557 }
 0xc8e   : > { %11755 = vmatprep.mubr.msk.f32.mxu0 %vm12828_vm1, %v12826_v0  ;;  %11752 = vmatpush3.msk.msra.mxu0 %vm2792_vm13, %v2786_v8 }
 0xc8f   : > { %11753 = vmatprep.subr.mxu0 %v12826_v0 }
 0xc90   : > { %11754 = vmatpush3.msra.mxu0 %v2784_v13  ;;  %3483 = vrot.lane.b32.xlu0 %v13595_v39, %s12869_s23  ;;  %s12888_s23 = smov 13  }
 0xc91   : > { %11765 = vmatprep.subr.mxu0 %v12826_v0 }
 0xd4d   : > { %v2774_v18 = vpop.f32.mrf.mxu0 }
 0xd4e   : > { %v2775_v19 = vadd.f32 %v2774_v18, %v2702_v12  ;;  %v3328_v12 = vpop.permute.xlu0 %3327 }
 0xd4f   : > { %v11750_v20 = vpop.f32.mrf.mxu0 }
 0xd50   : > { %v2778_v21 = vmax.f32 %v2775_v19, 0.0 }
 0xd52   : > { %11756 = vmatmul.mubr.msk.f32.vlgmr.msra.gmra.mxu0 %vm2788_vm14, %v2778_v21  ;;  %11763 = vmatmul.mubr.msk.f32.vlgmr.msra.gmra.mxu1 %vm2788_vm14, %v2778_v21  ;;  %v3484_v8 = vpop.permute.xlu0 %3483 }
 0xd53   : > { %11766 = vmatpush3.msk.msra.mxu0 %vm2792_vm13, %v2945_v10  ;;  %11769 = vmatprep.mubr.msk.f32.mxu0 %vm12828_vm1, %v12826_v0  ;;  %v12870_v10 = vmov 110  }
 0xd54   : > { %11767 = vmatprep.subr.mxu0 %v12826_v0  ;;  %11778 = vmatprep.mubr.msk.f32.mxu1 %vm12828_vm1, %v12826_v0 }
 0xd55   : > { %11768 = vmatpush3.msra.mxu0 %v2943_v24  ;;  %12635 = vset.pattern.permute.xlu0 %v12870_v10 }
 0xd56   : > { %11770 = vmatmul.mubr.msk.f32.vlgmr.msra.gmra.mxu0 %vm2788_vm14, %v2778_v21  ;;  %11781 = vmatprep.subr.mxu0 %v12826_v0 }
 0xd57   : > { %11783 = vmatprep.mubr.msk.f32.mxu0 %vm12828_vm1, %v12826_v0  ;;  %11782 = vmatpush3.msk.msra.mxu0 %vm2792_vm13, %v13719_v28 }
 0xd58   : > { %11791 = vmatprep.subr.mxu0 %v12826_v0  ;;  %3632 = vperm.xlu0 %12635, %v13477_v59  }
 0xe12   : > { %v2861_v33 = vpop.f32.mrf.mxu0  ;;  %v2938_v34 = vpop.f32.mrf.mxu1 }
 0xe14   : > { %v11757_v35 = vpop.f32.mrf.mxu0  ;;  %v11764_v37 = vpop.f32.mrf.mxu1 }
 0xe16   : > { %v3015_v38 = vpop.f32.mrf.mxu0 }
 0xe17   : > { %11773 = vmatpush3.msra.mxu1 %v3015_v38 }
 0xe18   : > { %v11771_v30 = vpop.f32.mrf.mxu0  ;;  %11774 = vmatprep.subr.mxu1 %v12826_v0 }
 0xe19   : > { %11775 = vmatpush3.msra.mxu1 %v2938_v34  ;;  %v3633_v34 = vpop.permute.xlu0 %3632 }
 0xe1a   : > { %11776 = vmatprep.subr.mxu1 %v12826_v0 }
 0xe1b   : > { %11777 = vmatpush3.msra.mxu1 %v2861_v33  ;;  %v3636_v33 = vpop.permute.xlu1 %3635 }
 0xe1c   : > { %11779 = vmatmul.mubr.msk.f32.vlgmr.msra.gmra.mxu1 %vm1467_vm10, %v3024_v25  ;;  %11786 = vmatprep.subr.mxu1 %v12826_v0 }
 0xe1d   : > { %11788 = vmatprep.mubr.msk.f32.mxu1 %vm12828_vm1, %v12826_v0  ;;  %11787 = vmatpush3.msk.msra.mxu1 %vm2792_vm13, %v13730_v41 }
 0xe1e   : > { %11796 = vmatprep.subr.mxu1 %v12826_v0 }
 0xe1f   : > { %v3932_v59 = vpop.permute.xlu1 %3931 }
 0xe23   : > { %v3934_v35 = vpop.permute.xlu1 %3933 }
 0xedc   : > { %v3093_v47 = vpop.f32.mrf.mxu1 }
 0xedd   : > { %v3094_v48 = vadd.f32 %v3093_v47, %v3021_v42  ;;  %v13790_v47 = vpop.permute.xlu1 %4010 }
 0xede   : > { %v11780_v49 = vpop.f32.mrf.mxu1 }
 0xedf   : > { %v3097_v51 = vmax.f32 %v3094_v48, 0.0  ;;  %v12871_v48 = vmov 7  }
 0xee0   : > { %12636 = vset.pattern.permute.xlu0 %v12871_v48  ;;  %v12875_v48 = vmov 57  }
 0xee1   : > { %11784 = vmatmul.mubr.msk.f32.vlgmr.msra.gmra.mxu0 %vm3102_vm15, %v3097_v51  ;;  %11789 = vmatmul.mubr.msk.f32.vlgmr.msra.gmra.mxu1 %vm3102_vm15, %v3097_v51 }
 0xee2   : > { %11792 = vmatpush3.msk.msra.mxu0 %vm2792_vm13, %v13735_v46  ;;  %11793 = vmatprep.mubr.msk.f32.mxu0 %vm12828_vm1, %v12826_v0 }
 0xee3   : > { %11802 = vmatprep.mubr.msk.f32.mxu1 %vm12828_vm1, %v12826_v0  ;;  %11805 = vmatprep.subr.mxu0 %v12826_v0 }
 0xee4   : > { %3927 = vperm.xlu0 %12636, %v13603_v40  }
 0xee5   : > { %11794 = vmatmul.mubr.msk.f32.vlgmr.msra.gmra.mxu0 %vm3102_vm15, %v3097_v51 }
 0xee6   : > { %11806 = vmatpush3.msk.msra.mxu0 %vm691_vm4, %v3407_v52  ;;  %11807 = vmatprep.mubr.msk.f32.mxu0 %vm12828_vm1, %v12826_v0 }
 0xee7   : > { %11810 = vmatprep.subr.mxu0 %v12826_v0 }
 0xee8   : > { %4087 = vrot.lane.b32.xlu0 %v13595_v39, %s12872_s27  ;;  %s12889_s27 = smov 114  }
 0xf5f   : > { %v3928_v39 = vpop.permute.xlu0 %3927 }
 0xfa1   : > { %v3174_v54 = vpop.f32.mrf.mxu0  ;;  %v3248_v1 = vpop.f32.mrf.mxu1 }
 0xfa3   : > { %v11785_v2 = vpop.f32.mrf.mxu0  ;;  %v11790_v3 = vpop.f32.mrf.mxu1 }
 0xfa4   : > { %v13808_v2 = vpop.permute.xlu1 %4161 }
 0xfa5   : > { %v3322_v4 = vpop.f32.mrf.mxu0 }
 0xfa6   : > { %11797 = vmatpush3.msra.mxu1 %v3322_v4 }
 0xfa7   : > { %v11795_v5 = vpop.f32.mrf.mxu0  ;;  %11798 = vmatprep.subr.mxu1 %v12826_v0 }
 0xfa8   : > { %11799 = vmatpush3.msra.mxu1 %v3248_v1  ;;  %v3936_v1 = vsel %vm3935_vm0, %v3932_v59, %v3934_v35  ;;  %v4240_v3 = vpop.permute.xlu1 %4239  ;;  %vm4945_vm0 = vcmask 252928  }
 0xfa9   : > { %11800 = vmatprep.subr.mxu1 %v12826_v0 }
 0xfaa   : > { %11801 = vmatpush3.msra.mxu1 %v3174_v54 }
 0xfab   : > { %11803 = vmatmul.mubr.msk.f32.vlgmr.msra.gmra.mxu1 %vm1467_vm10, %v3331_v50  ;;  %11815 = vmatprep.subr.mxu1 %v12826_v0 }
 0xfac   : > { %11816 = vmatpush3.msk.msra.mxu1 %vm691_vm4, %v3558_v11  ;;  %11817 = vmatprep.mubr.msk.f32.mxu1 %vm12828_vm1, %v12826_v0 }
 0xfad   : > { %11829 = vmatprep.subr.mxu1 %v12826_v0 }
0x106b   : > { %v3400_v13 = vpop.f32.mrf.mxu1 }
0x106c   : > { %v13761_v6 = vadd.f32 %v3400_v13, %v3328_v12  ;;  %v13818_v13 = vpop.permute.xlu0 %4087 }
0x106d   : > { %v11804_v9 = vpop.f32.mrf.mxu1 }
0x106e   : > { %11808 = vmatmul.mubr.msk.f32.vlgmr.msra.gmra.mxu0 %vm688_vm5, %v13761_v6  ;;  %11818 = vmatmul.mubr.msk.f32.vlgmr.msra.gmra.mxu1 %vm688_vm5, %v13761_v6 }
0x106f   : > { %11830 = vmatpush3.msk.msra.mxu1 %vm691_vm4, %v3407_v52  ;;  %11811 = vmatpush3.msk.msra.mxu0 %vm691_vm4, %v3484_v8 }
0x1070   : > { %11812 = vmatprep.mubr.msk.f32.mxu0 %vm12828_vm1, %v12826_v0  ;;  %11820 = vmatprep.subr.mxu0 %v12826_v0 }
0x1071   : > { %11831 = vmatprep.mubr.msk.f32.mxu1 %vm12828_vm1, %v12826_v0  ;;  %11834 = vmatprep.subr.mxu1 %v12826_v0 }
0x1072   : > { %11813 = vmatmul.mubr.msk.f32.vlgmr.msra.gmra.mxu0 %vm688_vm5, %v13761_v6 }
0x1073   : > { %11826 = vmatprep.mubr.msk.f32.mxu0 %vm12828_vm1, %v12826_v0 }
0x112e   : > { %v3479_v18 = vpop.f32.mrf.mxu0  ;;  %v3627_v19 = vpop.f32.mrf.mxu1 }
0x112f   : > { %11821 = vmatpush3.msra.mxu0 %v3627_v19 }
0x1130   : > { %v11809_v20 = vpop.f32.mrf.mxu0  ;;  %v11819_v21 = vpop.f32.mrf.mxu1  ;;  %11822 = vmatprep.subr.mxu0 %v12826_v0 }
0x1132   : > { %v3553_v24 = vpop.f32.mrf.mxu0 }
0x1133   : > { %11823 = vmatpush3.msra.mxu0 %v3553_v24 }
0x1134   : > { %v11814_v25 = vpop.f32.mrf.mxu0  ;;  %11824 = vmatprep.subr.mxu0 %v12826_v0 }
0x1135   : > { %11825 = vmatpush3.msra.mxu0 %v3479_v18 }
0x1136   : > { %11827 = vmatmul.mubr.msk.f32.vlgmr.msra.gmra.mxu0 %vm1467_vm10, %v3636_v33  ;;  %11839 = vmatprep.subr.mxu0 %v12826_v0 }
0x1137   : > { %11840 = vmatpush3.msk.msra.mxu0 %vm691_vm4, %v3558_v11  ;;  %11841 = vmatprep.mubr.msk.f32.mxu0 %vm12828_vm1, %v12826_v0 }
0x1138   : > { %11853 = vmatprep.subr.mxu0 %v12826_v0 }
0x11f6   : > { %v3705_v37 = vpop.f32.mrf.mxu0 }
0x11f7   : > { %v3706_v38 = vadd.f32 %v3705_v37, %v3633_v34 }
0x11f8   : > { %v11828_v30 = vpop.f32.mrf.mxu0 }
0x11f9   : > { %v3709_v42 = vmax.f32 %v3706_v38, 0.0 }
0x11fb   : > { %11832 = vmatmul.mubr.msk.f32.vlgmr.msra.gmra.mxu1 %vm688_vm5, %v3709_v42  ;;  %11842 = vmatmul.mubr.msk.f32.vlgmr.msra.gmra.mxu0 %vm688_vm5, %v3709_v42 }
0x11fc   : > { %11835 = vmatpush3.msk.msra.mxu1 %vm691_vm4, %v3484_v8  ;;  %11836 = vmatprep.mubr.msk.f32.mxu1 %vm12828_vm1, %v12826_v0  ;;  %v4315_v8 = vpop.permute.xlu1 %4314 }
0x11fd   : > { %11844 = vmatprep.subr.mxu1 %v12826_v0  ;;  %11854 = vmatpush3.msk.msra.mxu0 %vm691_vm4, %v13790_v47 }
0x11fe   : > { %11855 = vmatprep.mubr.msk.f32.mxu0 %vm12828_vm1, %v12826_v0  ;;  %11858 = vmatprep.subr.mxu0 %v12826_v0 }
0x11ff   : > { %11837 = vmatmul.mubr.msk.f32.vlgmr.msra.gmra.mxu1 %vm688_vm5, %v3709_v42 }
0x1200   : > { %11850 = vmatprep.mubr.msk.f32.mxu1 %vm12828_vm1, %v12826_v0  ;;  %v4466_v24 = vpop.permute.xlu1 %4465 }
0x12bb   : > { %v3779_v49 = vpop.f32.mrf.mxu1  ;;  %v3919_v50 = vpop.f32.mrf.mxu0 }
0x12bc   : > { %11845 = vmatpush3.msra.mxu1 %v3919_v50 }
0x12bd   : > { %v11833_v51 = vpop.f32.mrf.mxu1  ;;  %v11843_v52 = vpop.f32.mrf.mxu0  ;;  %11846 = vmatprep.subr.mxu1 %v12826_v0 }
0x12bf   : > { %v3849_v53 = vpop.f32.mrf.mxu1 }
0x12c0   : > { %11847 = vmatpush3.msra.mxu1 %v3849_v53 }
0x12c1   : > { %v11838_v54 = vpop.f32.mrf.mxu1  ;;  %11848 = vmatprep.subr.mxu1 %v12826_v0 }
0x12c2   : > { %11849 = vmatpush3.msra.mxu1 %v3779_v49 }
0x12c3   : > { %11851 = vmatmul.mubr.msk.f32.vlgmr.msra.gmra.mxu1 %vm1467_vm10, %v3936_v1  ;;  %11863 = vmatprep.subr.mxu1 %v12826_v0 }
0x12c4   : > { %11864 = vmatpush3.msk.msra.mxu1 %vm691_vm4, %v13808_v2  ;;  %11865 = vmatprep.mubr.msk.f32.mxu1 %vm12828_vm1, %v12826_v0 }
0x12c5   : > { %11877 = vmatprep.subr.mxu1 %v12826_v0 }
0x1383   : > { %v4005_v4 = vpop.f32.mrf.mxu1 }
0x1384   : > { %v4006_v5 = vadd.f32 %v4005_v4, %v3928_v39 }
0x1385   : > { %v11852_v11 = vpop.f32.mrf.mxu1 }
0x1386   : > { %v4009_v12 = vadd.f32 %v4006_v5, %v13761_v6  ;;  %v12873_v6 = vmov 32  }
0x1387   : > { %12637 = vset.pattern.permute.xlu0 %v12873_v6 }
0x1388   : > { %11856 = vmatmul.mubr.msk.f32.vlgmr.msra.gmra.mxu0 %vm688_vm5, %v4009_v12  ;;  %11866 = vmatmul.mubr.msk.f32.vlgmr.msra.gmra.mxu1 %vm688_vm5, %v4009_v12 }
0x1389   : > { %11859 = vmatpush3.msk.msra.mxu0 %vm691_vm4, %v13818_v13  ;;  %11860 = vmatprep.mubr.msk.f32.mxu0 %vm12828_vm1, %v12826_v0 }
0x138a   : > { %11868 = vmatprep.subr.mxu0 %v12826_v0  ;;  %11878 = vmatpush3.msk.msra.mxu1 %vm2792_vm13, %v4315_v8 }
0x138b   : > { %11879 = vmatprep.mubr.msk.f32.mxu1 %vm12828_vm1, %v12826_v0  ;;  %11882 = vmatprep.subr.mxu1 %v12826_v0 }
0x138c   : > { %11861 = vmatmul.mubr.msk.f32.vlgmr.msra.gmra.mxu0 %vm688_vm5, %v4009_v12  ;;  %4236 = vperm.xlu0 %12637, %v13603_v40  }
0x138d   : > { %11874 = vmatprep.mubr.msk.f32.mxu0 %vm12828_vm1, %v12826_v0 }
0x1390   : > { %4391 = vrot.lane.b32.xlu0 %v13591_v31, %s12874_s29  ;;  %v4544_v31 = vpop.permute.xlu1 %4543  ;;  %s12893_s29 = smov 109  }
0x1391   : > { %12638 = vset.pattern.permute.xlu0 %v12875_v48 }
0x1394   : > { %v4631_v25 = vpop.permute.xlu1 %4630  ;;  %4540 = vperm.xlu0 %12638, %v13603_v40  }
0x1398   : > { %v4633_v37 = vpop.permute.xlu1 %4632  ;;  %4626 = vrot.lane.b32.xlu0 %v13497_v63, %s12862_s11  ;;  %s12883_s11 = smov 37  }
0x1399   : > { %v4636_v42 = vsel %vm4634_vm2, %v4631_v25, %v4633_v37 }
0x139c   : > { %4792 = vrot.lane.b32.xlu0 %v13620_v43, %s12856_s30  ;;  %v4629_v63 = vpop.permute.xlu1 %4628 }
0x13a0   : > { %4790 = vrot.lane.b32.xlu0 %v13624_v44, %s12856_s30  ;;  %s12876_s30 = smov 70   ;;  %v4716_v12 = vpop.permute.xlu1 %4715 }
0x13a4   : > { %4871 = vrot.lane.b32.xlu0 %v13603_v40, %s12876_s30  ;;  %s12894_s30 = smov 100  }
0x1407   : > { %v4237_v33 = vpop.permute.xlu0 %4236 }
0x140b   : > { %v4392_v30 = vpop.permute.xlu0 %4391 }
0x140f   : > { %v4541_v54 = vpop.permute.xlu0 %4540 }
0x1413   : > { %v4627_v39 = vpop.permute.xlu0 %4626 }
0x1417   : > { %v4793_v4 = vpop.permute.xlu0 %4792 }
0x141b   : > { %v4791_v5 = vpop.permute.xlu0 %4790 }
0x1448   : > { %v4083_v9 = vpop.f32.mrf.mxu0  ;;  %v4231_v10 = vpop.f32.mrf.mxu1 }
0x1449   : > { %11869 = vmatpush3.msra.mxu0 %v4231_v10  ;;  %v4714_v10 = vpop.permute.xlu1 %4713 }
0x144a   : > { %v11857_v18 = vpop.f32.mrf.mxu0  ;;  %v11867_v19 = vpop.f32.mrf.mxu1  ;;  %11870 = vmatprep.subr.mxu0 %v12826_v0 }
0x144c   : > { %v4157_v20 = vpop.f32.mrf.mxu0 }
0x144d   : > { %11871 = vmatpush3.msra.mxu0 %v4157_v20  ;;  %v4872_v20 = vpop.permute.xlu0 %4871 }
0x144e   : > { %v11862_v21 = vpop.f32.mrf.mxu0  ;;  %11872 = vmatprep.subr.mxu0 %v12826_v0 }
0x144f   : > { %11873 = vmatpush3.msra.mxu0 %v4083_v9 }
0x1450   : > { %11875 = vmatmul.mubr.msk.f32.vlgmr.msra.gmra.mxu0 %vm1467_vm10, %v4240_v3  ;;  %11887 = vmatprep.subr.mxu0 %v12826_v0  ;;  %v4635_v3 = vsel %vm4634_vm2, %v4627_v39, %v4629_v63  ;;  %vm5800_vm2 = vcmask 39936  }
0x1451   : > { %11888 = vmatpush3.msk.msra.mxu0 %vm2792_vm13, %v4466_v24  ;;  %11889 = vmatprep.mubr.msk.f32.mxu0 %vm12828_vm1, %v12826_v0 }
0x1452   : > { %11901 = vmatprep.subr.mxu0 %v12826_v0 }
0x1510   : > { %v4309_v59 = vpop.f32.mrf.mxu0 }
0x1511   : > { %v4310_v34 = vadd.f32 %v4309_v59, %v4237_v33 }
0x1512   : > { %v11876_v35 = vpop.f32.mrf.mxu0 }
0x1513   : > { %v4313_v38 = vmax.f32 %v4310_v34, 0.0 }
0x1515   : > { %11880 = vmatmul.mubr.msk.f32.vlgmr.msra.gmra.mxu1 %vm3102_vm15, %v4313_v38  ;;  %11890 = vmatmul.mubr.msk.f32.vlgmr.msra.gmra.mxu0 %vm3102_vm15, %v4313_v38 }
0x1516   : > { %11883 = vmatpush3.msk.msra.mxu1 %vm2792_vm13, %v4392_v30  ;;  %11884 = vmatprep.mubr.msk.f32.mxu1 %vm12828_vm1, %v12826_v0 }
0x1517   : > { %11892 = vmatprep.subr.mxu1 %v12826_v0  ;;  %11902 = vmatpush3.msk.msra.mxu0 %vm2792_vm13, %v4636_v42 }
0x1518   : > { %11903 = vmatprep.subr.mxu0 %v12826_v0  ;;  %11905 = vmatprep.mubr.msk.f32.mxu0 %vm12828_vm1, %v12826_v0 }
0x1519   : > { %11885 = vmatmul.mubr.msk.f32.vlgmr.msra.gmra.mxu1 %vm3102_vm15, %v4313_v38  ;;  %11904 = vmatpush3.msra.mxu0 %v4635_v3  ;;  %v12881_v38 = vmov 116  }
0x151a   : > { %11898 = vmatprep.mubr.msk.f32.mxu1 %vm12828_vm1, %v12826_v0  ;;  %11908 = vmatprep.subr.mxu0 %v12826_v0 }
0x15d5   : > { %v4387_v49 = vpop.f32.mrf.mxu1  ;;  %v4535_v50 = vpop.f32.mrf.mxu0 }
0x15d6   : > { %11893 = vmatpush3.msra.mxu1 %v4535_v50 }
0x15d7   : > { %v11881_v51 = vpop.f32.mrf.mxu1  ;;  %v11891_v52 = vpop.f32.mrf.mxu0  ;;  %11894 = vmatprep.subr.mxu1 %v12826_v0 }
0x15d9   : > { %v4461_v53 = vpop.f32.mrf.mxu1 }
0x15da   : > { %11895 = vmatpush3.msra.mxu1 %v4461_v53 }
0x15db   : > { %v11886_v1 = vpop.f32.mrf.mxu1  ;;  %11896 = vmatprep.subr.mxu1 %v12826_v0 }
0x15dc   : > { %11897 = vmatpush3.msra.mxu1 %v4387_v49  ;;  %v13962_v1 = vld [vmem:[#allocation6 + $0x20] sm:$0xff] }
0x15dd   : > { %11899 = vmatmul.mubr.msk.f32.vlgmr.msra.gmra.mxu1 %vm1467_vm10, %v4544_v31  ;;  %11915 = vmatprep.subr.mxu1 %v12826_v0 }
0x15de   : > { %11919 = vmatprep.mubr.msk.f32.mxu1 %vm12828_vm1, %v12826_v0  ;;  %11916 = vmatpush3.msk.msra.mxu1 %vm2792_vm13, %v4793_v4 }
0x15df   : > { %11917 = vmatprep.subr.mxu1 %v12826_v0 }
0x15e0   : > { %11918 = vmatpush3.msra.mxu1 %v4791_v5 }
0x15e1   : > { %11931 = vmatprep.subr.mxu1 %v12826_v0 }
0x169d   : > { %v4613_v11 = vpop.f32.mrf.mxu1 }
0x169e   : > { %v4614_v8 = vadd.f32 %v4613_v11, %v4541_v54 }
0x169f   : > { %v11900_v6 = vpop.f32.mrf.mxu1 }
0x16a0   : > { %v4617_v9 = vmax.f32 %v4614_v8, 0.0  ;;  %v13982_v8 = vld [vmem:[#allocation7 + $0x28] sm:$0xff] }
0x16a2   : > { %11906 = vmatmul.mubr.msk.f32.vlgmr.msra.gmra.mxu0 %vm2788_vm14, %v4617_v9  ;;  %11920 = vmatmul.mubr.msk.f32.vlgmr.msra.gmra.mxu1 %vm2788_vm14, %v4617_v9 }
0x16a3   : > { %11909 = vmatpush3.msk.msra.mxu0 %vm2792_vm13, %v4716_v12  ;;  %11932 = vmatpush3.msra.mxu1 %v13529_v14  ;;  %v12877_v14 = vmov 82  }
0x16a4   : > { %11933 = vmatprep.subr.mxu1 %v12826_v0  ;;  %11910 = vmatprep.subr.mxu0 %v12826_v0 }
0x16a5   : > { %11934 = vmatpush3.msra.mxu1 %v13531_v15  ;;  %11911 = vmatpush3.msra.mxu0 %v4714_v10 }
0x16a6   : > { %11912 = vmatprep.mubr.msk.f32.mxu0 %vm12828_vm1, %v12826_v0  ;;  %11935 = vmatprep.subr.mxu1 %v12826_v0 }
0x16a7   : > { %11913 = vmatmul.mubr.msk.f32.vlgmr.msra.gmra.mxu0 %vm2788_vm14, %v4617_v9  ;;  %11936 = vmatpush3.msra.mxu1 %v13533_v16 }
0x16a8   : > { %11937 = vmatprep.subr.mxu1 %v12826_v0  ;;  %11922 = vmatprep.subr.mxu0 %v12826_v0 }
0x16a9   : > { %11938 = vmatpush3.msra.mxu1 %v13535_v17  ;;  %11928 = vmatprep.mubr.msk.f32.mxu0 %vm12828_vm1, %v12826_v0 }
0x16aa   : > { %11939 = vmatprep.mubr.msk.f32.mxu1 %vm12828_vm1, %v12826_v0  ;;  %11953 = vmatprep.subr.mxu1 %v12826_v0 }
0x16ab   : > { %12640 = vset.pattern.permute.xlu0 %v12877_v14 }
0x16ac   : > { %4868 = vperm.xlu0 %12640, %v13603_v40  }
0x16b0   : > { %5245 = vrot.lane.b32.xlu0 %v13603_v40, %s12880_s5  ;;  %s12898_s5 = smov 16  }
0x16b4   : > { %5323 = vrot.lane.b32.xlu0 %v13620_v43, %s12878_s24 }
0x16b8   : > { %5480 = vrot.lane.b32.xlu0 %v13620_v43, %s12882_s6 }
0x16bc   : > { %5478 = vrot.lane.b32.xlu0 %v13624_v44, %s12882_s6  ;;  %s12901_s6 = smov 71  }
0x16c0   : > { %5563 = vrot.lane.b32.xlu0 %v13603_v40, %s12884_s13 }
0x1727   : > { %v4869_v31 = vpop.permute.xlu0 %4868 }
0x172b   : > { %v5246_v51 = vpop.permute.xlu0 %5245 }
0x172f   : > { %v5324_v53 = vpop.permute.xlu0 %5323 }
0x1733   : > { %v5481_v4 = vpop.permute.xlu0 %5480 }
0x1737   : > { %v5479_v12 = vpop.permute.xlu0 %5478 }
0x1762   : > { %v4709_v15 = vpop.f32.mrf.mxu0  ;;  %v4863_v16 = vpop.f32.mrf.mxu1 }
0x1763   : > { %11923 = vmatpush3.msra.mxu0 %v4863_v16  ;;  %v5564_v16 = vpop.permute.xlu0 %5563 }
0x1764   : > { %v11907_v18 = vpop.f32.mrf.mxu0  ;;  %v11921_v19 = vpop.f32.mrf.mxu1  ;;  %11924 = vmatprep.subr.mxu0 %v12826_v0 }
0x1767   : > { %v4786_v17 = vpop.f32.mrf.mxu0 }
0x1768   : > { %11925 = vmatpush3.msra.mxu0 %v4786_v17 }
0x1769   : > { %v11914_v21 = vpop.f32.mrf.mxu0  ;;  %11926 = vmatprep.subr.mxu0 %v12826_v0 }
0x176a   : > { %11927 = vmatpush3.msra.mxu0 %v4709_v15 }
0x176b   : > { %11929 = vmatmul.mubr.msk.f32.vlgmr.msra.gmra.mxu0 %vm1467_vm10, %v4872_v20  ;;  %11942 = vmatprep.subr.mxu0 %v12826_v0 }
0x176c   : > { %11943 = vmatpush3.msra.mxu0 %v13545_v23  ;;  %11950 = vmatprep.mubr.msk.f32.mxu0 %vm12828_vm1, %v12826_v0  ;;  %v2343_v23 = vpop.permute.xlu1 %2342 }
0x176d   : > { %11944 = vmatprep.subr.mxu0 %v12826_v0  ;;  %v2421_v24 = vadd.f32 %v13690_v61, %v2343_v23 }
0x176e   : > { %11945 = vmatpush3.msra.mxu0 %v13553_v36 }
0x176f   : > { %11946 = vmatprep.subr.mxu0 %v12826_v0  ;;  %v2424_v33 = vadd.f32 %v2421_v24, %v13443_v57  ;;  %v12879_v57 = vmov 107  }
0x1770   : > { %11947 = vmatpush3.msra.mxu0 %v13576_v26  ;;  %12641 = vset.pattern.permute.xlu1 %v12879_v57  ;;  %v5167_v37 = vpop.permute.xlu1 %5166 }
0x1771   : > { %11948 = vmatprep.subr.mxu0 %v12826_v0  ;;  %5163 = vperm.xlu1 %12641, %v13603_v40  }
0x1772   : > { %11949 = vmatpush3.msra.mxu0 %v13580_v27 }
0x1773   : > { %11964 = vmatprep.subr.mxu0 %v12826_v0 }
0x1775   : > { %12642 = vset.pattern.permute.xlu1 %v12881_v38 }
0x1776   : > { %5242 = vperm.xlu1 %12642, %v13603_v40   ;;  %v12885_v40 = vmov 13  }
0x1777   : > { %12643 = vset.pattern.permute.xlu0 %v12885_v40  ;;  %v14108_v40 = vld [vmem:[#allocation7 + $0x28] sm:$0x7] }
0x1778   : > { %5559 = vperm.xlu0 %12643, %v13962_v1  }
0x177a   : > { %5321 = vrot.lane.b32.xlu1 %v13624_v44, %s12878_s24  ;;  %s12895_s24 = smov 105  }
0x177b   : > { %12644 = vset.pattern.permute.xlu1 %v12836_v7 }
0x177c   : > { %5798 = vrot.lane.b32.xlu0 %v13982_v8, %s12887_s15 }
0x177e   : > { %5403 = vrot.lane.b32.xlu1 %v13620_v43, %s12883_s11 }
0x1780   : > { %5877 = vrot.lane.b32.xlu0 %v13962_v1, %s12889_s27  ;;  %s12915_s27 = smov 52  }
0x1782   : > { %5401 = vrot.lane.b32.xlu1 %v13624_v44, %s12883_s11  ;;  %s12905_s11 = smov 103  }
0x1784   : > { %6169 = vrot.lane.b32.xlu0 %v13962_v1, %s12838_s9  ;;  %s12891_s9 = smov 118  }
0x1786   : > { %5565 = vrot.lane.b32.xlu1 %v13962_v1, %s12884_s13 }
0x1788   : > { %6461 = vrot.lane.b32.xlu0 %v13962_v1, %s12827_s20  ;;  %s12890_s20 = smov 125  }
0x178a   : > { %5643 = vrot.lane.b32.xlu1 %v13624_v44, %s12886_s14  ;;  %s12906_s14 = smov 83  }
0x178c   : > { %6828 = vrot.lane.b32.xlu0 %v13982_v8, %s12890_s20 }
0x178e   : > { %5796 = vrot.lane.b32.xlu1 %v13624_v44, %s12887_s15  ;;  %s12907_s15 = smov 58  }
0x1790   : > { %6753 = vrot.lane.b32.xlu0 %v13962_v1, %s12841_s10 }
0x1792   : > { %5719 = vrot.lane.b32.xlu1 %v13624_v44, %s12888_s23  ;;  %s12911_s23 = smov 119  }
0x1796   : > { %5874 = vperm.xlu1 %12644, %v13962_v1  }
0x179a   : > { %12645 = vset.pattern.permute.xlu1 %v12839_v32 }
0x179b   : > { %6166 = vperm.xlu1 %12645, %v13962_v1  }
0x179f   : > { %12646 = vset.pattern.permute.xlu1 %v12840_v45 }
0x17a0   : > { %6458 = vperm.xlu1 %12646, %v13962_v1  }
0x17a4   : > { %6901 = vrot.lane.b32.xlu1 %v13982_v8, %s12891_s9  ;;  %s12919_s9 = smov 31  }
0x17a8   : > { %6982 = vrot.lane.b32.xlu1 %v13962_v1, %s12843_s18 }
0x17ec   : > { %v5164_v30 = vpop.permute.xlu1 %5163 }
0x17f1   : > { %v5243_v7 = vpop.permute.xlu1 %5242 }
0x17f3   : > { %v5560_v20 = vpop.permute.xlu0 %5559 }
0x17f5   : > { %v5322_v52 = vpop.permute.xlu1 %5321 }
0x17f7   : > { %v5799_v21 = vpop.permute.xlu0 %5798 }
0x17f9   : > { %v5404_v43 = vpop.permute.xlu1 %5403 }
0x17fb   : > { %v5878_v57 = vpop.permute.xlu0 %5877 }
0x17fd   : > { %v5402_v54 = vpop.permute.xlu1 %5401 }
0x1801   : > { %v5566_v6 = vpop.permute.xlu1 %5565 }
0x1805   : > { %v13992_v9 = vpop.permute.xlu1 %5643 }
0x1809   : > { %v5797_v19 = vpop.permute.xlu1 %5796 }
0x180d   : > { %v14012_v17 = vpop.permute.xlu1 %5719 }
0x182b   : > { %v4941_v25 = vpop.f32.mrf.mxu0 }
0x182c   : > { %v4942_v36 = vadd.f32 %v4941_v25, %v4869_v31  ;;  %v14023_v31 = vsel %vm5800_vm2, %v5797_v19, %v5799_v21  ;;  %v14152_v21 = vld [vmem:[#allocation7 + $0x118] sm:$0xff] }
0x182d   : > { %v11930_v26 = vpop.f32.mrf.mxu0 }
0x182e   : > { %v4946_v59 = vsel %vm4945_vm0, %v4942_v36, 0.0 }
0x182f   : > { %v4947_v34 = vmul.f32 %v4946_v59, %v2424_v33 }
0x1831   : > { %v4948_v27 = vadd.f32 %v4947_v34, %v13349_v29 }
0x1833   : > { %11940 = vmatmul.mubr.msk.f32.vlgmr.msra.gmra.mxu1 %vm1219_vm9, %v4948_v27  ;;  %11951 = vmatmul.mubr.msk.f32.vlgmr.msra.gmra.mxu0 %vm1219_vm9, %v4948_v27 }
0x1834   : > { %11954 = vmatpush3.msra.mxu1 %v13652_v55  ;;  %11961 = vmatprep.mubr.msk.f32.mxu1 %vm12828_vm1, %v12826_v0 }
0x1835   : > { %11955 = vmatprep.subr.mxu1 %v12826_v0  ;;  %11970 = vmatprep.mubr.msk.f32.mxu0 %vm12828_vm1, %v12826_v0 }
0x1836   : > { %11956 = vmatpush3.msra.mxu1 %v13663_v56 }
0x1837   : > { %11957 = vmatprep.subr.mxu1 %v12826_v0 }
0x1838   : > { %11958 = vmatpush3.msra.mxu1 %v13670_v22 }
0x1839   : > { %11959 = vmatprep.subr.mxu1 %v12826_v0 }
0x183a   : > { %11960 = vmatpush3.msra.mxu1 %v13677_v60 }
0x183b   : > { %11962 = vmatmul.mubr.msk.f32.vlgmr.msra.gmra.mxu1 %vm1219_vm9, %v4948_v27  ;;  %11973 = vmatprep.subr.mxu1 %v12826_v0 }
0x183c   : > { %11975 = vmatprep.mubr.msk.f32.mxu1 %vm12828_vm1, %v12826_v0 }
0x18f3   : > { %v5018_v55 = vpop.f32.mrf.mxu1  ;;  %v5088_v56 = vpop.f32.mrf.mxu0 }
0x18f5   : > { %v11941_v22 = vpop.f32.mrf.mxu1  ;;  %v11952_v60 = vpop.f32.mrf.mxu0 }
0x18fb   : > { %v5158_v61 = vpop.f32.mrf.mxu1 }
0x18fc   : > { %11965 = vmatpush3.msra.mxu0 %v5158_v61 }
0x18fd   : > { %v11963_v35 = vpop.f32.mrf.mxu1  ;;  %11966 = vmatprep.subr.mxu0 %v12826_v0 }
0x18fe   : > { %11967 = vmatpush3.msra.mxu0 %v5088_v56 }
0x18ff   : > { %11968 = vmatprep.subr.mxu0 %v12826_v0 }
0x1900   : > { %11969 = vmatpush3.msra.mxu0 %v5018_v55  ;;  %v5875_v55 = vpop.permute.xlu1 %5874 }
0x1901   : > { %11971 = vmatmul.mubr.msk.f32.vlgmr.msra.gmra.mxu0 %vm1467_vm10, %v5167_v37  ;;  %11978 = vmatprep.subr.mxu0 %v12826_v0 }
0x1902   : > { %11982 = vmatprep.mubr.msk.f32.mxu0 %vm12828_vm1, %v12826_v0  ;;  %11979 = vmatpush3.msk.msra.mxu0 %vm2792_vm13, %v5324_v53 }
0x1903   : > { %11980 = vmatprep.subr.mxu0 %v12826_v0 }
0x1904   : > { %11981 = vmatpush3.msra.mxu0 %v5322_v52 }
0x1905   : > { %11992 = vmatprep.subr.mxu0 %v12826_v0 }
0x19c1   : > { %v5236_v42 = vpop.f32.mrf.mxu0 }
0x19c2   : > { %v5237_v48 = vadd.f32 %v5236_v42, %v5164_v30 }
0x19c3   : > { %v11972_v49 = vpop.f32.mrf.mxu0 }
0x19c4   : > { %v5240_v50 = vmul.f32 %v5237_v48, %v5237_v48 }
0x19c6   : > { %11974 = vmatpush3.msra.mxu1 %v5240_v50  ;;  %v6167_v50 = vpop.permute.xlu1 %6166 }
0x19c7   : > { %11976 = vmatmul.mubr.msk.f32.vlgmr.msra.gmra.mxu1 %vm772_vm6, %v5246_v51  ;;  %11985 = vmatprep.subr.mxu1 %v12826_v0 }
0x19c8   : > { %11989 = vmatprep.mubr.msk.f32.mxu1 %vm12828_vm1, %v12826_v0  ;;  %11986 = vmatpush3.msk.msra.mxu1 %vm2792_vm13, %v5404_v43 }
0x19c9   : > { %11987 = vmatprep.subr.mxu1 %v12826_v0 }
0x19ca   : > { %11988 = vmatpush3.msra.mxu1 %v5402_v54 }
0x19cb   : > { %11999 = vmatprep.subr.mxu1 %v12826_v0 }
0x1a87   : > { %v5315_v63 = vpop.f32.mrf.mxu1 }
0x1a88   : > { %v5316_v39 = vadd.f32 %v5315_v63, %v5243_v7 }
0x1a89   : > { %v11977_v3 = vpop.f32.mrf.mxu1 }
0x1a8a   : > { %12664 = vrsqrt.f32 %v5316_v39 }
0x1a97   : > { %v12665_v5 = vpop.eup %12664 }
0x1a98   : > { %v5320_v11 = vmul.f32 %v12665_v5, %v5237_v48  ;;  %v6170_v48 = vpop.permute.xlu0 %6169 }
0x1a9a   : > { %11983 = vmatmul.mubr.msk.f32.vlgmr.msra.gmra.mxu0 %vm2788_vm14, %v5320_v11  ;;  %11990 = vmatmul.mubr.msk.f32.vlgmr.msra.gmra.mxu1 %vm2788_vm14, %v5320_v11 }
0x1a9b   : > { %11993 = vmatpush3.msk.msra.mxu0 %vm2792_vm13, %v5481_v4  ;;  %11996 = vmatprep.mubr.msk.f32.mxu0 %vm12828_vm1, %v12826_v0 }
0x1a9c   : > { %11994 = vmatprep.subr.mxu0 %v12826_v0  ;;  %12005 = vmatprep.mubr.msk.f32.mxu1 %vm12828_vm1, %v12826_v0  ;;  %v6462_v4 = vpop.permute.xlu0 %6461 }
0x1a9d   : > { %11995 = vmatpush3.msra.mxu0 %v5479_v12  ;;  %v12892_v12 = vmov 69  }
0x1a9e   : > { %11997 = vmatmul.mubr.msk.f32.vlgmr.msra.gmra.mxu0 %vm2788_vm14, %v5320_v11  ;;  %12008 = vmatprep.subr.mxu0 %v12826_v0  ;;  %vm5567_vm14 = vcmask 89088   ;;  %v14103_v11 = vld [vmem:[#allocation6 + $0x28] sm:$0xff] }
0x1a9f   : > { %12010 = vmatprep.mubr.msk.f32.mxu0 %vm12828_vm1, %v12826_v0  ;;  %12009 = vmatpush3.msra.mxu0 %v13992_v9  ;;  %v5568_v18 = vsel %vm5567_vm14, %v5564_v16, %v5566_v6  ;;  %v14112_v6 = vld [vmem:[#allocation7 + $0x28] sm:$0x3] }
0x1aa0   : > { %12018 = vmatprep.subr.mxu0 %v12826_v0  ;;  %6984 = vrot.lane.b32.xlu0 %v14103_v11, %s12843_s18  ;;  %s12897_s18 = smov 33  }
0x1aa1   : > { %12650 = vset.pattern.permute.xlu0 %v12892_v12 }
0x1aa4   : > { %7277 = vrot.lane.b32.xlu0 %v14103_v11, %s12890_s20  ;;  %s12916_s20 = smov 77  }
0x1aa8   : > { %7431 = vrot.lane.b32.xlu0 %v14108_v40, %s12893_s29 }
0x1aac   : > { %7509 = vrot.lane.b32.xlu0 %v14103_v11, %s12894_s30 }
0x1ab0   : > { %7585 = vrot.lane.b32.xlu0 %v14112_v6, %s12863_s28 }
0x1ab4   : > { %7662 = vrot.lane.b32.xlu0 %v14112_v6, %s12895_s24 }
0x1ab8   : > { %7811 = vperm.xlu0 %12650, %v14103_v11  }
0x1abc   : > { %8181 = vrot.lane.b32.xlu0 %v14112_v6, %s12864_s12  ;;  %s12900_s12 = smov 63  }
0x1ac0   : > { %8336 = vrot.lane.b32.xlu0 %v14103_v11, %s12897_s18 }
0x1ac4   : > { %8632 = vrot.lane.b32.xlu0 %v14103_v11, %s12898_s5 }
0x1b5a   : > { %v13996_v10 = vpop.f32.mrf.mxu0  ;;  %v13998_v44 = vpop.f32.mrf.mxu1 }
0x1b5c   : > { %v11984_v14 = vpop.f32.mrf.mxu0  ;;  %v11991_v15 = vpop.f32.mrf.mxu1 }
0x1b5d   : > { %v14123_v14 = vld [vmem:[#allocation6 + $0x30] sm:$0xff]  ;;  %v6459_v15 = vpop.permute.xlu1 %6458 }
0x1b5e   : > { %v14000_v32 = vpop.f32.mrf.mxu0 }
0x1b5f   : > { %12000 = vmatpush3.msra.mxu1 %v14000_v32 }
0x1b60   : > { %v11998_v45 = vpop.f32.mrf.mxu0  ;;  %12001 = vmatprep.subr.mxu1 %v12826_v0 }
0x1b61   : > { %12002 = vmatpush3.msra.mxu1 %v13998_v44 }
0x1b62   : > { %12003 = vmatprep.subr.mxu1 %v12826_v0 }
0x1b63   : > { %12004 = vmatpush3.msra.mxu1 %v13996_v10 }
0x1b64   : > { %12006 = vmatmul.mubr.msk.f32.vlgmr.msra.gmra.mxu1 %vm1467_vm10, %v5568_v18  ;;  %12013 = vmatprep.subr.mxu1 %v12826_v0 }
0x1b65   : > { %12015 = vmatprep.mubr.msk.f32.mxu1 %vm12828_vm1, %v12826_v0  ;;  %12014 = vmatpush3.msra.mxu1 %v14012_v17 }
0x1b66   : > { %12023 = vmatprep.subr.mxu1 %v12826_v0 }
0x1c24   : > { %v5637_v23 = vpop.f32.mrf.mxu1 }
0x1c25   : > { %v14021_v24 = vadd.f32 %v5637_v23, %v5560_v20  ;;  %v6829_v20 = vpop.permute.xlu0 %6828  ;;  %v14156_v23 = vld [vmem:[#allocation7 + $0xb8] sm:$0xff] }
0x1c26   : > { %v12007_v25 = vpop.f32.mrf.mxu1 }
0x1c27   : > { %12011 = vmatmul.mubr.msk.f32.vlgmr.msra.gmra.mxu0 %vm772_vm6, %v14021_v24  ;;  %12016 = vmatmul.mubr.msk.f32.vlgmr.msra.gmra.mxu1 %vm772_vm6, %v14021_v24  ;;  %v14166_v25 = vld [vmem:[#allocation7 + $0x148] sm:$0xff] }
0x1c28   : > { %12019 = vmatpush3.msra.mxu0 %v14023_v31  ;;  %12020 = vmatprep.mubr.msk.f32.mxu0 %vm12828_vm1, %v12826_v0 }
0x1c29   : > { %12032 = vmatprep.subr.mxu0 %v12826_v0  ;;  %12029 = vmatprep.mubr.msk.f32.mxu1 %vm12828_vm1, %v12826_v0 }
0x1c2b   : > { %12021 = vmatmul.mubr.msk.f32.vlgmr.msra.gmra.mxu0 %vm772_vm6, %v14021_v24 }
0x1c2c   : > { %12033 = vmatpush3.msra.mxu0 %v13992_v9  ;;  %12034 = vmatprep.mubr.msk.f32.mxu0 %vm12828_vm1, %v12826_v0 }
0x1c2d   : > { %12037 = vmatprep.subr.mxu0 %v12826_v0 }
0x1ce7   : > { %v5715_v36 = vpop.f32.mrf.mxu0  ;;  %v5788_v33 = vpop.f32.mrf.mxu1 }
0x1ce9   : > { %v12012_v26 = vpop.f32.mrf.mxu0  ;;  %v12017_v59 = vpop.f32.mrf.mxu1 }
0x1cea   : > { %v6754_v26 = vpop.permute.xlu0 %6753 }
0x1ceb   : > { %v5869_v34 = vpop.f32.mrf.mxu0 }
0x1cec   : > { %12024 = vmatpush3.msra.mxu1 %v5869_v34 }
0x1ced   : > { %v12022_v27 = vpop.f32.mrf.mxu0  ;;  %12025 = vmatprep.subr.mxu1 %v12826_v0 }
0x1cee   : > { %12026 = vmatpush3.msra.mxu1 %v5788_v33  ;;  %v14174_v33 = vld [vmem:[#allocation7 + $0x88] sm:$0xff] }
0x1cef   : > { %12027 = vmatprep.subr.mxu1 %v12826_v0 }
0x1cf0   : > { %12028 = vmatpush3.msra.mxu1 %v5715_v36  ;;  %v14170_v36 = vld [vmem:[#allocation7 + $0xe8] sm:$0xff] }
0x1cf1   : > { %12030 = vmatmul.mubr.msk.f32.vlgmr.msra.gmra.mxu1 %vm1467_vm10, %v5878_v57  ;;  %12042 = vmatprep.subr.mxu1 %v12826_v0 }
0x1cf2   : > { %12043 = vmatpush3.msra.mxu1 %v14023_v31  ;;  %12044 = vmatprep.mubr.msk.f32.mxu1 %vm12828_vm1, %v12826_v0 }
0x1cf3   : > { %12056 = vmatprep.subr.mxu1 %v12826_v0 }
0x1db1   : > { %v5947_v56 = vpop.f32.mrf.mxu1 }
0x1db2   : > { %v5948_v22 = vadd.f32 %v5947_v56, %v5875_v55 }
0x1db3   : > { %v12031_v60 = vpop.f32.mrf.mxu1 }
0x1db4   : > { %v5951_v61 = vmax.f32 %v5948_v22, 0.0  ;;  %v6985_v22 = vpop.permute.xlu0 %6984 }
0x1db6   : > { %12035 = vmatmul.mubr.msk.f32.vlgmr.msra.gmra.mxu0 %vm772_vm6, %v5951_v61  ;;  %12045 = vmatmul.mubr.msk.f32.vlgmr.msra.gmra.mxu1 %vm772_vm6, %v5951_v61 }
0x1db7   : > { %12038 = vmatpush3.msra.mxu0 %v14012_v17  ;;  %12057 = vmatpush3.msra.mxu1 %v13992_v9 }
0x1db8   : > { %12039 = vmatprep.mubr.msk.f32.mxu0 %vm12828_vm1, %v12826_v0  ;;  %12047 = vmatprep.subr.mxu0 %v12826_v0 }
0x1db9   : > { %12058 = vmatprep.mubr.msk.f32.mxu1 %vm12828_vm1, %v12826_v0  ;;  %12061 = vmatprep.subr.mxu1 %v12826_v0 }
0x1dba   : > { %12040 = vmatmul.mubr.msk.f32.vlgmr.msra.gmra.mxu0 %vm772_vm6, %v5951_v61 }
0x1dbb   : > { %12053 = vmatprep.mubr.msk.f32.mxu0 %vm12828_vm1, %v12826_v0 }
0x1e76   : > { %v6021_v35 = vpop.f32.mrf.mxu0  ;;  %v6161_v37 = vpop.f32.mrf.mxu1 }
0x1e77   : > { %12048 = vmatpush3.msra.mxu0 %v6161_v37 }
0x1e78   : > { %v12036_v38 = vpop.f32.mrf.mxu0  ;;  %v12046_v30 = vpop.f32.mrf.mxu1  ;;  %12049 = vmatprep.subr.mxu0 %v12826_v0 }
0x1e7a   : > { %v6091_v42 = vpop.f32.mrf.mxu0 }
0x1e7b   : > { %12050 = vmatpush3.msra.mxu0 %v6091_v42 }
0x1e7c   : > { %v12041_v49 = vpop.f32.mrf.mxu0  ;;  %12051 = vmatprep.subr.mxu0 %v12826_v0 }
0x1e7d   : > { %12052 = vmatpush3.msra.mxu0 %v6021_v35 }
0x1e7e   : > { %12054 = vmatmul.mubr.msk.f32.vlgmr.msra.gmra.mxu0 %vm1467_vm10, %v6170_v48  ;;  %12066 = vmatprep.subr.mxu0 %v12826_v0 }
0x1e7f   : > { %12067 = vmatpush3.msra.mxu0 %v14023_v31  ;;  %12068 = vmatprep.mubr.msk.f32.mxu0 %vm12828_vm1, %v12826_v0 }
0x1e80   : > { %12080 = vmatprep.subr.mxu0 %v12826_v0 }
0x1f3e   : > { %v6239_v51 = vpop.f32.mrf.mxu0 }
0x1f3f   : > { %v6240_v7 = vadd.f32 %v6239_v51, %v6167_v50 }
0x1f40   : > { %v12055_v52 = vpop.f32.mrf.mxu0 }
0x1f41   : > { %v14071_v53 = vadd.f32 %v6240_v7, %v14021_v24 }
0x1f43   : > { %12059 = vmatmul.mubr.msk.f32.vlgmr.msra.gmra.mxu1 %vm772_vm6, %v14071_v53  ;;  %12069 = vmatmul.mubr.msk.f32.vlgmr.msra.gmra.mxu0 %vm772_vm6, %v14071_v53 }
0x1f44   : > { %12062 = vmatpush3.msra.mxu1 %v14012_v17  ;;  %12081 = vmatpush3.msra.mxu0 %v13992_v9  ;;  %v12896_v9 = vmov 8  }
0x1f45   : > { %12063 = vmatprep.mubr.msk.f32.mxu1 %vm12828_vm1, %v12826_v0  ;;  %12071 = vmatprep.subr.mxu1 %v12826_v0 }
0x1f46   : > { %12082 = vmatprep.mubr.msk.f32.mxu0 %vm12828_vm1, %v12826_v0  ;;  %12085 = vmatprep.subr.mxu0 %v12826_v0 }
0x1f47   : > { %12064 = vmatmul.mubr.msk.f32.vlgmr.msra.gmra.mxu1 %vm772_vm6, %v14071_v53  ;;  %12653 = vset.pattern.permute.xlu0 %v12896_v9 }
0x1f48   : > { %12077 = vmatprep.mubr.msk.f32.mxu1 %vm12828_vm1, %v12826_v0  ;;  %8628 = vperm.xlu0 %12653, %v14123_v14  }
0x1f4c   : > { %12654 = vset.pattern.permute.xlu0 %v12842_v58  ;;  %v6902_v58 = vpop.permute.xlu1 %6901 }
0x1f50   : > { %v6983_v60 = vpop.permute.xlu1 %6982 }
0x1f51   : > { %v6986_v37 = vsel %vm2350_vm11, %v6983_v60, %v6985_v22 }
0x2003   : > { %v6313_v43 = vpop.f32.mrf.mxu1  ;;  %v6453_v54 = vpop.f32.mrf.mxu0 }
0x2004   : > { %12072 = vmatpush3.msra.mxu1 %v6453_v54 }
0x2005   : > { %v12060_v63 = vpop.f32.mrf.mxu1  ;;  %v12070_v39 = vpop.f32.mrf.mxu0  ;;  %12073 = vmatprep.subr.mxu1 %v12826_v0 }
0x2006   : > { %v7278_v63 = vpop.permute.xlu0 %7277 }
0x2007   : > { %v6383_v3 = vpop.f32.mrf.mxu1 }
0x2008   : > { %12074 = vmatpush3.msra.mxu1 %v6383_v3 }
0x2009   : > { %v12065_v5 = vpop.f32.mrf.mxu1  ;;  %12075 = vmatprep.subr.mxu1 %v12826_v0 }
0x200a   : > { %12076 = vmatpush3.msra.mxu1 %v6313_v43 }
0x200b   : > { %12078 = vmatmul.mubr.msk.f32.vlgmr.msra.gmra.mxu1 %vm1467_vm10, %v6462_v4  ;;  %12090 = vmatprep.subr.mxu1 %v12826_v0  ;;  %v7432_v4 = vpop.permute.xlu0 %7431 }
0x200c   : > { %12091 = vmatpush3.msra.mxu1 %v14023_v31  ;;  %12092 = vmatprep.mubr.msk.f32.mxu1 %vm12828_vm1, %v12826_v0  ;;  %v14160_v31 = vld [vmem:[#allocation7 + $0x58] sm:$0xff] }
0x200d   : > { %12104 = vmatprep.subr.mxu1 %v12826_v0 }
0x20cb   : > { %v6531_v16 = vpop.f32.mrf.mxu1 }
0x20cc   : > { %v6532_v45 = vadd.f32 %v6531_v16, %v6459_v15 }
0x20cd   : > { %v12079_v18 = vpop.f32.mrf.mxu1 }
0x20ce   : > { %v6535_v19 = vmax.f32 %v6532_v45, 0.0 }
0x20d0   : > { %12083 = vmatmul.mubr.msk.f32.vlgmr.msra.gmra.mxu0 %vm772_vm6, %v6535_v19  ;;  %12093 = vmatmul.mubr.msk.f32.vlgmr.msra.gmra.mxu1 %vm772_vm6, %v6535_v19 }
0x20d1   : > { %12086 = vmatpush3.msra.mxu0 %v14012_v17  ;;  %12087 = vmatprep.mubr.msk.f32.mxu0 %vm12828_vm1, %v12826_v0  ;;  %v8950_v17 = vld [vmem:[#allocation7 + $0x178] sm:$0xff] }
0x20d2   : > { %12105 = vmatpush3.msra.mxu1 %v6829_v20  ;;  %12106 = vmatprep.mubr.msk.f32.mxu1 %vm12828_vm1, %v12826_v0 }
0x20d3   : > { %12109 = vmatprep.subr.mxu1 %v12826_v0  ;;  %12095 = vmatprep.subr.mxu0 %v12826_v0 }
0x20d4   : > { %12088 = vmatmul.mubr.msk.f32.vlgmr.msra.gmra.mxu0 %vm772_vm6, %v6535_v19  ;;  %12107 = vmatmul.mubr.msk.f32.vlgmr.msra.gmra.mxu1 %vm772_vm6, %v14021_v24  ;;  %v12904_v19 = vmov 44  }
0x20d5   : > { %12110 = vmatpush3.msra.mxu1 %v6902_v58  ;;  %12111 = vmatprep.mubr.msk.f32.mxu1 %vm12828_vm1, %v12826_v0 }
0x20d6   : > { %12121 = vmatprep.subr.mxu1 %v12826_v0  ;;  %12101 = vmatprep.mubr.msk.f32.mxu0 %vm12828_vm1, %v12826_v0 }
0x20d7   : > { %8973 = vrot.lane.b32.xlu0 %v8950_v17, %s12852_s25 }
0x20d8   : > { %12112 = vmatmul.mubr.msk.f32.vlgmr.msra.gmra.mxu1 %vm772_vm6, %v14021_v24 }
0x20d9   : > { %12122 = vmatpush3.msk.msra.mxu1 %vm2792_vm13, %v13719_v28  ;;  %12123 = vmatprep.mubr.msk.f32.mxu1 %vm12828_vm1, %v12826_v0  ;;  %v12899_v28 = vmov 2  }
0x20da   : > { %12131 = vmatprep.subr.mxu1 %v12826_v0  ;;  %12647 = vset.pattern.permute.xlu1 %v12899_v28 }
0x20db   : > { %8969 = vrot.lane.b32.xlu0 %v14152_v21, %s12852_s25  ;;  %6978 = vperm.xlu1 %12647, %v14103_v11  }
0x20df   : > { %8965 = vrot.lane.b32.xlu0 %v14156_v23, %s12852_s25 }
0x20e3   : > { %8961 = vrot.lane.b32.xlu0 %v14160_v31, %s12852_s25 }
0x20e7   : > { %9161 = vrot.lane.b32.xlu0 %v8950_v17, %s12900_s12 }
0x20eb   : > { %9067 = vrot.lane.b32.xlu0 %v8950_v17, %s12901_s6 }
0x20ef   : > { %9065 = vrot.lane.b32.xlu0 %v14166_v25, %s12901_s6 }
0x20f3   : > { %9063 = vrot.lane.b32.xlu0 %v14152_v21, %s12901_s6 }
0x20f7   : > { %9061 = vrot.lane.b32.xlu0 %v14170_v36, %s12901_s6 }
0x20fb   : > { %9059 = vrot.lane.b32.xlu0 %v14156_v23, %s12901_s6 }
0x20ff   : > { %9057 = vrot.lane.b32.xlu0 %v14174_v33, %s12901_s6 }
0x2103   : > { %9055 = vrot.lane.b32.xlu0 %v14160_v31, %s12901_s6 }
0x2107   : > { %9053 = vrot.lane.b32.xlu0 %v13982_v8, %s12901_s6 }
0x210b   : > { %9333 = vrot.lane.b32.xlu0 %v14156_v23, %s12859_s21 }
0x210f   : > { %9329 = vrot.lane.b32.xlu0 %v14160_v31, %s12859_s21 }
0x2113   : > { %9497 = vrot.lane.b32.xlu0 %v14156_v23, %s12841_s10 }
0x2117   : > { %9495 = vrot.lane.b32.xlu0 %v14174_v33, %s12841_s10 }
0x211b   : > { %9493 = vrot.lane.b32.xlu0 %v14160_v31, %s12841_s10 }
0x211f   : > { %9491 = vrot.lane.b32.xlu0 %v13982_v8, %s12841_s10  ;;  %s12903_s10 = smov 111  }
0x2123   : > { %6750 = vperm.xlu0 %12654, %v13962_v1  }
0x2156   : > { %v6979_v48 = vpop.permute.xlu1 %6978 }
0x2190   : > { %v6605_v59 = vpop.f32.mrf.mxu0  ;;  %v6745_v34 = vpop.f32.mrf.mxu1 }
0x2191   : > { %12096 = vmatpush3.msra.mxu0 %v6745_v34 }
0x2192   : > { %v12084_v27 = vpop.f32.mrf.mxu0  ;;  %v12094_v57 = vpop.f32.mrf.mxu1  ;;  %12097 = vmatprep.subr.mxu0 %v12826_v0 }
0x2194   : > { %v6675_v55 = vpop.f32.mrf.mxu0  ;;  %v6897_v56 = vpop.f32.mrf.mxu1 }
0x2195   : > { %12098 = vmatpush3.msra.mxu0 %v6675_v55 }
0x2196   : > { %v12089_v61 = vpop.f32.mrf.mxu0  ;;  %12099 = vmatprep.subr.mxu0 %v12826_v0  ;;  %v12108_v35 = vpop.f32.mrf.mxu1 }
0x2197   : > { %12100 = vmatpush3.msra.mxu0 %v6605_v59 }
0x2198   : > { %12102 = vmatmul.mubr.msk.f32.vlgmr.msra.gmra.mxu0 %vm1467_vm10, %v6754_v26  ;;  %v6970_v1 = vpop.f32.mrf.mxu1  ;;  %12114 = vmatprep.subr.mxu0 %v12826_v0 }
0x2199   : > { %12115 = vmatpush3.msra.mxu0 %v6970_v1  ;;  %12118 = vmatprep.mubr.msk.f32.mxu0 %vm12828_vm1, %v12826_v0 }
0x219a   : > { %v12113_v38 = vpop.f32.mrf.mxu1  ;;  %12116 = vmatprep.subr.mxu0 %v12826_v0 }
0x219b   : > { %12117 = vmatpush3.msra.mxu0 %v6897_v56 }
0x219c   : > { %12119 = vmatmul.mubr.msk.f32.vlgmr.msra.gmra.mxu0 %vm1061_vm8, %v6986_v37  ;;  %12126 = vmatprep.subr.mxu0 %v12826_v0 }
0x219d   : > { %12127 = vmatpush3.msk.msra.mxu0 %vm2792_vm13, %v13730_v41  ;;  %12128 = vmatprep.mubr.msk.f32.mxu0 %vm12828_vm1, %v12826_v0  ;;  %v12902_v41 = vmov 27  }
0x219e   : > { %12136 = vmatprep.subr.mxu0 %v12826_v0  ;;  %12648 = vset.pattern.permute.xlu1 %v12902_v41 }
0x219f   : > { %7274 = vperm.xlu1 %12648, %v14103_v11  }
0x21a3   : > { %7354 = vrot.lane.b32.xlu1 %v14108_v40, %s12903_s10  ;;  %v7510_v40 = vpop.permute.xlu0 %7509 }
0x21a4   : > { %12649 = vset.pattern.permute.xlu1 %v12904_v19 }
0x21a7   : > { %v7586_v18 = vpop.permute.xlu0 %7585  ;;  %7506 = vperm.xlu1 %12649, %v14103_v11  }
0x21ab   : > { %7736 = vrot.lane.b32.xlu1 %v14112_v6, %s12905_s11  ;;  %v7663_v26 = vpop.permute.xlu0 %7662 }
0x21af   : > { %7814 = vrot.lane.b32.xlu1 %v14103_v11, %s12906_s14  ;;  %v7812_v38 = vpop.permute.xlu0 %7811 }
0x21b3   : > { %8106 = vrot.lane.b32.xlu1 %v14103_v11, %s12907_s15 }
0x221a   : > { %v7275_v5 = vpop.permute.xlu1 %7274 }
0x221e   : > { %v7355_v12 = vpop.permute.xlu1 %7354 }
0x2222   : > { %v7507_v59 = vpop.permute.xlu1 %7506 }
0x2226   : > { %v7737_v57 = vpop.permute.xlu1 %7736 }
0x222a   : > { %v7815_v37 = vpop.permute.xlu1 %7814 }
0x2258   : > { %v14207_v30 = vpop.f32.mrf.mxu0 }
0x225a   : > { %v12103_v42 = vpop.f32.mrf.mxu0 }
0x225c   : > { %v7055_v49 = vpop.f32.mrf.mxu0 }
0x225d   : > { %v7056_v50 = vadd.f32 %v7055_v49, %v6979_v48 }
0x225e   : > { %v12120_v51 = vpop.f32.mrf.mxu0 }
0x225f   : > { %v7059_v7 = vmax.f32 %v7056_v50, 0.0  ;;  %v8182_v51 = vpop.permute.xlu0 %8181 }
0x2261   : > { %12124 = vmatmul.mubr.msk.f32.vlgmr.msra.gmra.mxu1 %vm3102_vm15, %v7059_v7  ;;  %12129 = vmatmul.mubr.msk.f32.vlgmr.msra.gmra.mxu0 %vm3102_vm15, %v7059_v7 }
0x2262   : > { %12132 = vmatpush3.msk.msra.mxu1 %vm2792_vm13, %v13735_v46  ;;  %12133 = vmatprep.mubr.msk.f32.mxu1 %vm12828_vm1, %v12826_v0 }
0x2263   : > { %12142 = vmatprep.mubr.msk.f32.mxu0 %vm12828_vm1, %v12826_v0  ;;  %12145 = vmatprep.subr.mxu1 %v12826_v0 }
0x2265   : > { %12134 = vmatmul.mubr.msk.f32.vlgmr.msra.gmra.mxu1 %vm3102_vm15, %v7059_v7  ;;  %v12908_v7 = vmov 94  }
0x2266   : > { %12147 = vmatprep.mubr.msk.f32.mxu1 %vm12828_vm1, %v12826_v0  ;;  %12146 = vmatpush3.msk.msra.mxu1 %vm691_vm4, %v7355_v12 }
0x2267   : > { %12155 = vmatprep.subr.mxu1 %v12826_v0  ;;  %12651 = vset.pattern.permute.xlu1 %v12908_v7 }
0x2268   : > { %8103 = vperm.xlu1 %12651, %v14103_v11  }
0x226c   : > { %8258 = vrot.lane.b32.xlu1 %v14112_v6, %s12835_s7  ;;  %s12910_s7 = smov 87  }
0x2321   : > { %v7129_v46 = vpop.f32.mrf.mxu1  ;;  %v7199_v52 = vpop.f32.mrf.mxu0 }
0x2323   : > { %v12125_v43 = vpop.f32.mrf.mxu1  ;;  %v12130_v54 = vpop.f32.mrf.mxu0 }
0x2325   : > { %v7269_v39 = vpop.f32.mrf.mxu1 }
0x2326   : > { %12137 = vmatpush3.msra.mxu0 %v7269_v39  ;;  %v8107_v39 = vpop.permute.xlu1 %8106 }
0x2327   : > { %v12135_v3 = vpop.f32.mrf.mxu1  ;;  %12138 = vmatprep.subr.mxu0 %v12826_v0 }
0x2328   : > { %12139 = vmatpush3.msra.mxu0 %v7199_v52 }
0x2329   : > { %12140 = vmatprep.subr.mxu0 %v12826_v0 }
0x232a   : > { %12141 = vmatpush3.msra.mxu0 %v7129_v46  ;;  %v8104_v6 = vpop.permute.xlu1 %8103 }
0x232b   : > { %12143 = vmatmul.mubr.msk.f32.vlgmr.msra.gmra.mxu0 %vm1467_vm10, %v7278_v63  ;;  %12150 = vmatprep.subr.mxu0 %v12826_v0 }
0x232c   : > { %12151 = vmatpush3.msk.msra.mxu0 %vm691_vm4, %v7432_v4  ;;  %12152 = vmatprep.mubr.msk.f32.mxu0 %vm12828_vm1, %v12826_v0 }
0x232d   : > { %12162 = vmatprep.subr.mxu0 %v12826_v0 }
0x23eb   : > { %v7347_v9 = vpop.f32.mrf.mxu0 }
0x23ec   : > { %v7348_v15 = vadd.f32 %v7347_v9, %v7275_v5  ;;  %v12909_v9 = vmov 111  }
0x23ed   : > { %v12144_v16 = vpop.f32.mrf.mxu0  ;;  %12652 = vset.pattern.permute.xlu1 %v12909_v9 }
0x23ee   : > { %v7351_v45 = vmax.f32 %v7348_v15, 0.0  ;;  %8333 = vperm.xlu1 %12652, %v14103_v11  }
0x23f0   : > { %12148 = vmatmul.mubr.msk.f32.vlgmr.msra.gmra.mxu1 %vm688_vm5, %v7351_v45  ;;  %12153 = vmatmul.mubr.msk.f32.vlgmr.msra.gmra.mxu0 %vm688_vm5, %v7351_v45 }
0x23f1   : > { %12159 = vmatprep.mubr.msk.f32.mxu1 %vm12828_vm1, %v12826_v0  ;;  %12163 = vmatpush3.msk.msra.mxu0 %vm680_vm3, %v7586_v18 }
0x23f2   : > { %12164 = vmatprep.mubr.msk.f32.mxu0 %vm12828_vm1, %v12826_v0  ;;  %12172 = vmatprep.subr.mxu0 %v12826_v0 }
0x23f3   : > { %8634 = vrot.lane.b32.xlu1 %v14123_v14, %s12898_s5 }
0x24b0   : > { %v7427_v20 = vpop.f32.mrf.mxu1  ;;  %v7501_v58 = vpop.f32.mrf.mxu0 }
0x24b1   : > { %12156 = vmatpush3.msra.mxu1 %v7501_v58 }
0x24b2   : > { %v12149_v17 = vpop.f32.mrf.mxu1  ;;  %v12154_v28 = vpop.f32.mrf.mxu0  ;;  %12157 = vmatprep.subr.mxu1 %v12826_v0 }
0x24b3   : > { %12158 = vmatpush3.msra.mxu1 %v7427_v20 }
0x24b4   : > { %12160 = vmatmul.mubr.msk.f32.vlgmr.msra.gmra.mxu1 %vm1061_vm8, %v7510_v40  ;;  %12167 = vmatprep.subr.mxu1 %v12826_v0  ;;  %v8259_v40 = vpop.permute.xlu1 %8258 }
0x24b5   : > { %12168 = vmatpush3.msk.msra.mxu1 %vm680_vm3, %v7663_v26  ;;  %12169 = vmatprep.mubr.msk.f32.mxu1 %vm12828_vm1, %v12826_v0 }
0x24b6   : > { %12177 = vmatprep.subr.mxu1 %v12826_v0 }
0x24b8   : > { %v8334_v11 = vpop.permute.xlu1 %8333 }
0x2574   : > { %v7579_v34 = vpop.f32.mrf.mxu1 }
0x2575   : > { %v14251_v27 = vadd.f32 %v7579_v34, %v7507_v59 }
0x2576   : > { %v12161_v55 = vpop.f32.mrf.mxu1 }
0x2577   : > { %12165 = vmatmul.mubr.msk.f32.vlgmr.msra.gmra.mxu0 %vm2621_vm12, %v14251_v27  ;;  %12170 = vmatmul.mubr.msk.f32.vlgmr.msra.gmra.mxu1 %vm2621_vm12, %v14251_v27 }
0x2578   : > { %12173 = vmatpush3.msk.msra.mxu0 %vm680_vm3, %v7737_v57  ;;  %12174 = vmatprep.mubr.msk.f32.mxu0 %vm12828_vm1, %v12826_v0 }
0x2579   : > { %12186 = vmatprep.subr.mxu0 %v12826_v0  ;;  %12183 = vmatprep.mubr.msk.f32.mxu1 %vm12828_vm1, %v12826_v0 }
0x257b   : > { %12175 = vmatmul.mubr.msk.f32.vlgmr.msra.gmra.mxu0 %vm2621_vm12, %v14251_v27 }
0x257c   : > { %12187 = vmatpush3.msk.msra.mxu0 %vm680_vm3, %v7586_v18  ;;  %12188 = vmatprep.mubr.msk.f32.mxu0 %vm12828_vm1, %v12826_v0 }
0x257d   : > { %12196 = vmatprep.subr.mxu0 %v12826_v0 }
0x2637   : > { %v7658_v56 = vpop.f32.mrf.mxu0  ;;  %v7732_v22 = vpop.f32.mrf.mxu1 }
0x2639   : > { %v12166_v60 = vpop.f32.mrf.mxu0  ;;  %v12171_v61 = vpop.f32.mrf.mxu1 }
0x263b   : > { %v7806_v35 = vpop.f32.mrf.mxu0 }
0x263c   : > { %12178 = vmatpush3.msra.mxu1 %v7806_v35 }
0x263d   : > { %v12176_v1 = vpop.f32.mrf.mxu0  ;;  %12179 = vmatprep.subr.mxu1 %v12826_v0 }
0x263e   : > { %12180 = vmatpush3.msra.mxu1 %v7732_v22 }
0x263f   : > { %12181 = vmatprep.subr.mxu1 %v12826_v0 }
0x2640   : > { %12182 = vmatpush3.msra.mxu1 %v7658_v56 }
0x2641   : > { %12184 = vmatmul.mubr.msk.f32.vlgmr.msra.gmra.mxu1 %vm1467_vm10, %v7815_v37  ;;  %12191 = vmatprep.subr.mxu1 %v12826_v0 }
0x2642   : > { %12192 = vmatpush3.msk.msra.mxu1 %vm680_vm3, %v7663_v26  ;;  %12193 = vmatprep.mubr.msk.f32.mxu1 %vm12828_vm1, %v12826_v0 }
0x2643   : > { %12201 = vmatprep.subr.mxu1 %v12826_v0 }
0x2701   : > { %v7884_v42 = vpop.f32.mrf.mxu1 }
0x2702   : > { %v7885_v48 = vadd.f32 %v7884_v42, %v7812_v38 }
0x2703   : > { %v12185_v49 = vpop.f32.mrf.mxu1 }
0x2704   : > { %v7888_v50 = vmax.f32 %v7885_v48, 0.0 }
0x2706   : > { %12189 = vmatmul.mubr.msk.f32.vlgmr.msra.gmra.mxu0 %vm2621_vm12, %v7888_v50  ;;  %12194 = vmatmul.mubr.msk.f32.vlgmr.msra.gmra.mxu1 %vm2621_vm12, %v7888_v50 }
0x2707   : > { %12197 = vmatpush3.msk.msra.mxu0 %vm680_vm3, %v7737_v57  ;;  %12198 = vmatprep.mubr.msk.f32.mxu0 %vm12828_vm1, %v12826_v0 }
0x2708   : > { %12207 = vmatprep.mubr.msk.f32.mxu1 %vm12828_vm1, %v12826_v0  ;;  %12210 = vmatprep.subr.mxu0 %v12826_v0 }
0x270a   : > { %12199 = vmatmul.mubr.msk.f32.vlgmr.msra.gmra.mxu0 %vm2621_vm12, %v7888_v50 }
0x270b   : > { %12211 = vmatpush3.msk.msra.mxu0 %vm680_vm3, %v8182_v51  ;;  %12212 = vmatprep.mubr.msk.f32.mxu0 %vm12828_vm1, %v12826_v0 }
0x270c   : > { %12215 = vmatprep.subr.mxu0 %v12826_v0 }
0x27c6   : > { %v7958_v41 = vpop.f32.mrf.mxu0  ;;  %v8028_v46 = vpop.f32.mrf.mxu1 }
0x27c8   : > { %v12190_v52 = vpop.f32.mrf.mxu0  ;;  %v12195_v43 = vpop.f32.mrf.mxu1 }
0x27ca   : > { %v8098_v54 = vpop.f32.mrf.mxu0 }
0x27cb   : > { %12202 = vmatpush3.msra.mxu1 %v8098_v54 }
0x27cc   : > { %v12200_v63 = vpop.f32.mrf.mxu0  ;;  %12203 = vmatprep.subr.mxu1 %v12826_v0 }
0x27cd   : > { %12204 = vmatpush3.msra.mxu1 %v8028_v46 }
0x27ce   : > { %12205 = vmatprep.subr.mxu1 %v12826_v0 }
0x27cf   : > { %12206 = vmatpush3.msra.mxu1 %v7958_v41 }
0x27d0   : > { %12208 = vmatmul.mubr.msk.f32.vlgmr.msra.gmra.mxu1 %vm1467_vm10, %v8107_v39  ;;  %12220 = vmatprep.subr.mxu1 %v12826_v0 }
0x27d1   : > { %12224 = vmatprep.mubr.msk.f32.mxu1 %vm12828_vm1, %v12826_v0 }
0x2890   : > { %v8176_v3 = vpop.f32.mrf.mxu1 }
0x2891   : > { %v8177_v4 = vadd.f32 %v8176_v3, %v8104_v6 }
0x2892   : > { %v12209_v5 = vpop.f32.mrf.mxu1 }
0x2893   : > { %v8180_v12 = vadd.f32 %v8177_v4, %v14251_v27 }
0x2895   : > { %12213 = vmatmul.mubr.msk.f32.vlgmr.msra.gmra.mxu0 %vm2621_vm12, %v8180_v12 }
0x2896   : > { %12216 = vmatpush3.msk.msra.mxu0 %vm680_vm3, %v8259_v40  ;;  %12217 = vmatprep.mubr.msk.f32.mxu0 %vm12828_vm1, %v12826_v0 }
0x2897   : > { %12227 = vmatprep.subr.mxu0 %v12826_v0 }
0x2899   : > { %12218 = vmatmul.mubr.msk.f32.vlgmr.msra.gmra.mxu0 %vm2621_vm12, %v8180_v12 }
0x289a   : > { %12228 = vmatpush3.msk.msra.mxu0 %vm691_vm4, %v13790_v47  ;;  %12229 = vmatprep.mubr.msk.f32.mxu0 %vm12828_vm1, %v12826_v0  ;;  %v8337_v47 = vpop.permute.xlu0 %8336 }
0x289b   : > { %12237 = vmatprep.subr.mxu0 %v12826_v0 }
0x289e   : > { %v8633_v27 = vpop.permute.xlu0 %8632 }
0x28a2   : > { %v8629_v55 = vpop.permute.xlu0 %8628 }
0x28a6   : > { %v8974_v56 = vpop.permute.xlu0 %8973 }
0x28aa   : > { %v8970_v22 = vpop.permute.xlu0 %8969 }
0x28ae   : > { %v8966_v60 = vpop.permute.xlu0 %8965 }
0x28b2   : > { %v8962_v61 = vpop.permute.xlu0 %8961 }
0x28b6   : > { %v9162_v35 = vpop.permute.xlu0 %9161 }
0x28ba   : > { %v14370_v1 = vpop.permute.xlu0 %9067 }
0x28be   : > { %v14372_v38 = vpop.permute.xlu0 %9065 }
0x28c2   : > { %v14374_v48 = vpop.permute.xlu0 %9063 }
0x28c6   : > { %v14376_v50 = vpop.permute.xlu0 %9061 }
0x28ca   : > { %v14378_v7 = vpop.permute.xlu0 %9059 }
0x28ce   : > { %v14382_v46 = vpop.permute.xlu0 %9057 }
0x28d2   : > { %v14384_v54 = vpop.permute.xlu0 %9055 }
0x28d6   : > { %v14390_v4 = vpop.permute.xlu0 %9053 }
0x28da   : > { %v14397_v12 = vpop.permute.xlu0 %9333 }
0x28de   : > { %v14402_v9 = vpop.permute.xlu0 %9329 }
0x2955   : > { %v8254_v15 = vpop.f32.mrf.mxu0 }
0x2957   : > { %v12214_v16 = vpop.f32.mrf.mxu0 }
0x2958   : > { %v9498_v16 = vpop.permute.xlu0 %9497 }
0x2959   : > { %v8328_v45 = vpop.f32.mrf.mxu0 }
0x295a   : > { %12221 = vmatpush3.msra.mxu1 %v8328_v45 }
0x295b   : > { %v12219_v18 = vpop.f32.mrf.mxu0  ;;  %12222 = vmatprep.subr.mxu1 %v12826_v0 }
0x295c   : > { %12223 = vmatpush3.msra.mxu1 %v8254_v15  ;;  %v9496_v18 = vpop.permute.xlu0 %9495 }
0x295d   : > { %12225 = vmatmul.mubr.msk.f32.vlgmr.msra.gmra.mxu1 %vm1061_vm8, %v8337_v47  ;;  %12232 = vmatprep.subr.mxu1 %v12826_v0 }
0x295e   : > { %12233 = vmatpush3.msk.msra.mxu1 %vm691_vm4, %v13818_v13  ;;  %12234 = vmatprep.mubr.msk.f32.mxu1 %vm12828_vm1, %v12826_v0  ;;  %v8710_v13 = vld [vmem:[#allocation7 + $0x28] sm:$0x7f] }
0x295f   : > { %12242 = vmatprep.subr.mxu1 %v12826_v0  ;;  %8789 = vrot.lane.b32.xlu1 %v8710_v13, %s12910_s7 }
0x2963   : > { %8712 = vrot.lane.b32.xlu1 %v8710_v13, %s12861_s8  ;;  %s12914_s8 = smov 47  }
0x2967   : > { %8971 = vrot.lane.b32.xlu1 %v14166_v25, %s12852_s25 }
0x296b   : > { %8967 = vrot.lane.b32.xlu1 %v14170_v36, %s12852_s25 }
0x296f   : > { %8963 = vrot.lane.b32.xlu1 %v14174_v33, %s12852_s25 }
0x2973   : > { %8959 = vrot.lane.b32.xlu1 %v13982_v8, %s12852_s25  ;;  %s12912_s25 = smov 102  }
0x2977   : > { %8867 = vrot.lane.b32.xlu1 %v14123_v14, %s12911_s23 }
0x297b   : > { %9159 = vrot.lane.b32.xlu1 %v14166_v25, %s12900_s12 }
0x297f   : > { %9157 = vrot.lane.b32.xlu1 %v14152_v21, %s12900_s12 }
0x2983   : > { %9155 = vrot.lane.b32.xlu1 %v14170_v36, %s12900_s12 }
0x2987   : > { %9153 = vrot.lane.b32.xlu1 %v14156_v23, %s12900_s12 }
0x298b   : > { %9151 = vrot.lane.b32.xlu1 %v14174_v33, %s12900_s12 }
0x298f   : > { %9149 = vrot.lane.b32.xlu1 %v14160_v31, %s12900_s12 }
0x2993   : > { %9147 = vrot.lane.b32.xlu1 %v13982_v8, %s12900_s12 }
0x2997   : > { %9245 = vrot.lane.b32.xlu1 %v14123_v14, %s12912_s25 }
0x299b   : > { %9331 = vrot.lane.b32.xlu1 %v14174_v33, %s12859_s21 }
0x2a1d   : > { %v8406_v19 = vpop.f32.mrf.mxu1 }
0x2a1e   : > { %v8407_v20 = vadd.f32 %v8406_v19, %v8334_v11  ;;  %v9494_v11 = vpop.permute.xlu0 %9493 }
0x2a1f   : > { %v12226_v58 = vpop.f32.mrf.mxu1 }
0x2a20   : > { %v8410_v17 = vmax.f32 %v8407_v20, 0.0  ;;  %v12913_v20 = vmov 25  }
0x2a21   : > { %12655 = vset.pattern.permute.xlu1 %v12913_v20 }
0x2a22   : > { %12230 = vmatmul.mubr.msk.f32.vlgmr.msra.gmra.mxu0 %vm688_vm5, %v8410_v17  ;;  %12235 = vmatmul.mubr.msk.f32.vlgmr.msra.gmra.mxu1 %vm688_vm5, %v8410_v17  ;;  %v9492_v19 = vpop.permute.xlu0 %9491 }
0x2a23   : > { %12238 = vmatpush3.msk.msra.mxu0 %vm691_vm4, %v13808_v2  ;;  %12239 = vmatprep.mubr.msk.f32.mxu0 %vm12828_vm1, %v12826_v0  ;;  %v8635_v2 = vpop.permute.xlu1 %8634 }
0x2a24   : > { %12248 = vmatprep.mubr.msk.f32.mxu1 %vm12828_vm1, %v12826_v0  ;;  %12251 = vmatprep.subr.mxu0 %v12826_v0  ;;  %v8636_v8 = vsel %vm1061_vm8, %v8633_v27, %v8635_v2 }
0x2a26   : > { %12240 = vmatmul.mubr.msk.f32.vlgmr.msra.gmra.mxu0 %vm688_vm5, %v8410_v17 }
0x2a27   : > { %12253 = vmatprep.mubr.msk.f32.mxu0 %vm12828_vm1, %v12826_v0  ;;  %v8790_v25 = vpop.permute.xlu1 %8789 }
0x2a2b   : > { %v8713_v21 = vpop.permute.xlu1 %8712 }
0x2a2c   : > { %12252 = vmatpush3.msk.msra.mxu0 %vm2792_vm13, %v8713_v21 }
0x2a2d   : > { %12261 = vmatprep.subr.mxu0 %v12826_v0 }
0x2a2f   : > { %v8972_v37 = vpop.permute.xlu1 %8971 }
0x2a33   : > { %v8968_v42 = vpop.permute.xlu1 %8967 }
0x2a37   : > { %v8964_v49 = vpop.permute.xlu1 %8963 }
0x2a3b   : > { %v8960_v51 = vpop.permute.xlu1 %8959 }
0x2a3f   : > { %v14380_v41 = vpop.permute.xlu1 %8867 }
0x2a43   : > { %v9160_v52 = vpop.permute.xlu1 %9159 }
0x2a47   : > { %v9158_v3 = vpop.permute.xlu1 %9157 }
0x2a4b   : > { %v9156_v5 = vpop.permute.xlu1 %9155 }
0x2a4f   : > { %v9154_v40 = vpop.permute.xlu1 %9153 }
0x2a53   : > { %v9152_v15 = vpop.permute.xlu1 %9151 }
0x2a57   : > { %v9150_v45 = vpop.permute.xlu1 %9149 }
0x2a5b   : > { %v9148_v47 = vpop.permute.xlu1 %9147 }
0x2a5f   : > { %v9246_v17 = vpop.permute.xlu1 %9245 }
0x2a63   : > { %v9332_v13 = vpop.permute.xlu1 %9331 }
0x2ae2   : > { %v8480_v28 = vpop.f32.mrf.mxu0  ;;  %v8550_v26 = vpop.f32.mrf.mxu1 }
0x2ae4   : > { %v12231_v59 = vpop.f32.mrf.mxu0  ;;  %v12236_v34 = vpop.f32.mrf.mxu1 }
0x2ae6   : > { %v8620_v36 = vpop.f32.mrf.mxu0 }
0x2ae7   : > { %12243 = vmatpush3.msra.mxu1 %v8620_v36 }
0x2ae8   : > { %v12241_v57 = vpop.f32.mrf.mxu0  ;;  %12244 = vmatprep.subr.mxu1 %v12826_v0 }
0x2ae9   : > { %12245 = vmatpush3.msra.mxu1 %v8550_v26 }
0x2aea   : > { %12246 = vmatprep.subr.mxu1 %v12826_v0 }
0x2aeb   : > { %12247 = vmatpush3.msra.mxu1 %v8480_v28 }
0x2aec   : > { %12249 = vmatmul.mubr.msk.f32.vlgmr.msra.gmra.mxu1 %vm1467_vm10, %v8636_v8  ;;  %12256 = vmatprep.subr.mxu1 %v12826_v0 }
0x2aed   : > { %12257 = vmatpush3.msk.msra.mxu1 %vm2792_vm13, %v8790_v25  ;;  %12258 = vmatprep.mubr.msk.f32.mxu1 %vm12828_vm1, %v12826_v0 }
0x2aee   : > { %12268 = vmatprep.subr.mxu1 %v12826_v0 }
0x2bac   : > { %v8705_v43 = vpop.f32.mrf.mxu1 }
0x2bad   : > { %v8706_v63 = vadd.f32 %v8705_v43, %v8629_v55 }
0x2bae   : > { %v12250_v39 = vpop.f32.mrf.mxu1 }
0x2baf   : > { %v8709_v6 = vmax.f32 %v8706_v63, 0.0 }
0x2bb1   : > { %12254 = vmatmul.mubr.msk.f32.vlgmr.msra.gmra.mxu0 %vm3102_vm15, %v8709_v6  ;;  %12259 = vmatmul.mubr.msk.f32.vlgmr.msra.gmra.mxu1 %vm3102_vm15, %v8709_v6 }
0x2bb2   : > { %12269 = vmatpush3.msra.mxu1 %v8974_v56  ;;  %12284 = vmatprep.mubr.msk.f32.mxu1 %vm12828_vm1, %v12826_v0  ;;  %v12918_v56 = vmov 50  }
0x2bb3   : > { %12270 = vmatprep.subr.mxu1 %v12826_v0  ;;  %12265 = vmatprep.mubr.msk.f32.mxu0 %vm12828_vm1, %v12826_v0 }
0x2bb4   : > { %12271 = vmatpush3.msra.mxu1 %v8972_v37  ;;  %12656 = vset.pattern.permute.xlu0 %v12918_v56 }
0x2bb5   : > { %12272 = vmatprep.subr.mxu1 %v12826_v0  ;;  %9242 = vperm.xlu0 %12656, %v14123_v14  }
0x2bb6   : > { %12273 = vmatpush3.msra.mxu1 %v8970_v22  ;;  %v6751_v22 = vpop.permute.xlu0 %6750 }
0x2bb7   : > { %12274 = vmatprep.subr.mxu1 %v12826_v0 }
0x2bb8   : > { %12275 = vmatpush3.msra.mxu1 %v8968_v42 }
0x2bb9   : > { %12276 = vmatprep.subr.mxu1 %v12826_v0 }
0x2bba   : > { %12277 = vmatpush3.msra.mxu1 %v8966_v60  ;;  %v6824_v60 = vadd.f32 %v14207_v30, %v6751_v22 }
0x2bbb   : > { %12278 = vmatprep.subr.mxu1 %v12826_v0 }
0x2bbc   : > { %12279 = vmatpush3.msra.mxu1 %v8964_v49  ;;  %v12920_v49 = vmov 75  }
0x2bbd   : > { %12280 = vmatprep.subr.mxu1 %v12826_v0 }
0x2bbe   : > { %12281 = vmatpush3.msra.mxu1 %v8962_v61 }
0x2bbf   : > { %12282 = vmatprep.subr.mxu1 %v12826_v0 }
0x2bc0   : > { %12283 = vmatpush3.msra.mxu1 %v8960_v51  ;;  %v12921_v51 = vmov 100  }
0x2bc1   : > { %12285 = vmatmul.mubr.msk.f32.vlgmr.msra.gmra.mxu1 %vm887_vm7, %v13273_v62  ;;  %12306 = vmatprep.subr.mxu1 %v12826_v0 }
0x2bc2   : > { %12307 = vmatpush3.msra.mxu1 %v9162_v35  ;;  %12322 = vmatprep.mubr.msk.f32.mxu1 %vm12828_vm1, %v12826_v0  ;;  %v6827_v35 = vadd.f32 %v6824_v60, %v14071_v53 }
0x2bc3   : > { %12308 = vmatprep.subr.mxu1 %v12826_v0 }
0x2bc4   : > { %12309 = vmatpush3.msra.mxu1 %v9160_v52 }
0x2bc5   : > { %12310 = vmatprep.subr.mxu1 %v12826_v0 }
0x2bc6   : > { %12311 = vmatpush3.msra.mxu1 %v9158_v3 }
0x2bc7   : > { %12312 = vmatprep.subr.mxu1 %v12826_v0 }
0x2bc8   : > { %12313 = vmatpush3.msra.mxu1 %v9156_v5 }
0x2bc9   : > { %12314 = vmatprep.subr.mxu1 %v12826_v0 }
0x2bca   : > { %12315 = vmatpush3.msra.mxu1 %v9154_v40 }
0x2bcb   : > { %12316 = vmatprep.subr.mxu1 %v12826_v0 }
0x2bcc   : > { %12317 = vmatpush3.msra.mxu1 %v9152_v15 }
0x2bcd   : > { %12318 = vmatprep.subr.mxu1 %v12826_v0 }
0x2bce   : > { %12319 = vmatpush3.msra.mxu1 %v9150_v45 }
0x2bcf   : > { %12320 = vmatprep.subr.mxu1 %v12826_v0 }
0x2bd0   : > { %12321 = vmatpush3.msra.mxu1 %v9148_v47 }
0x2bd1   : > { %12323 = vmatmul.mubr.msk.f32.vlgmr.msra.gmra.mxu1 %vm887_vm7, %v13273_v62  ;;  %12356 = vmatprep.subr.mxu1 %v12826_v0 }
0x2bd2   : > { %12357 = vmatpush3.msra.mxu1 %v9498_v16  ;;  %12364 = vmatprep.mubr.msk.f32.mxu1 %vm12828_vm1, %v12826_v0 }
0x2bd3   : > { %12358 = vmatprep.subr.mxu1 %v12826_v0 }
0x2bd4   : > { %12359 = vmatpush3.msra.mxu1 %v9496_v18 }
0x2bd5   : > { %12360 = vmatprep.subr.mxu1 %v12826_v0 }
0x2bd6   : > { %12361 = vmatpush3.msra.mxu1 %v9494_v11 }
0x2bd7   : > { %12362 = vmatprep.subr.mxu1 %v12826_v0 }
0x2bd8   : > { %12363 = vmatpush3.msra.mxu1 %v9492_v19 }
0x2bd9   : > { %12365 = vmatmul.mubr.msk.f32.vlgmr.msra.gmra.mxu1 %vm1219_vm9, %v13349_v29  ;;  %12376 = vmatprep.subr.mxu1 %v12826_v0 }
0x2bda   : > { %12377 = vmatpush3.msra.mxu1 %v14000_v32  ;;  %12382 = vmatprep.mubr.msk.f32.mxu1 %vm12828_vm1, %v12826_v0  ;;  %v14439_v32 = vld [vmem:[#allocation7 + $0x28] sm:$0xff] }
0x2bdb   : > { %12378 = vmatprep.subr.mxu1 %v12826_v0  ;;  %9327 = vrot.lane.b32.xlu1 %v14439_v32, %s12859_s21  ;;  %s12917_s21 = smov 27  }
0x2bdc   : > { %12379 = vmatpush3.msra.mxu1 %v13998_v44  ;;  %9729 = vrot.lane.b32.xlu0 %v14439_v32, %s12919_s9 }
0x2bdd   : > { %12380 = vmatprep.subr.mxu1 %v12826_v0 }
0x2bde   : > { %12381 = vmatpush3.msra.mxu1 %v13996_v10 }
0x2bdf   : > { %12390 = vmatprep.subr.mxu1 %v12826_v0  ;;  %9415 = vrot.lane.b32.xlu1 %v14156_v23, %s12914_s8 }
0x2be0   : > { %10102 = vrot.lane.b32.xlu0 %v14123_v14, %s12917_s21 }
0x2be3   : > { %9413 = vrot.lane.b32.xlu1 %v14174_v33, %s12914_s8 }
0x2be7   : > { %9411 = vrot.lane.b32.xlu1 %v14160_v31, %s12914_s8 }
0x2beb   : > { %9409 = vrot.lane.b32.xlu1 %v14439_v32, %s12914_s8 }
0x2bef   : > { %8864 = vperm.xlu1 %12655, %v14123_v14  }
0x2bf3   : > { %9655 = vrot.lane.b32.xlu1 %v14123_v14, %s12915_s27 }
0x2bf4   : > { %12657 = vset.pattern.permute.xlu1 %v12920_v49 }
0x2bf7   : > { %9577 = vrot.lane.b32.xlu1 %v14123_v14, %s12916_s20 }
0x2bfb   : > { %9805 = vrot.lane.b32.xlu1 %v14439_v32, %s12917_s21 }
0x2c4d   : > { %v9328_v2 = vpop.permute.xlu1 %9327 }
0x2c51   : > { %v9416_v26 = vpop.permute.xlu1 %9415 }
0x2c55   : > { %v9414_v59 = vpop.permute.xlu1 %9413 }
0x2c59   : > { %v9412_v36 = vpop.permute.xlu1 %9411 }
0x2c5d   : > { %v9410_v27 = vpop.permute.xlu1 %9409 }
0x2c71   : > { %v8785_v10 = vpop.f32.mrf.mxu0  ;;  %v8859_v44 = vpop.f32.mrf.mxu1 }
0x2c72   : > { %12262 = vmatpush3.msra.mxu0 %v8859_v44 }
0x2c73   : > { %v12255_v23 = vpop.f32.mrf.mxu0  ;;  %v12260_v33 = vpop.f32.mrf.mxu1  ;;  %12263 = vmatprep.subr.mxu0 %v12826_v0 }
0x2c74   : > { %12264 = vmatpush3.msra.mxu0 %v8785_v10 }
0x2c75   : > { %12266 = vmatmul.mubr.msk.f32.vlgmr.msra.gmra.mxu0 %vm1061_vm8, %v14380_v41  ;;  %12287 = vmatprep.subr.mxu0 %v12826_v0 }
0x2c76   : > { %12288 = vmatpush3.msra.mxu0 %v14370_v1  ;;  %12303 = vmatprep.mubr.msk.f32.mxu0 %vm12828_vm1, %v12826_v0 }
0x2c77   : > { %12289 = vmatprep.subr.mxu0 %v12826_v0 }
0x2c78   : > { %12290 = vmatpush3.msra.mxu0 %v14372_v38 }
0x2c79   : > { %12291 = vmatprep.subr.mxu0 %v12826_v0 }
0x2c7a   : > { %12292 = vmatpush3.msra.mxu0 %v14374_v48  ;;  %v14529_v48 = vld [vmem:[#allocation6 + $0x38] sm:$0xff] }
0x2c7b   : > { %12293 = vmatprep.subr.mxu0 %v12826_v0  ;;  %10027 = vrot.lane.b32.xlu0 %v14529_v48, %s12884_s13 }
0x2c7c   : > { %12294 = vmatpush3.msra.mxu0 %v14376_v50  ;;  %v12667_v50 = vld [vmem:[#allocation6 + $0x30] sm:$0xff] }
0x2c7d   : > { %12295 = vmatprep.subr.mxu0 %v12826_v0  ;;  %9574 = vperm.xlu1 %12657, %v12667_v50  }
0x2c7e   : > { %12296 = vmatpush3.msra.mxu0 %v14378_v7 }
0x2c7f   : > { %12297 = vmatprep.subr.mxu0 %v12826_v0 }
0x2c80   : > { %12298 = vmatpush3.msra.mxu0 %v14382_v46  ;;  %v9243_v46 = vpop.permute.xlu0 %9242 }
0x2c81   : > { %v9049_v31 = vpop.f32.mrf.mxu1  ;;  %12299 = vmatprep.subr.mxu0 %v12826_v0  ;;  %12658 = vset.pattern.permute.xlu1 %v12921_v51 }
0x2c82   : > { %12300 = vmatpush3.msra.mxu0 %v14384_v54 }
0x2c83   : > { %v12286_v58 = vpop.f32.mrf.mxu1  ;;  %12301 = vmatprep.subr.mxu0 %v12826_v0 }
0x2c84   : > { %12302 = vmatpush3.msra.mxu0 %v14390_v4  ;;  %v9730_v4 = vpop.permute.xlu0 %9729 }
0x2c85   : > { %12304 = vmatmul.mubr.msk.f32.vlgmr.msra.gmra.mxu0 %vm887_vm7, %v13273_v62  ;;  %12325 = vmatprep.subr.mxu0 %v12826_v0  ;;  %v8865_v62 = vpop.permute.xlu1 %8864 }
0x2c86   : > { %12331 = vmatprep.mubr.msk.f32.mxu0 %vm12828_vm1, %v12826_v0 }
0x2c89   : > { %v9656_v57 = vpop.permute.xlu1 %9655 }
0x2c8a   : > { %12383 = vmatmul.mubr.msk.f32.vlgmr.msra.gmra.mxu1 %vm1467_vm10, %v9656_v57 }
0x2c8b   : > { %12392 = vmatprep.mubr.msk.f32.mxu1 %vm12828_vm1, %v12826_v0 }
0x2c8d   : > { %v14482_v8 = vpop.permute.xlu1 %9577 }
0x2c91   : > { %v9237_v25 = vpop.f32.mrf.mxu1  ;;  %v14484_v55 = vpop.permute.xlu1 %9805 }
0x2c92   : > { %12326 = vmatpush3.msra.mxu0 %v9237_v25  ;;  %12391 = vmatpush3.msra.mxu1 %v14484_v55 }
0x2c93   : > { %v12324_v28 = vpop.f32.mrf.mxu1  ;;  %12327 = vmatprep.subr.mxu0 %v12826_v0  ;;  %12400 = vmatprep.subr.mxu1 %v12826_v0 }
0x2c99   : > { %v9569_v21 = vpop.f32.mrf.mxu1 }
0x2c9b   : > { %v12366_v34 = vpop.f32.mrf.mxu1 }
0x2cf8   : > { %v9575_v40 = vpop.permute.xlu1 %9574 }
0x2d35   : > { %v8937_v61 = vpop.f32.mrf.mxu0 }
0x2d36   : > { %v8938_v1 = vadd.f32 %v8937_v61, %v8865_v62 }
0x2d37   : > { %v12267_v37 = vpop.f32.mrf.mxu0 }
0x2d38   : > { %v8941_v38 = vmul.f32 %v8938_v1, %v6827_v35 }
0x2d3a   : > { %v14495_v42 = vadd.f32 %v8941_v38, %v14021_v24 }
0x2d3c   : > { %12393 = vmatmul.mubr.msk.f32.vlgmr.msra.gmra.mxu1 %vm772_vm6, %v14495_v42 }
0x2d3d   : > { %12401 = vmatpush3.msra.mxu1 %v14484_v55  ;;  %12402 = vmatprep.mubr.msk.f32.mxu1 %vm12828_vm1, %v12826_v0 }
0x2d3e   : > { %12412 = vmatprep.subr.mxu1 %v12826_v0 }
0x2d45   : > { %v9143_v14 = vpop.f32.mrf.mxu0 }
0x2d46   : > { %12328 = vmatpush3.msra.mxu0 %v9143_v14 }
0x2d47   : > { %v12305_v30 = vpop.f32.mrf.mxu0  ;;  %12329 = vmatprep.subr.mxu0 %v12826_v0 }
0x2d48   : > { %12330 = vmatpush3.msra.mxu0 %v9049_v31 }
0x2d49   : > { %12332 = vmatmul.mubr.msk.f32.vlgmr.msra.gmra.mxu0 %vm1467_vm10, %v9246_v17  ;;  %12334 = vmatprep.subr.mxu0 %v12826_v0 }
0x2d4a   : > { %12335 = vmatpush3.msra.mxu0 %v14397_v12  ;;  %12342 = vmatprep.mubr.msk.f32.mxu0 %vm12828_vm1, %v12826_v0  ;;  %v14527_v24 = vpop.f32.mrf.mxu1 }
0x2d4b   : > { %12336 = vmatprep.subr.mxu0 %v12826_v0 }
0x2d4c   : > { %12337 = vmatpush3.msra.mxu0 %v9332_v13  ;;  %v12384_v53 = vpop.f32.mrf.mxu1 }
0x2d4d   : > { %12338 = vmatprep.subr.mxu0 %v12826_v0 }
0x2d4e   : > { %12339 = vmatpush3.msra.mxu0 %v14402_v9  ;;  %v10103_v9 = vpop.permute.xlu0 %10102 }
0x2d4f   : > { %12340 = vmatprep.subr.mxu0 %v12826_v0 }
0x2d50   : > { %12341 = vmatpush3.msra.mxu0 %v9328_v2 }
0x2d51   : > { %12343 = vmatmul.mubr.msk.f32.vlgmr.msra.gmra.mxu0 %vm1219_vm9, %v13349_v29  ;;  %12345 = vmatprep.subr.mxu0 %v12826_v0 }
0x2d52   : > { %12346 = vmatpush3.msra.mxu0 %v9416_v26  ;;  %12353 = vmatprep.mubr.msk.f32.mxu0 %vm12828_vm1, %v12826_v0  ;;  %v10028_v47 = vpop.permute.xlu0 %10027 }
0x2d53   : > { %12347 = vmatprep.subr.mxu0 %v12826_v0 }
0x2d54   : > { %12348 = vmatpush3.msra.mxu0 %v9414_v59 }
0x2d55   : > { %12349 = vmatprep.subr.mxu0 %v12826_v0 }
0x2d56   : > { %12350 = vmatpush3.msra.mxu0 %v9412_v36  ;;  %v12923_v36 = vmov 37  }
0x2d57   : > { %12351 = vmatprep.subr.mxu0 %v12826_v0  ;;  %12659 = vset.pattern.permute.xlu0 %v12923_v36 }
0x2d58   : > { %12352 = vmatpush3.msra.mxu0 %v9410_v27 }
0x2d59   : > { %12354 = vmatmul.mubr.msk.f32.vlgmr.msra.gmra.mxu0 %vm1219_vm9, %v13349_v29  ;;  %12367 = vmatprep.subr.mxu0 %v12826_v0  ;;  %v10021_v29 = vld [vmem:[#allocation6 + $0x30] sm:$0xff] }
0x2d5a   : > { %12368 = vmatpush3.msra.mxu0 %v9569_v21  ;;  %12373 = vmatprep.mubr.msk.f32.mxu0 %vm12828_vm1, %v12826_v0 }
0x2d5b   : > { %12369 = vmatprep.subr.mxu0 %v12826_v0  ;;  %10025 = vrot.lane.b32.xlu1 %v10021_v29, %s12884_s13  ;;  %s10727_s13 = sshll.u32 %s14631_s19, 3 }
0x2d5c   : > { %s255_s24 = scalar_lea.vmem %s14612_s4, %s10727_s13 }
0x2d5f   : > { %9652 = vperm.xlu1 %12658, %v12667_v50  }
0x2d63   : > { %10537 = vrot.lane.b32.xlu1 %v14529_v48, %s12863_s28  ;;  %s12922_s28 = smov 123  }
0x2d64   : > { %10319 = vrot.lane.b32.xlu0 %v14529_v48, %s12922_s28 }
0x2d68   : > { %10613 = vperm.xlu0 %12659, %v14529_v48  }
0x2dcd   : > { %v10026_v45 = vpop.permute.xlu1 %10025 }
0x2dce   : > { %v10029_v19 = vsel %vm5567_vm14, %v10026_v45, %v10028_v47 }
0x2dd6   : > { %v10320_v28 = vpop.permute.xlu0 %10319 }
0x2dda   : > { %v9653_v10 = vpop.permute.xlu1 %9652 }
0x2ddb   : > { %v9726_v23 = vadd.f32 %v14527_v24, %v9653_v10 }
0x2dde   : > { %v10538_v56 = vpop.permute.xlu1 %10537 }
0x2de3   : > { %v10614_v60 = vpop.permute.xlu0 %10613 }
0x2dfc   : > { %v9874_v7 = vpop.f32.mrf.mxu1 }
0x2dfe   : > { %v12394_v41 = vpop.f32.mrf.mxu1 }
0x2e09   : > { %v9315_v52 = vpop.f32.mrf.mxu0 }
0x2e0a   : > { %v9316_v43 = vadd.f32 %v9315_v52, %v9243_v46 }
0x2e0b   : > { %v12333_v54 = vpop.f32.mrf.mxu0 }
0x2e0c   : > { %12403 = vmatmul.mubr.msk.f32.vlgmr.msra.gmra.mxu1 %vm772_vm6, %v9316_v43 }
0x2e0d   : > { %12413 = vmatpush3.msra.mxu1 %v9874_v7  ;;  %12416 = vmatprep.mubr.msk.f32.mxu1 %vm12828_vm1, %v12826_v0 }
0x2e0e   : > { %12414 = vmatprep.subr.mxu1 %v12826_v0 }
0x2e11   : > { %v9405_v63 = vpop.f32.mrf.mxu0 }
0x2e13   : > { %v12344_v39 = vpop.f32.mrf.mxu0 }
0x2e19   : > { %v9487_v6 = vpop.f32.mrf.mxu0 }
0x2e1a   : > { %12370 = vmatpush3.msra.mxu0 %v9487_v6 }
0x2e1b   : > { %v12355_v3 = vpop.f32.mrf.mxu0  ;;  %12371 = vmatprep.subr.mxu0 %v12826_v0 }
0x2e1c   : > { %12372 = vmatpush3.msra.mxu0 %v9405_v63 }
0x2e1d   : > { %12374 = vmatmul.mubr.msk.f32.vlgmr.msra.gmra.mxu0 %vm1467_vm10, %v14482_v8  ;;  %12385 = vmatprep.subr.mxu0 %v12826_v0 }
0x2e1e   : > { %12386 = vmatpush3.msra.mxu0 %v9730_v4  ;;  %12387 = vmatprep.mubr.msk.f32.mxu0 %vm12828_vm1, %v12826_v0 }
0x2e1f   : > { %12395 = vmatprep.subr.mxu0 %v12826_v0 }
0x2e21   : > { %12388 = vmatmul.mubr.msk.f32.vlgmr.msra.gmra.mxu0 %vm772_vm6, %v14495_v42 }
0x2e22   : > { %12396 = vmatpush3.msra.mxu0 %v9730_v4  ;;  %12397 = vmatprep.mubr.msk.f32.mxu0 %vm12828_vm1, %v12826_v0 }
0x2e23   : > { %12405 = vmatprep.subr.mxu0 %v12826_v0 }
0x2e25   : > { %12398 = vmatmul.mubr.msk.f32.vlgmr.msra.gmra.mxu0 %vm772_vm6, %v9316_v43 }
0x2e26   : > { %12409 = vmatprep.mubr.msk.f32.mxu0 %vm12828_vm1, %v12826_v0 }
0x2ecc   : > { %v10017_v5 = vpop.f32.mrf.mxu1 }
0x2ecd   : > { %12406 = vmatpush3.msra.mxu0 %v10017_v5 }
0x2ece   : > { %v12404_v12 = vpop.f32.mrf.mxu1  ;;  %12407 = vmatprep.subr.mxu0 %v12826_v0 }
0x2edd   : > { %v9647_v15 = vpop.f32.mrf.mxu0 }
0x2ede   : > { %v9648_v20 = vadd.f32 %v9647_v15, %v9575_v40 }
0x2edf   : > { %v12375_v16 = vpop.f32.mrf.mxu0 }
0x2ee1   : > { %v9801_v18 = vpop.f32.mrf.mxu0 }
0x2ee2   : > { %12415 = vmatpush3.msra.mxu1 %v9801_v18 }
0x2ee3   : > { %v12389_v11 = vpop.f32.mrf.mxu0  ;;  %12417 = vmatmul.mubr.msk.f32.vlgmr.msra.gmra.mxu1 %vm1061_vm8, %v10103_v9  ;;  %12424 = vmatprep.subr.mxu1 %v12826_v0 }
0x2ee4   : > { %12425 = vmatpush3.msra.mxu1 %v14484_v55  ;;  %12426 = vmatprep.mubr.msk.f32.mxu1 %vm12828_vm1, %v12826_v0 }
0x2ee5   : > { %v9947_v32 = vpop.f32.mrf.mxu0  ;;  %12436 = vmatprep.subr.mxu1 %v12826_v0 }
0x2ee6   : > { %12408 = vmatpush3.msra.mxu0 %v9947_v32 }
0x2ee7   : > { %v12399_v44 = vpop.f32.mrf.mxu0  ;;  %12410 = vmatmul.mubr.msk.f32.vlgmr.msra.gmra.mxu0 %vm1061_vm8, %v10029_v19  ;;  %12419 = vmatprep.subr.mxu0 %v12826_v0 }
0x2ee8   : > { %12427 = vmatmul.mubr.msk.f32.vlgmr.msra.gmra.mxu1 %vm772_vm6, %v9648_v20  ;;  %12420 = vmatpush3.msra.mxu0 %v9730_v4 }
0x2ee9   : > { %12437 = vmatpush3.msra.mxu1 %v9730_v4  ;;  %12421 = vmatprep.mubr.msk.f32.mxu0 %vm12828_vm1, %v12826_v0 }
0x2eea   : > { %12438 = vmatprep.mubr.msk.f32.mxu1 %vm12828_vm1, %v12826_v0  ;;  %12429 = vmatprep.subr.mxu0 %v12826_v0 }
0x2eeb   : > { %12422 = vmatmul.mubr.msk.f32.vlgmr.msra.gmra.mxu0 %vm772_vm6, %v9648_v20  ;;  %12446 = vmatprep.subr.mxu1 %v12826_v0 }
0x2eec   : > { %12439 = vmatmul.mubr.msk.f32.vlgmr.msra.gmra.mxu1 %vm772_vm6, %v9726_v23  ;;  %12433 = vmatprep.mubr.msk.f32.mxu0 %vm12828_vm1, %v12826_v0 }
0x2eed   : > { %12450 = vmatprep.mubr.msk.f32.mxu1 %vm12828_vm1, %v12826_v0 }
0x2fa3   : > { %v10172_v33 = vpop.f32.mrf.mxu1 }
0x2fa5   : > { %v12418_v31 = vpop.f32.mrf.mxu1 }
0x2fa7   : > { %v10098_v58 = vpop.f32.mrf.mxu0 }
0x2fa8   : > { %v10173_v17 = vadd.f32 %v10172_v33, %v10098_v58  ;;  %v10315_v13 = vpop.f32.mrf.mxu1 }
0x2fa9   : > { %12430 = vmatpush3.msra.mxu0 %v10315_v13  ;;  %v12411_v2 = vpop.f32.mrf.mxu0 }
0x2faa   : > { %v12428_v25 = vpop.f32.mrf.mxu1  ;;  %12431 = vmatprep.subr.mxu0 %v12826_v0 }
0x2fab   : > { %v10245_v26 = vpop.f32.mrf.mxu0 }
0x2fac   : > { %v10463_v21 = vpop.f32.mrf.mxu1  ;;  %12432 = vmatpush3.msra.mxu0 %v10245_v26 }
0x2fad   : > { %v12423_v59 = vpop.f32.mrf.mxu0  ;;  %12434 = vmatmul.mubr.msk.f32.vlgmr.msra.gmra.mxu0 %vm1061_vm8, %v10320_v28  ;;  %12441 = vmatprep.subr.mxu0 %v12826_v0 }
0x2fae   : > { %v12440_v34 = vpop.f32.mrf.mxu1  ;;  %12442 = vmatpush3.msra.mxu0 %v14484_v55  ;;  %12443 = vmatprep.mubr.msk.f32.mxu0 %vm12828_vm1, %v12826_v0  ;;  %vm10617_vm1 = vcmask 31744  }
0x2fb1   : > { %12444 = vmatmul.mubr.msk.f32.vlgmr.msra.gmra.mxu0 %vm772_vm6, %v9726_v23 }
0x306d   : > { %v10389_v27 = vpop.f32.mrf.mxu0 }
0x306e   : > { %v10393_v62 = vadd.f32 %v10389_v27, %v10173_v17 }
0x306f   : > { %v12435_v57 = vpop.f32.mrf.mxu0 }
0x3071   : > { %v10533_v8 = vpop.f32.mrf.mxu0 }
0x3072   : > { %12447 = vmatpush3.msra.mxu1 %v10533_v8 }
0x3073   : > { %v12445_v22 = vpop.f32.mrf.mxu0  ;;  %12448 = vmatprep.subr.mxu1 %v12826_v0 }
0x3074   : > { %12449 = vmatpush3.msra.mxu1 %v10463_v21 }
0x3075   : > { %12451 = vmatmul.mubr.msk.f32.vlgmr.msra.gmra.mxu1 %vm1061_vm8, %v10538_v56 }
0x3135   : > { %v10607_v55 = vpop.f32.mrf.mxu1 }
0x3136   : > { %v10611_v61 = vadd.f32 %v10607_v55, %v10393_v62 }
0x3137   : > { %v12452_v35 = vpop.f32.mrf.mxu1 }
0x3138   : > { %v10616_v1 = vadd.f32 %v10614_v60, %v10611_v61 }
0x313a   : > { %10618 = vst.msk [vmem:[%s255_s24] sm:$0xff] %vm10617_vm1, %v10616_v1 }
0x313b PF: > { %p16_p4 = scmp.ge.s32.totalorder %s13019_s22, 4   ;;  %s14626_s15 = smov %s12808_s16 }
0x313c   : > { %s14627_s16 = smov %s12812_s17  ;;  %s14628_s17 = smov %s13029_s26 }
0x313d   : > { %s14629_s18 = smov %s13019_s22  ;;  %18 = sbr.rel (!%p16_p4) target bundleno = 5 (0x5), region = 88 }
0x3142   :  { %10638 = vsyncpa [#allocation3], 1 }
0x3143   :  { %10640 = vsyncpa [#allocation3 + $0x1], 1 }
0x3144   :  { %10641 = vsyncpa [#allocation5], 1 }
0x3145   :  { %10642 = vsyncpa [#allocation8], 1 }

</bundles_post_ra>
